<compile_context>
chip_gen: v6e
topology: v6e:2x2x1
jax: 0.10.0
libtpu: 0.0.40
codegen_flags: <defaults>
</compile_context>

<pallas_src>
import functools

import jax
import jax.numpy as jnp
from jax import lax
from jax.experimental import pallas as pl
from jax.experimental.pallas import tpu as pltpu

EPS = 1e-5
LANE = 128


def _round_up(x, m):
    return (x + m - 1) // m * m


def _itemsize(dt):
    return jnp.dtype(dt).itemsize


def _vmem_capacity_bytes():
    """Generation-aware VMEM capacity; falls back to v7x's 64 MiB per core."""
    try:
        return int(pltpu.get_tpu_info().vmem_capacity_bytes)
    except Exception:
        return 64 * 1024 * 1024


# ----------------------------------------------------------------------------
# Pallas kernel: in-VMEM 9-tap 3x3 conv + BN (+ fused 1x1 shortcut) + ReLU
# ----------------------------------------------------------------------------
def _conv3x3_bn_act_kernel(*refs, stride, hph, out_hw, apply_relu, has_res):
    """One grid step == one batch image.

    VMEM blocks:
      xph_ref  : (1, s*s*hph, wph, Cin)  phase-stacked padded input (bf16)
      w_ref    : (9, Cin, Cpad)          3x3 weights, BN scale folded in (bf16)
      shift_ref: (1, Cpad)               BN shift (f32)
      [xs_ref  : (1, Ho*Wo, Cr)          shortcut activations (bf16)]
      [wr_ref  : (Cr, Cpad)              1x1 shortcut weights / identity (bf16)]
      [sr_ref  : (1, Cpad)               shortcut BN shift (f32)]
      o_ref    : (1, Ho*Wo, Cpad)        output (bf16 intermediate / f32 final)
      acc_ref  : (Ho*Wo, Cpad) f32       accumulator scratch
    """
    if has_res:
        xph_ref, w_ref, shift_ref, xs_ref, wr_ref, sr_ref, o_ref, acc_ref = refs
    else:
        xph_ref, w_ref, shift_ref, o_ref, acc_ref = refs
    Ho, Wo = out_hw
    s = stride

    acc_ref[...] = jnp.zeros_like(acc_ref)

    # 9-tap accumulating matmul: every tap is a *contiguous* (Ho, Wo, Cin)
    # window of the phase-stacked input (stride handled on the host by the
    # phase packing), so there is no im2col buffer and no strided in-kernel
    # load.  Unrolled: 9 static slices + 9 MXU matmuls into the f32 scratch.
    for kh in range(3):
        for kw in range(3):
            phase = (kh % s) * s + (kw % s)
            row0 = phase * hph + kh // s
            col0 = kw // s
            win = xph_ref[0, pl.ds(row0, Ho), pl.ds(col0, Wo), :]
            lhs = win.reshape(Ho * Wo, win.shape[-1])
            acc_ref[...] += jnp.dot(lhs, w_ref[kh * 3 + kw],
                                    preferred_element_type=jnp.float32)

    y = acc_ref[...] + shift_ref[...]          # BN shift (scale folded into W)
    if has_res:
        # Fused 1x1-conv shortcut (identity handled via an eye weight matrix).
        y = y + jnp.dot(xs_ref[0], wr_ref[...],
                        preferred_element_type=jnp.float32) + sr_ref[...]
    if apply_relu:
        y = jnp.maximum(y, 0.0)
    o_ref[0] = y.astype(o_ref.dtype)


def conv3x3_bn_act(xph, w, shift, *, stride, hph, out_hw, residual=None,
                   apply_relu=True, out_dtype=jnp.float32):
    """relu?( conv3x3(x)*bn_scale + bn_shift [+ fused 1x1 shortcut] ) per image."""
    N = xph.shape[0]
    Ho, Wo = out_hw
    M = Ho * Wo
    Cpad = w.shape[-1]
    has_res = residual is not None
    if has_res:
        xs, wr, sr = residual

    xph_blk = (1,) + tuple(xph.shape[1:])
    in_specs = [
        pl.BlockSpec(xph_blk, lambda n: (n, 0, 0, 0)),        # per-image input
        pl.BlockSpec(tuple(w.shape), lambda n: (0, 0, 0)),     # resident weights
        pl.BlockSpec(tuple(shift.shape), lambda n: (0, 0)),    # resident shift
    ]
    args = [xph, w, shift]
    if has_res:
        in_specs += [
            pl.BlockSpec((1, M, xs.shape[-1]), lambda n: (n, 0, 0)),
            pl.BlockSpec(tuple(wr.shape), lambda n: (0, 0)),
            pl.BlockSpec(tuple(sr.shape), lambda n: (0, 0)),
        ]
        args += [xs, wr, sr]
    out_spec = pl.BlockSpec((1, M, Cpad), lambda n: (n, 0, 0))

    # Generation-aware VMEM limit: double-buffered blocks + f32 accumulator,
    # 4x headroom, capped at half the per-core capacity (v7x: 64 MiB).
    def blk_bytes(shape, dtype):
        sz = 1
        for d in shape:
            sz *= int(d)
        return sz * _itemsize(dtype)

    need = (2 * blk_bytes(xph_blk, xph.dtype)
            + 2 * blk_bytes(w.shape, w.dtype)
            + 2 * blk_bytes(shift.shape, shift.dtype)
            + 2 * blk_bytes((1, M, Cpad), out_dtype)
            + blk_bytes((M, Cpad), jnp.float32))
    flops = 2 * N * 9 * M * xph.shape[-1] * Cpad
    if has_res:
        need += (2 * blk_bytes((1, M, xs.shape[-1]), xs.dtype)
                 + 2 * blk_bytes(wr.shape, wr.dtype)
                 + 2 * blk_bytes(sr.shape, sr.dtype))
        flops += 2 * N * M * xs.shape[-1] * Cpad
    vmem_limit = int(min(max(4 * need, 8 * 1024 * 1024),
                         _vmem_capacity_bytes() // 2))

    bytes_accessed = (sum(int(a.size) * _itemsize(a.dtype) for a in args)
                      + N * M * Cpad * _itemsize(out_dtype))
    cost = pl.CostEstimate(flops=int(flops), transcendentals=0,
                           bytes_accessed=int(bytes_accessed))

    kern = functools.partial(_conv3x3_bn_act_kernel, stride=stride, hph=hph,
                             out_hw=out_hw, apply_relu=apply_relu,
                             has_res=has_res)
    return pl.pallas_call(
        kern,
        out_shape=jax.ShapeDtypeStruct((N, M, Cpad), out_dtype),
        grid=(N,),
        in_specs=in_specs,
        out_specs=out_spec,
        scratch_shapes=[pltpu.VMEM((M, Cpad), jnp.float32)],
        compiler_params=pltpu.CompilerParams(
            dimension_semantics=("parallel",),   # N >= 2 -> both v7x cores busy
            vmem_limit_bytes=vmem_limit),
        cost_estimate=cost,
    )(*args)


# ----------------------------------------------------------------------------
# Host-side glue (phase stacking, weight/BN folding) -- plain JAX, tiny passes
# ----------------------------------------------------------------------------
def _phase_stack(x_nhwc, k, stride, pad):
    """Spatial pad + space-to-depth so every (kh, kw) tap of a k x k / stride-s
    conv is a contiguous (Ho, Wo, C) window of the result.

    xph[n, (p*stride+q)*hph + i, j, c] == x_padded[n, stride*i + p, stride*j + q, c]
    """
    N, H, W, C = x_nhwc.shape
    Ho = (H + 2 * pad - k) // stride + 1
    Wo = (W + 2 * pad - k) // stride + 1
    hph = Ho + (k - 1) // stride
    wph = Wo + (k - 1) // stride
    ph_h, ph_w = stride * hph, stride * wph
    xp = jnp.pad(x_nhwc, ((0, 0),
                          (pad, max(0, ph_h - H - pad)),
                          (pad, max(0, ph_w - W - pad)),
                          (0, 0)))[:, :ph_h, :ph_w, :]
    xp = xp.reshape(N, hph, stride, wph, stride, C)
    xp = jnp.transpose(xp, (0, 2, 4, 1, 3, 5))
    xp = xp.reshape(N, stride * stride * hph, wph, C)
    return xp, (Ho, Wo), hph


def _fold_bn_3x3(w_oihw, bias, gamma, beta, mean, var, *, in_pad, out_pad):
    """-> w: (9, in_pad, out_pad) bf16 with BN scale folded into the columns,
          shift: (1, out_pad) f32 (zero in the pad lanes)."""
    cout, cin = w_oihw.shape[0], w_oihw.shape[1]
    scale = gamma / jnp.sqrt(var + EPS)
    wk = jnp.transpose(w_oihw, (2, 3, 1, 0)).reshape(9, cin, cout)
    wk = (wk * scale[None, None, :]).astype(jnp.bfloat16)
    wk = jnp.pad(wk, ((0, 0), (0, in_pad - cin), (0, out_pad - cout)))
    shift = ((bias - mean) * scale + beta).astype(jnp.float32)
    shift = jnp.pad(shift, (0, out_pad - cout)).reshape(1, out_pad)
    return wk, shift


def _fold_bn_1x1(w_oihw, bias, gamma, beta, mean, var, out_pad):
    cout, cin = w_oihw.shape[0], w_oihw.shape[1]
    scale = gamma / jnp.sqrt(var + EPS)
    wk = (w_oihw.reshape(cout, cin).T * scale[None, :]).astype(jnp.bfloat16)
    wk = jnp.pad(wk, ((0, 0), (0, out_pad - cout)))
    shift = ((bias - mean) * scale + beta).astype(jnp.float32)
    shift = jnp.pad(shift, (0, out_pad - cout)).reshape(1, out_pad)
    return wk, shift


def basic_block_forward(x_nchw, p, stride):
    """mode='encode' BasicBlock: relu(bn2(conv2(relu(bn1(conv1(x))))) + shortcut)."""
    x = jnp.transpose(x_nchw, (0, 2, 3, 1)).astype(jnp.bfloat16)     # NHWC bf16
    N, H, W, Cin = x.shape
    Cout = p['conv1_w'].shape[0]
    Cpad = _round_up(Cout, LANE)        # lane-dense outputs / MXU tiles

    # ---- conv1 (3x3, stride, pad 1) + bn1 + relu  ->  bf16 intermediate -----
    xph1, (Ho, Wo), hph1 = _phase_stack(x, 3, stride, 1)
    w1, s1 = _fold_bn_3x3(p['conv1_w'], p['conv1_b'], p['bn1_g'], p['bn1_b'],
                          p['bn1_m'], p['bn1_v'], in_pad=Cin, out_pad=Cpad)
    y1 = conv3x3_bn_act(xph1, w1, s1, stride=stride, hph=hph1, out_hw=(Ho, Wo),
                        apply_relu=True, out_dtype=jnp.bfloat16)   # (N,Ho*Wo,Cpad)

    # ---- shortcut operands (fused into conv2; identity via eye weights) -----
    if (N, Cout, Ho, Wo) != tuple(x_nchw.shape):
        # 1x1 conv, stride s, pad 0 (matches the 3x3/pad=1 output grid).
        xs = x[:, ::stride, ::stride, :].reshape(N, Ho * Wo, Cin)
        wr, sr = _fold_bn_1x1(p['resize_w'], p['resize_b'], p['bnr_g'],
                              p['bnr_b'], p['bnr_m'], p['bnr_v'], Cpad)
    else:
        xs = x.reshape(N, Ho * Wo, Cin)
        wr = jnp.pad(jnp.eye(Cin, dtype=jnp.bfloat16), ((0, 0), (0, Cpad - Cin)))
        sr = jnp.zeros((1, Cpad), jnp.float32)

    # ---- conv2 (3x3, stride 1, pad 1) + bn2 + shortcut + relu ---------------
    y1_img = y1.reshape(N, Ho, Wo, Cpad)
    xph2, _, hph2 = _phase_stack(y1_img, 3, 1, 1)
    w2, s2 = _fold_bn_3x3(p['conv2_w'], p['conv2_b'], p['bn2_g'], p['bn2_b'],
                          p['bn2_m'], p['bn2_v'], in_pad=Cpad, out_pad=Cpad)
    y2 = conv3x3_bn_act(xph2, w2, s2, stride=1, hph=hph2, out_hw=(Ho, Wo),
                        residual=(xs, wr, sr), apply_relu=True,
                        out_dtype=jnp.float32)                     # (N,Ho*Wo,Cpad)

    out = y2[:, :, :Cout].reshape(N, Ho, Wo, Cout)
    return jnp.transpose(out, (0, 3, 1, 2)).astype(jnp.float32)     # NCHW


# ----------------------------------------------------------------------------
# Pure-JAX f32 reference (mirrors PyTorch NCHW semantics) for a sanity check
# ----------------------------------------------------------------------------
def ref_forward(x, p, stride):
    def conv(x, w, b, s, pad):
        y = lax.conv_general_dilated(
            x, w, (s, s), [(pad, pad), (pad, pad)],
            dimension_numbers=('NCHW', 'OIHW', 'NCHW'))
        return y + b[None, :, None, None]

    def bn(x, g, be, m, v):
        return ((x - m[None, :, None, None]) /
                jnp.sqrt(v[None, :, None, None] + EPS) *
                g[None, :, None, None] + be[None, :, None, None])

    y = conv(x, p['conv1_w'], p['conv1_b'], stride, 1)
    y = jnp.maximum(bn(y, p['bn1_g'], p['bn1_b'], p['bn1_m'], p['bn1_v']), 0.0)
    y = conv(y, p['conv2_w'], p['conv2_b'], 1, 1)
    y = bn(y, p['bn2_g'], p['bn2_b'], p['bn2_m'], p['bn2_v'])
    if y.shape != x.shape:
        sc = conv(x, p['resize_w'], p['resize_b'], stride, 0)
        sc = bn(sc, p['bnr_g'], p['bnr_b'], p['bnr_m'], p['bnr_v'])
        y = y + sc
    else:
        y = y + x
    return jnp.maximum(y, 0.0)


# ----------------------------------------------------------------------------
def make_params(key, in_channels, out_channels):
    ks = jax.random.split(key, 16)
    n = lambda k, shp, s=0.1: s * jax.random.normal(k, shp, jnp.float32)
    Cin, Cout = in_channels, out_channels
    return {
        'conv1_w': n(ks[0], (Cout, Cin, 3, 3)),
        'conv1_b': n(ks[1], (Cout,)),
        'conv2_w': n(ks[2], (Cout, Cout, 3, 3)),
        'conv2_b': n(ks[3], (Cout,)),
        'resize_w': n(ks[4], (Cout, Cin, 1, 1)),
        'resize_b': n(ks[5], (Cout,)),
        'bn1_g': 1.0 + n(ks[6], (Cout,)),
        'bn1_b': n(ks[7], (Cout,)),
        'bn1_m': n(ks[8], (Cout,)),
        'bn1_v': 0.5 + jnp.abs(n(ks[9], (Cout,))),
        'bn2_g': 1.0 + n(ks[10], (Cout,)),
        'bn2_b': n(ks[11], (Cout,)),
        'bn2_m': n(ks[12], (Cout,)),
        'bn2_v': 0.5 + jnp.abs(n(ks[13], (Cout,))),
        'bnr_g': 1.0 + n(ks[14], (Cout,)),
        'bnr_b': n(ks[15], (Cout,)),
        'bnr_m': jnp.zeros((Cout,), jnp.float32),
        'bnr_v': jnp.ones((Cout,), jnp.float32),
    }


if __name__ == "__main__":
    key = jax.random.PRNGKey(0)
    kx, kp = jax.random.split(key)

    in_channels, out_channels, stride = 4, 8, 2      # mode='encode'
    x = jax.random.normal(kx, (2, in_channels, 16, 16), jnp.float32)
    params = make_params(kp, in_channels, out_channels)

    fwd = jax.jit(basic_block_forward, static_argnums=2)
    out = jax.block_until_ready(fwd(x, params, stride))

    ref = jax.block_until_ready(ref_forward(x, params, stride))
    assert out.shape == ref.shape == (2, out_channels, 8, 8)
    max_err = jnp.max(jnp.abs(out - ref))
    # bf16 MXU inputs -> loosen tolerance vs the f32 reference.
    assert jnp.allclose(out, ref, atol=5e-2, rtol=5e-2), \
        f"max abs err {max_err}"

    print("KERNEL_OK")
</pallas_src>

<mosaic_0001>
module attributes {stable_mosaic.version = 11 : i64} {
  func.func @_conv3x3_bn_act_kernel(%arg0: i32, %arg1: memref<1x36x9x4xbf16, #tpu.memory_space<vmem>>, %arg2: memref<9x4x128xbf16, #tpu.memory_space<vmem>>, %arg3: memref<1x128xf32, #tpu.memory_space<vmem>>, %arg4: memref<1x64x128xbf16, #tpu.memory_space<vmem>>, %arg5: memref<64x128xf32, #tpu.memory_space<vmem>>) attributes {dimension_semantics = [#tpu.dimension_semantics<parallel>], iteration_bounds = array<i64: 2>, scalar_prefetch = 0 : i64, scratch_operands = 1 : i64, tpu.core_type = #tpu.core_type<tc>, window_params = [{transform_indices = @transform_0, window_bounds = array<i64: 1, 36, 9, 4>}, {pipeline_mode = #tpu.pipeline_mode<synchronous>, transform_indices = @transform_1, window_bounds = array<i64: 9, 4, 128>}, {pipeline_mode = #tpu.pipeline_mode<synchronous>, transform_indices = @transform_2, window_bounds = array<i64: 1, 128>}, {transform_indices = @transform_3, window_bounds = array<i64: 1, 64, 128>}]} {
    %cst = arith.constant 0.000000e+00 : f32
    %0 = vector.broadcast %cst : f32 to vector<64x128xf32>
    %c0 = arith.constant 0 : index
    %c0_0 = arith.constant 0 : index
    %1 = vector.load %arg5[%c0, %c0_0] : memref<64x128xf32, #tpu.memory_space<vmem>>, vector<64x128xf32>
    tpu.vector_store %arg5[%c0, %c0_0], %0 {strides = array<i32>} : memref<64x128xf32, #tpu.memory_space<vmem>>, vector<64x128xf32>,
    %c0_1 = arith.constant 0 : index
    %c0_2 = arith.constant 0 : index
    %c0_3 = arith.constant 0 : index
    %c0_4 = arith.constant 0 : index
    %2 = vector.load %arg1[%c0_1, %c0_2, %c0_3, %c0_4] : memref<1x36x9x4xbf16, #tpu.memory_space<vmem>>, vector<1x8x8x4xbf16>
    %3 = vector.shape_cast %2 : vector<1x8x8x4xbf16> to vector<8x8x4xbf16>
    %4 = vector.shape_cast %3 : vector<8x8x4xbf16> to vector<64x4xbf16>
    %c0_5 = arith.constant 0 : index
    %c0_6 = arith.constant 0 : index
    %5 = vector.load %arg5[%c0_5, %c0_6] : memref<64x128xf32, #tpu.memory_space<vmem>>, vector<64x128xf32>
    %c0_7 = arith.constant 0 : index
    %c0_8 = arith.constant 0 : index
    %c0_9 = arith.constant 0 : index
    %6 = vector.load %arg2[%c0_7, %c0_8, %c0_9] : memref<9x4x128xbf16, #tpu.memory_space<vmem>>, vector<1x4x128xbf16>
    %7 = vector.shape_cast %6 : vector<1x4x128xbf16> to vector<4x128xbf16>
    %cst_10 = arith.constant dense<0.000000e+00> : vector<64x128xf32>
    %8 = tpu.matmul %4, %7, %cst_10 {dimension_numbers = #tpu.dot_dimension_numbers<[1], [0], [0], [1], [0, 0, 1, 1], [], []>} : vector<64x4xbf16>, vector<4x128xbf16>, vector<64x128xf32> -> vector<64x128xf32>
    %9 = arith.addf %5, %8 : vector<64x128xf32>
    %c0_11 = arith.constant 0 : index
    %c0_12 = arith.constant 0 : index
    %10 = vector.load %arg5[%c0_11, %c0_12] : memref<64x128xf32, #tpu.memory_space<vmem>>, vector<64x128xf32>
    tpu.vector_store %arg5[%c0_11, %c0_12], %9 {strides = array<i32>} : memref<64x128xf32, #tpu.memory_space<vmem>>, vector<64x128xf32>,
    %c0_13 = arith.constant 0 : index
    %c9 = arith.constant 9 : index
    %c0_14 = arith.constant 0 : index
    %c0_15 = arith.constant 0 : index
    %11 = vector.load %arg1[%c0_13, %c9, %c0_14, %c0_15] : memref<1x36x9x4xbf16, #tpu.memory_space<vmem>>, vector<1x8x8x4xbf16>
    %12 = vector.shape_cast %11 : vector<1x8x8x4xbf16> to vector<8x8x4xbf16>
    %13 = vector.shape_cast %12 : vector<8x8x4xbf16> to vector<64x4xbf16>
    %c0_16 = arith.constant 0 : index
    %c0_17 = arith.constant 0 : index
    %14 = vector.load %arg5[%c0_16, %c0_17] : memref<64x128xf32, #tpu.memory_space<vmem>>, vector<64x128xf32>
    %c1 = arith.constant 1 : index
    %c0_18 = arith.constant 0 : index
    %c0_19 = arith.constant 0 : index
    %15 = vector.load %arg2[%c1, %c0_18, %c0_19] : memref<9x4x128xbf16, #tpu.memory_space<vmem>>, vector<1x4x128xbf16>
    %16 = vector.shape_cast %15 : vector<1x4x128xbf16> to vector<4x128xbf16>
    %cst_20 = arith.constant dense<0.000000e+00> : vector<64x128xf32>
    %17 = tpu.matmul %13, %16, %cst_20 {dimension_numbers = #tpu.dot_dimension_numbers<[1], [0], [0], [1], [0, 0, 1, 1], [], []>} : vector<64x4xbf16>, vector<4x128xbf16>, vector<64x128xf32> -> vector<64x128xf32>
    %18 = arith.addf %14, %17 : vector<64x128xf32>
    %c0_21 = arith.constant 0 : index
    %c0_22 = arith.constant 0 : index
    %19 = vector.load %arg5[%c0_21, %c0_22] : memref<64x128xf32, #tpu.memory_space<vmem>>, vector<64x128xf32>
    tpu.vector_store %arg5[%c0_21, %c0_22], %18 {strides = array<i32>} : memref<64x128xf32, #tpu.memory_space<vmem>>, vector<64x128xf32>,
    %c0_23 = arith.constant 0 : index
    %c0_24 = arith.constant 0 : index
    %c1_25 = arith.constant 1 : index
    %c0_26 = arith.constant 0 : index
    %20 = vector.load %arg1[%c0_23, %c0_24, %c1_25, %c0_26] : memref<1x36x9x4xbf16, #tpu.memory_space<vmem>>, vector<1x8x8x4xbf16>
    %21 = vector.shape_cast %20 : vector<1x8x8x4xbf16> to vector<8x8x4xbf16>
    %22 = vector.shape_cast %21 : vector<8x8x4xbf16> to vector<64x4xbf16>
    %c0_27 = arith.constant 0 : index
    %c0_28 = arith.constant 0 : index
    %23 = vector.load %arg5[%c0_27, %c0_28] : memref<64x128xf32, #tpu.memory_space<vmem>>, vector<64x128xf32>
    %c2 = arith.constant 2 : index
    %c0_29 = arith.constant 0 : index
    %c0_30 = arith.constant 0 : index
    %24 = vector.load %arg2[%c2, %c0_29, %c0_30] : memref<9x4x128xbf16, #tpu.memory_space<vmem>>, vector<1x4x128xbf16>
    %25 = vector.shape_cast %24 : vector<1x4x128xbf16> to vector<4x128xbf16>
    %cst_31 = arith.constant dense<0.000000e+00> : vector<64x128xf32>
    %26 = tpu.matmul %22, %25, %cst_31 {dimension_numbers = #tpu.dot_dimension_numbers<[1], [0], [0], [1], [0, 0, 1, 1], [], []>} : vector<64x4xbf16>, vector<4x128xbf16>, vector<64x128xf32> -> vector<64x128xf32>
    %27 = arith.addf %23, %26 : vector<64x128xf32>
    %c0_32 = arith.constant 0 : index
    %c0_33 = arith.constant 0 : index
    %28 = vector.load %arg5[%c0_32, %c0_33] : memref<64x128xf32, #tpu.memory_space<vmem>>, vector<64x128xf32>
    tpu.vector_store %arg5[%c0_32, %c0_33], %27 {strides = array<i32>} : memref<64x128xf32, #tpu.memory_space<vmem>>, vector<64x128xf32>,
    %c0_34 = arith.constant 0 : index
    %c18 = arith.constant 18 : index
    %c0_35 = arith.constant 0 : index
    %c0_36 = arith.constant 0 : index
    %29 = vector.load %arg1[%c0_34, %c18, %c0_35, %c0_36] : memref<1x36x9x4xbf16, #tpu.memory_space<vmem>>, vector<1x8x8x4xbf16>
    %30 = vector.shape_cast %29 : vector<1x8x8x4xbf16> to vector<8x8x4xbf16>
    %31 = vector.shape_cast %30 : vector<8x8x4xbf16> to vector<64x4xbf16>
    %c0_37 = arith.constant 0 : index
    %c0_38 = arith.constant 0 : index
    %32 = vector.load %arg5[%c0_37, %c0_38] : memref<64x128xf32, #tpu.memory_space<vmem>>, vector<64x128xf32>
    %c3 = arith.constant 3 : index
    %c0_39 = arith.constant 0 : index
    %c0_40 = arith.constant 0 : index
    %33 = vector.load %arg2[%c3, %c0_39, %c0_40] : memref<9x4x128xbf16, #tpu.memory_space<vmem>>, vector<1x4x128xbf16>
    %34 = vector.shape_cast %33 : vector<1x4x128xbf16> to vector<4x128xbf16>
    %cst_41 = arith.constant dense<0.000000e+00> : vector<64x128xf32>
    %35 = tpu.matmul %31, %34, %cst_41 {dimension_numbers = #tpu.dot_dimension_numbers<[1], [0], [0], [1], [0, 0, 1, 1], [], []>} : vector<64x4xbf16>, vector<4x128xbf16>, vector<64x128xf32> -> vector<64x128xf32>
    %36 = arith.addf %32, %35 : vector<64x128xf32>
    %c0_42 = arith.constant 0 : index
    %c0_43 = arith.constant 0 : index
    %37 = vector.load %arg5[%c0_42, %c0_43] : memref<64x128xf32, #tpu.memory_space<vmem>>, vector<64x128xf32>
    tpu.vector_store %arg5[%c0_42, %c0_43], %36 {strides = array<i32>} : memref<64x128xf32, #tpu.memory_space<vmem>>, vector<64x128xf32>,
    %c0_44 = arith.constant 0 : index
    %c27 = arith.constant 27 : index
    %c0_45 = arith.constant 0 : index
    %c0_46 = arith.constant 0 : index
    %38 = vector.load %arg1[%c0_44, %c27, %c0_45, %c0_46] : memref<1x36x9x4xbf16, #tpu.memory_space<vmem>>, vector<1x8x8x4xbf16>
    %39 = vector.shape_cast %38 : vector<1x8x8x4xbf16> to vector<8x8x4xbf16>
    %40 = vector.shape_cast %39 : vector<8x8x4xbf16> to vector<64x4xbf16>
    %c0_47 = arith.constant 0 : index
    %c0_48 = arith.constant 0 : index
    %41 = vector.load %arg5[%c0_47, %c0_48] : memref<64x128xf32, #tpu.memory_space<vmem>>, vector<64x128xf32>
    %c4 = arith.constant 4 : index
    %c0_49 = arith.constant 0 : index
    %c0_50 = arith.constant 0 : index
    %42 = vector.load %arg2[%c4, %c0_49, %c0_50] : memref<9x4x128xbf16, #tpu.memory_space<vmem>>, vector<1x4x128xbf16>
    %43 = vector.shape_cast %42 : vector<1x4x128xbf16> to vector<4x128xbf16>
    %cst_51 = arith.constant dense<0.000000e+00> : vector<64x128xf32>
    %44 = tpu.matmul %40, %43, %cst_51 {dimension_numbers = #tpu.dot_dimension_numbers<[1], [0], [0], [1], [0, 0, 1, 1], [], []>} : vector<64x4xbf16>, vector<4x128xbf16>, vector<64x128xf32> -> vector<64x128xf32>
    %45 = arith.addf %41, %44 : vector<64x128xf32>
    %c0_52 = arith.constant 0 : index
    %c0_53 = arith.constant 0 : index
    %46 = vector.load %arg5[%c0_52, %c0_53] : memref<64x128xf32, #tpu.memory_space<vmem>>, vector<64x128xf32>
    tpu.vector_store %arg5[%c0_52, %c0_53], %45 {strides = array<i32>} : memref<64x128xf32, #tpu.memory_space<vmem>>, vector<64x128xf32>,
    %c0_54 = arith.constant 0 : index
    %c18_55 = arith.constant 18 : index
    %c1_56 = arith.constant 1 : index
    %c0_57 = arith.constant 0 : index
    %47 = vector.load %arg1[%c0_54, %c18_55, %c1_56, %c0_57] : memref<1x36x9x4xbf16, #tpu.memory_space<vmem>>, vector<1x8x8x4xbf16>
    %48 = vector.shape_cast %47 : vector<1x8x8x4xbf16> to vector<8x8x4xbf16>
    %49 = vector.shape_cast %48 : vector<8x8x4xbf16> to vector<64x4xbf16>
    %c0_58 = arith.constant 0 : index
    %c0_59 = arith.constant 0 : index
    %50 = vector.load %arg5[%c0_58, %c0_59] : memref<64x128xf32, #tpu.memory_space<vmem>>, vector<64x128xf32>
    %c5 = arith.constant 5 : index
    %c0_60 = arith.constant 0 : index
    %c0_61 = arith.constant 0 : index
    %51 = vector.load %arg2[%c5, %c0_60, %c0_61] : memref<9x4x128xbf16, #tpu.memory_space<vmem>>, vector<1x4x128xbf16>
    %52 = vector.shape_cast %51 : vector<1x4x128xbf16> to vector<4x128xbf16>
    %cst_62 = arith.constant dense<0.000000e+00> : vector<64x128xf32>
    %53 = tpu.matmul %49, %52, %cst_62 {dimension_numbers = #tpu.dot_dimension_numbers<[1], [0], [0], [1], [0, 0, 1, 1], [], []>} : vector<64x4xbf16>, vector<4x128xbf16>, vector<64x128xf32> -> vector<64x128xf32>
    %54 = arith.addf %50, %53 : vector<64x128xf32>
    %c0_63 = arith.constant 0 : index
    %c0_64 = arith.constant 0 : index
    %55 = vector.load %arg5[%c0_63, %c0_64] : memref<64x128xf32, #tpu.memory_space<vmem>>, vector<64x128xf32>
    tpu.vector_store %arg5[%c0_63, %c0_64], %54 {strides = array<i32>} : memref<64x128xf32, #tpu.memory_space<vmem>>, vector<64x128xf32>,
    %c0_65 = arith.constant 0 : index
    %c1_66 = arith.constant 1 : index
    %c0_67 = arith.constant 0 : index
    %c0_68 = arith.constant 0 : index
    %56 = vector.load %arg1[%c0_65, %c1_66, %c0_67, %c0_68] : memref<1x36x9x4xbf16, #tpu.memory_space<vmem>>, vector<1x8x8x4xbf16>
    %57 = vector.shape_cast %56 : vector<1x8x8x4xbf16> to vector<8x8x4xbf16>
    %58 = vector.shape_cast %57 : vector<8x8x4xbf16> to vector<64x4xbf16>
    %c0_69 = arith.constant 0 : index
    %c0_70 = arith.constant 0 : index
    %59 = vector.load %arg5[%c0_69, %c0_70] : memref<64x128xf32, #tpu.memory_space<vmem>>, vector<64x128xf32>
    %c6 = arith.constant 6 : index
    %c0_71 = arith.constant 0 : index
    %c0_72 = arith.constant 0 : index
    %60 = vector.load %arg2[%c6, %c0_71, %c0_72] : memref<9x4x128xbf16, #tpu.memory_space<vmem>>, vector<1x4x128xbf16>
    %61 = vector.shape_cast %60 : vector<1x4x128xbf16> to vector<4x128xbf16>
    %cst_73 = arith.constant dense<0.000000e+00> : vector<64x128xf32>
    %62 = tpu.matmul %58, %61, %cst_73 {dimension_numbers = #tpu.dot_dimension_numbers<[1], [0], [0], [1], [0, 0, 1, 1], [], []>} : vector<64x4xbf16>, vector<4x128xbf16>, vector<64x128xf32> -> vector<64x128xf32>
    %63 = arith.addf %59, %62 : vector<64x128xf32>
    %c0_74 = arith.constant 0 : index
    %c0_75 = arith.constant 0 : index
    %64 = vector.load %arg5[%c0_74, %c0_75] : memref<64x128xf32, #tpu.memory_space<vmem>>, vector<64x128xf32>
    tpu.vector_store %arg5[%c0_74, %c0_75], %63 {strides = array<i32>} : memref<64x128xf32, #tpu.memory_space<vmem>>, vector<64x128xf32>,
    %c0_76 = arith.constant 0 : index
    %c10 = arith.constant 10 : index
    %c0_77 = arith.constant 0 : index
    %c0_78 = arith.constant 0 : index
    %65 = vector.load %arg1[%c0_76, %c10, %c0_77, %c0_78] : memref<1x36x9x4xbf16, #tpu.memory_space<vmem>>, vector<1x8x8x4xbf16>
    %66 = vector.shape_cast %65 : vector<1x8x8x4xbf16> to vector<8x8x4xbf16>
    %67 = vector.shape_cast %66 : vector<8x8x4xbf16> to vector<64x4xbf16>
    %c0_79 = arith.constant 0 : index
    %c0_80 = arith.constant 0 : index
    %68 = vector.load %arg5[%c0_79, %c0_80] : memref<64x128xf32, #tpu.memory_space<vmem>>, vector<64x128xf32>
    %c7 = arith.constant 7 : index
    %c0_81 = arith.constant 0 : index
    %c0_82 = arith.constant 0 : index
    %69 = vector.load %arg2[%c7, %c0_81, %c0_82] : memref<9x4x128xbf16, #tpu.memory_space<vmem>>, vector<1x4x128xbf16>
    %70 = vector.shape_cast %69 : vector<1x4x128xbf16> to vector<4x128xbf16>
    %cst_83 = arith.constant dense<0.000000e+00> : vector<64x128xf32>
    %71 = tpu.matmul %67, %70, %cst_83 {dimension_numbers = #tpu.dot_dimension_numbers<[1], [0], [0], [1], [0, 0, 1, 1], [], []>} : vector<64x4xbf16>, vector<4x128xbf16>, vector<64x128xf32> -> vector<64x128xf32>
    %72 = arith.addf %68, %71 : vector<64x128xf32>
    %c0_84 = arith.constant 0 : index
    %c0_85 = arith.constant 0 : index
    %73 = vector.load %arg5[%c0_84, %c0_85] : memref<64x128xf32, #tpu.memory_space<vmem>>, vector<64x128xf32>
    tpu.vector_store %arg5[%c0_84, %c0_85], %72 {strides = array<i32>} : memref<64x128xf32, #tpu.memory_space<vmem>>, vector<64x128xf32>,
    %c0_86 = arith.constant 0 : index
    %c1_87 = arith.constant 1 : index
    %c1_88 = arith.constant 1 : index
    %c0_89 = arith.constant 0 : index
    %74 = vector.load %arg1[%c0_86, %c1_87, %c1_88, %c0_89] : memref<1x36x9x4xbf16, #tpu.memory_space<vmem>>, vector<1x8x8x4xbf16>
    %75 = vector.shape_cast %74 : vector<1x8x8x4xbf16> to vector<8x8x4xbf16>
    %76 = vector.shape_cast %75 : vector<8x8x4xbf16> to vector<64x4xbf16>
    %c0_90 = arith.constant 0 : index
    %c0_91 = arith.constant 0 : index
    %77 = vector.load %arg5[%c0_90, %c0_91] : memref<64x128xf32, #tpu.memory_space<vmem>>, vector<64x128xf32>
    %c8 = arith.constant 8 : index
    %c0_92 = arith.constant 0 : index
    %c0_93 = arith.constant 0 : index
    %78 = vector.load %arg2[%c8, %c0_92, %c0_93] : memref<9x4x128xbf16, #tpu.memory_space<vmem>>, vector<1x4x128xbf16>
    %79 = vector.shape_cast %78 : vector<1x4x128xbf16> to vector<4x128xbf16>
    %cst_94 = arith.constant dense<0.000000e+00> : vector<64x128xf32>
    %80 = tpu.matmul %76, %79, %cst_94 {dimension_numbers = #tpu.dot_dimension_numbers<[1], [0], [0], [1], [0, 0, 1, 1], [], []>} : vector<64x4xbf16>, vector<4x128xbf16>, vector<64x128xf32> -> vector<64x128xf32>
    %81 = arith.addf %77, %80 : vector<64x128xf32>
    %c0_95 = arith.constant 0 : index
    %c0_96 = arith.constant 0 : index
    %82 = vector.load %arg5[%c0_95, %c0_96] : memref<64x128xf32, #tpu.memory_space<vmem>>, vector<64x128xf32>
    tpu.vector_store %arg5[%c0_95, %c0_96], %81 {strides = array<i32>} : memref<64x128xf32, #tpu.memory_space<vmem>>, vector<64x128xf32>,
    %c0_97 = arith.constant 0 : index
    %c0_98 = arith.constant 0 : index
    %83 = vector.load %arg5[%c0_97, %c0_98] : memref<64x128xf32, #tpu.memory_space<vmem>>, vector<64x128xf32>
    %c0_99 = arith.constant 0 : index
    %c0_100 = arith.constant 0 : index
    %84 = vector.load %arg3[%c0_99, %c0_100] : memref<1x128xf32, #tpu.memory_space<vmem>>, vector<1x128xf32>
    %85 = vector.broadcast %84 : vector<1x128xf32> to vector<64x128xf32>
    %86 = arith.addf %83, %85 : vector<64x128xf32>
    %cst_101 = arith.constant 0.000000e+00 : f32
    %87 = vector.broadcast %cst_101 : f32 to vector<64x128xf32>
    %88 = arith.maximumf %86, %87 : vector<64x128xf32>
    %89 = arith.truncf %88 : vector<64x128xf32> to vector<64x128xbf16>
    %c0_102 = arith.constant 0 : index
    %c0_103 = arith.constant 0 : index
    %c0_104 = arith.constant 0 : index
    %90 = vector.load %arg4[%c0_102, %c0_103, %c0_104] : memref<1x64x128xbf16, #tpu.memory_space<vmem>>, vector<1x64x128xbf16>
    %91 = vector.shape_cast %90 : vector<1x64x128xbf16> to vector<64x128xbf16>
    %92 = vector.shape_cast %89 : vector<64x128xbf16> to vector<1x64x128xbf16>
    tpu.vector_store %arg4[%c0_102, %c0_103, %c0_104], %92 {strides = array<i32>} : memref<1x64x128xbf16, #tpu.memory_space<vmem>>, vector<1x64x128xbf16>,
    return
  }
  func.func @transform_0(%arg0: i32) -> (i32, i32, i32, i32) {
    %c0_i32 = arith.constant 0 : i32
    %c0_i32_0 = arith.constant 0 : i32
    %c0_i32_1 = arith.constant 0 : i32
    %c0_i32_2 = arith.constant 0 : i32
    return %arg0, %c0_i32, %c0_i32_0, %c0_i32_1 : i32, i32, i32, i32
  }
  func.func @transform_1(%arg0: i32) -> (i32, i32, i32) {
    %c0_i32 = arith.constant 0 : i32
    %c0_i32_0 = arith.constant 0 : i32
    %c0_i32_1 = arith.constant 0 : i32
    %c0_i32_2 = arith.constant 0 : i32
    return %c0_i32, %c0_i32_0, %c0_i32_1 : i32, i32, i32
  }
  func.func @transform_2(%arg0: i32) -> (i32, i32) {
    %c0_i32 = arith.constant 0 : i32
    %c0_i32_0 = arith.constant 0 : i32
    %c0_i32_1 = arith.constant 0 : i32
    return %c0_i32, %c0_i32_0 : i32, i32
  }
  func.func @transform_3(%arg0: i32) -> (i32, i32, i32) {
    %c0_i32 = arith.constant 0 : i32
    %c0_i32_0 = arith.constant 0 : i32
    %c0_i32_1 = arith.constant 0 : i32
    return %arg0, %c0_i32, %c0_i32_0 : i32, i32, i32
  }
}

module attributes {stable_mosaic.version = 11 : i64} {
  func.func @_conv3x3_bn_act_kernel(%arg0: i32, %arg1: memref<1x10x10x128xbf16, #tpu.memory_space<vmem>>, %arg2: memref<9x128x128xbf16, #tpu.memory_space<vmem>>, %arg3: memref<1x128xf32, #tpu.memory_space<vmem>>, %arg4: memref<1x64x4xbf16, #tpu.memory_space<vmem>>, %arg5: memref<4x128xbf16, #tpu.memory_space<vmem>>, %arg6: memref<1x128xf32, #tpu.memory_space<vmem>>, %arg7: memref<1x64x128xf32, #tpu.memory_space<vmem>>, %arg8: memref<64x128xf32, #tpu.memory_space<vmem>>) attributes {dimension_semantics = [#tpu.dimension_semantics<parallel>], iteration_bounds = array<i64: 2>, scalar_prefetch = 0 : i64, scratch_operands = 1 : i64, tpu.core_type = #tpu.core_type<tc>, window_params = [{transform_indices = @transform_0, window_bounds = array<i64: 1, 10, 10, 128>}, {pipeline_mode = #tpu.pipeline_mode<synchronous>, transform_indices = @transform_1, window_bounds = array<i64: 9, 128, 128>}, {pipeline_mode = #tpu.pipeline_mode<synchronous>, transform_indices = @transform_2, window_bounds = array<i64: 1, 128>}, {transform_indices = @transform_3, window_bounds = array<i64: 1, 64, 4>}, {pipeline_mode = #tpu.pipeline_mode<synchronous>, transform_indices = @transform_4, window_bounds = array<i64: 4, 128>}, {pipeline_mode = #tpu.pipeline_mode<synchronous>, transform_indices = @transform_5, window_bounds = array<i64: 1, 128>}, {transform_indices = @transform_6, window_bounds = array<i64: 1, 64, 128>}]} {
    %cst = arith.constant 0.000000e+00 : f32
    %0 = vector.broadcast %cst : f32 to vector<64x128xf32>
    %c0 = arith.constant 0 : index
    %c0_0 = arith.constant 0 : index
    %1 = vector.load %arg8[%c0, %c0_0] : memref<64x128xf32, #tpu.memory_space<vmem>>, vector<64x128xf32>
    tpu.vector_store %arg8[%c0, %c0_0], %0 {strides = array<i32>} : memref<64x128xf32, #tpu.memory_space<vmem>>, vector<64x128xf32>,
    %c0_1 = arith.constant 0 : index
    %c0_2 = arith.constant 0 : index
    %c0_3 = arith.constant 0 : index
    %c0_4 = arith.constant 0 : index
    %2 = vector.load %arg1[%c0_1, %c0_2, %c0_3, %c0_4] : memref<1x10x10x128xbf16, #tpu.memory_space<vmem>>, vector<1x8x8x128xbf16>
    %3 = vector.shape_cast %2 : vector<1x8x8x128xbf16> to vector<8x8x128xbf16>
    %4 = vector.shape_cast %3 : vector<8x8x128xbf16> to vector<64x128xbf16>
    %c0_5 = arith.constant 0 : index
    %c0_6 = arith.constant 0 : index
    %5 = vector.load %arg8[%c0_5, %c0_6] : memref<64x128xf32, #tpu.memory_space<vmem>>, vector<64x128xf32>
    %c0_7 = arith.constant 0 : index
    %c0_8 = arith.constant 0 : index
    %c0_9 = arith.constant 0 : index
    %6 = vector.load %arg2[%c0_7, %c0_8, %c0_9] : memref<9x128x128xbf16, #tpu.memory_space<vmem>>, vector<1x128x128xbf16>
    %7 = vector.shape_cast %6 : vector<1x128x128xbf16> to vector<128x128xbf16>
    %cst_10 = arith.constant dense<0.000000e+00> : vector<64x128xf32>
    %8 = tpu.matmul %4, %7, %cst_10 {dimension_numbers = #tpu.dot_dimension_numbers<[1], [0], [0], [1], [0, 0, 1, 1], [], []>} : vector<64x128xbf16>, vector<128x128xbf16>, vector<64x128xf32> -> vector<64x128xf32>
    %9 = arith.addf %5, %8 : vector<64x128xf32>
    %c0_11 = arith.constant 0 : index
    %c0_12 = arith.constant 0 : index
    %10 = vector.load %arg8[%c0_11, %c0_12] : memref<64x128xf32, #tpu.memory_space<vmem>>, vector<64x128xf32>
    tpu.vector_store %arg8[%c0_11, %c0_12], %9 {strides = array<i32>} : memref<64x128xf32, #tpu.memory_space<vmem>>, vector<64x128xf32>,
    %c0_13 = arith.constant 0 : index
    %c0_14 = arith.constant 0 : index
    %c1 = arith.constant 1 : index
    %c0_15 = arith.constant 0 : index
    %11 = vector.load %arg1[%c0_13, %c0_14, %c1, %c0_15] : memref<1x10x10x128xbf16, #tpu.memory_space<vmem>>, vector<1x8x8x128xbf16>
    %12 = vector.shape_cast %11 : vector<1x8x8x128xbf16> to vector<8x8x128xbf16>
    %13 = vector.shape_cast %12 : vector<8x8x128xbf16> to vector<64x128xbf16>
    %c0_16 = arith.constant 0 : index
    %c0_17 = arith.constant 0 : index
    %14 = vector.load %arg8[%c0_16, %c0_17] : memref<64x128xf32, #tpu.memory_space<vmem>>, vector<64x128xf32>
    %c1_18 = arith.constant 1 : index
    %c0_19 = arith.constant 0 : index
    %c0_20 = arith.constant 0 : index
    %15 = vector.load %arg2[%c1_18, %c0_19, %c0_20] : memref<9x128x128xbf16, #tpu.memory_space<vmem>>, vector<1x128x128xbf16>
    %16 = vector.shape_cast %15 : vector<1x128x128xbf16> to vector<128x128xbf16>
    %cst_21 = arith.constant dense<0.000000e+00> : vector<64x128xf32>
    %17 = tpu.matmul %13, %16, %cst_21 {dimension_numbers = #tpu.dot_dimension_numbers<[1], [0], [0], [1], [0, 0, 1, 1], [], []>} : vector<64x128xbf16>, vector<128x128xbf16>, vector<64x128xf32> -> vector<64x128xf32>
    %18 = arith.addf %14, %17 : vector<64x128xf32>
    %c0_22 = arith.constant 0 : index
    %c0_23 = arith.constant 0 : index
    %19 = vector.load %arg8[%c0_22, %c0_23] : memref<64x128xf32, #tpu.memory_space<vmem>>, vector<64x128xf32>
    tpu.vector_store %arg8[%c0_22, %c0_23], %18 {strides = array<i32>} : memref<64x128xf32, #tpu.memory_space<vmem>>, vector<64x128xf32>,
    %c0_24 = arith.constant 0 : index
    %c0_25 = arith.constant 0 : index
    %c2 = arith.constant 2 : index
    %c0_26 = arith.constant 0 : index
    %20 = vector.load %arg1[%c0_24, %c0_25, %c2, %c0_26] : memref<1x10x10x128xbf16, #tpu.memory_space<vmem>>, vector<1x8x8x128xbf16>
    %21 = vector.shape_cast %20 : vector<1x8x8x128xbf16> to vector<8x8x128xbf16>
    %22 = vector.shape_cast %21 : vector<8x8x128xbf16> to vector<64x128xbf16>
    %c0_27 = arith.constant 0 : index
    %c0_28 = arith.constant 0 : index
    %23 = vector.load %arg8[%c0_27, %c0_28] : memref<64x128xf32, #tpu.memory_space<vmem>>, vector<64x128xf32>
    %c2_29 = arith.constant 2 : index
    %c0_30 = arith.constant 0 : index
    %c0_31 = arith.constant 0 : index
    %24 = vector.load %arg2[%c2_29, %c0_30, %c0_31] : memref<9x128x128xbf16, #tpu.memory_space<vmem>>, vector<1x128x128xbf16>
    %25 = vector.shape_cast %24 : vector<1x128x128xbf16> to vector<128x128xbf16>
    %cst_32 = arith.constant dense<0.000000e+00> : vector<64x128xf32>
    %26 = tpu.matmul %22, %25, %cst_32 {dimension_numbers = #tpu.dot_dimension_numbers<[1], [0], [0], [1], [0, 0, 1, 1], [], []>} : vector<64x128xbf16>, vector<128x128xbf16>, vector<64x128xf32> -> vector<64x128xf32>
    %27 = arith.addf %23, %26 : vector<64x128xf32>
    %c0_33 = arith.constant 0 : index
    %c0_34 = arith.constant 0 : index
    %28 = vector.load %arg8[%c0_33, %c0_34] : memref<64x128xf32, #tpu.memory_space<vmem>>, vector<64x128xf32>
    tpu.vector_store %arg8[%c0_33, %c0_34], %27 {strides = array<i32>} : memref<64x128xf32, #tpu.memory_space<vmem>>, vector<64x128xf32>,
    %c0_35 = arith.constant 0 : index
    %c1_36 = arith.constant 1 : index
    %c0_37 = arith.constant 0 : index
    %c0_38 = arith.constant 0 : index
    %29 = vector.load %arg1[%c0_35, %c1_36, %c0_37, %c0_38] : memref<1x10x10x128xbf16, #tpu.memory_space<vmem>>, vector<1x8x8x128xbf16>
    %30 = vector.shape_cast %29 : vector<1x8x8x128xbf16> to vector<8x8x128xbf16>
    %31 = vector.shape_cast %30 : vector<8x8x128xbf16> to vector<64x128xbf16>
    %c0_39 = arith.constant 0 : index
    %c0_40 = arith.constant 0 : index
    %32 = vector.load %arg8[%c0_39, %c0_40] : memref<64x128xf32, #tpu.memory_space<vmem>>, vector<64x128xf32>
    %c3 = arith.constant 3 : index
    %c0_41 = arith.constant 0 : index
    %c0_42 = arith.constant 0 : index
    %33 = vector.load %arg2[%c3, %c0_41, %c0_42] : memref<9x128x128xbf16, #tpu.memory_space<vmem>>, vector<1x128x128xbf16>
    %34 = vector.shape_cast %33 : vector<1x128x128xbf16> to vector<128x128xbf16>
    %cst_43 = arith.constant dense<0.000000e+00> : vector<64x128xf32>
    %35 = tpu.matmul %31, %34, %cst_43 {dimension_numbers = #tpu.dot_dimension_numbers<[1], [0], [0], [1], [0, 0, 1, 1], [], []>} : vector<64x128xbf16>, vector<128x128xbf16>, vector<64x128xf32> -> vector<64x128xf32>
    %36 = arith.addf %32, %35 : vector<64x128xf32>
    %c0_44 = arith.constant 0 : index
    %c0_45 = arith.constant 0 : index
    %37 = vector.load %arg8[%c0_44, %c0_45] : memref<64x128xf32, #tpu.memory_space<vmem>>, vector<64x128xf32>
    tpu.vector_store %arg8[%c0_44, %c0_45], %36 {strides = array<i32>} : memref<64x128xf32, #tpu.memory_space<vmem>>, vector<64x128xf32>,
    %c0_46 = arith.constant 0 : index
    %c1_47 = arith.constant 1 : index
    %c1_48 = arith.constant 1 : index
    %c0_49 = arith.constant 0 : index
    %38 = vector.load %arg1[%c0_46, %c1_47, %c1_48, %c0_49] : memref<1x10x10x128xbf16, #tpu.memory_space<vmem>>, vector<1x8x8x128xbf16>
    %39 = vector.shape_cast %38 : vector<1x8x8x128xbf16> to vector<8x8x128xbf16>
    %40 = vector.shape_cast %39 : vector<8x8x128xbf16> to vector<64x128xbf16>
    %c0_50 = arith.constant 0 : index
    %c0_51 = arith.constant 0 : index
    %41 = vector.load %arg8[%c0_50, %c0_51] : memref<64x128xf32, #tpu.memory_space<vmem>>, vector<64x128xf32>
    %c4 = arith.constant 4 : index
    %c0_52 = arith.constant 0 : index
    %c0_53 = arith.constant 0 : index
    %42 = vector.load %arg2[%c4, %c0_52, %c0_53] : memref<9x128x128xbf16, #tpu.memory_space<vmem>>, vector<1x128x128xbf16>
    %43 = vector.shape_cast %42 : vector<1x128x128xbf16> to vector<128x128xbf16>
    %cst_54 = arith.constant dense<0.000000e+00> : vector<64x128xf32>
    %44 = tpu.matmul %40, %43, %cst_54 {dimension_numbers = #tpu.dot_dimension_numbers<[1], [0], [0], [1], [0, 0, 1, 1], [], []>} : vector<64x128xbf16>, vector<128x128xbf16>, vector<64x128xf32> -> vector<64x128xf32>
    %45 = arith.addf %41, %44 : vector<64x128xf32>
    %c0_55 = arith.constant 0 : index
    %c0_56 = arith.constant 0 : index
    %46 = vector.load %arg8[%c0_55, %c0_56] : memref<64x128xf32, #tpu.memory_space<vmem>>, vector<64x128xf32>
    tpu.vector_store %arg8[%c0_55, %c0_56], %45 {strides = array<i32>} : memref<64x128xf32, #tpu.memory_space<vmem>>, vector<64x128xf32>,
    %c0_57 = arith.constant 0 : index
    %c1_58 = arith.constant 1 : index
    %c2_59 = arith.constant 2 : index
    %c0_60 = arith.constant 0 : index
    %47 = vector.load %arg1[%c0_57, %c1_58, %c2_59, %c0_60] : memref<1x10x10x128xbf16, #tpu.memory_space<vmem>>, vector<1x8x8x128xbf16>
    %48 = vector.shape_cast %47 : vector<1x8x8x128xbf16> to vector<8x8x128xbf16>
    %49 = vector.shape_cast %48 : vector<8x8x128xbf16> to vector<64x128xbf16>
    %c0_61 = arith.constant 0 : index
    %c0_62 = arith.constant 0 : index
    %50 = vector.load %arg8[%c0_61, %c0_62] : memref<64x128xf32, #tpu.memory_space<vmem>>, vector<64x128xf32>
    %c5 = arith.constant 5 : index
    %c0_63 = arith.constant 0 : index
    %c0_64 = arith.constant 0 : index
    %51 = vector.load %arg2[%c5, %c0_63, %c0_64] : memref<9x128x128xbf16, #tpu.memory_space<vmem>>, vector<1x128x128xbf16>
    %52 = vector.shape_cast %51 : vector<1x128x128xbf16> to vector<128x128xbf16>
    %cst_65 = arith.constant dense<0.000000e+00> : vector<64x128xf32>
    %53 = tpu.matmul %49, %52, %cst_65 {dimension_numbers = #tpu.dot_dimension_numbers<[1], [0], [0], [1], [0, 0, 1, 1], [], []>} : vector<64x128xbf16>, vector<128x128xbf16>, vector<64x128xf32> -> vector<64x128xf32>
    %54 = arith.addf %50, %53 : vector<64x128xf32>
    %c0_66 = arith.constant 0 : index
    %c0_67 = arith.constant 0 : index
    %55 = vector.load %arg8[%c0_66, %c0_67] : memref<64x128xf32, #tpu.memory_space<vmem>>, vector<64x128xf32>
    tpu.vector_store %arg8[%c0_66, %c0_67], %54 {strides = array<i32>} : memref<64x128xf32, #tpu.memory_space<vmem>>, vector<64x128xf32>,
    %c0_68 = arith.constant 0 : index
    %c2_69 = arith.constant 2 : index
    %c0_70 = arith.constant 0 : index
    %c0_71 = arith.constant 0 : index
    %56 = vector.load %arg1[%c0_68, %c2_69, %c0_70, %c0_71] : memref<1x10x10x128xbf16, #tpu.memory_space<vmem>>, vector<1x8x8x128xbf16>
    %57 = vector.shape_cast %56 : vector<1x8x8x128xbf16> to vector<8x8x128xbf16>
    %58 = vector.shape_cast %57 : vector<8x8x128xbf16> to vector<64x128xbf16>
    %c0_72 = arith.constant 0 : index
    %c0_73 = arith.constant 0 : index
    %59 = vector.load %arg8[%c0_72, %c0_73] : memref<64x128xf32, #tpu.memory_space<vmem>>, vector<64x128xf32>
    %c6 = arith.constant 6 : index
    %c0_74 = arith.constant 0 : index
    %c0_75 = arith.constant 0 : index
    %60 = vector.load %arg2[%c6, %c0_74, %c0_75] : memref<9x128x128xbf16, #tpu.memory_space<vmem>>, vector<1x128x128xbf16>
    %61 = vector.shape_cast %60 : vector<1x128x128xbf16> to vector<128x128xbf16>
    %cst_76 = arith.constant dense<0.000000e+00> : vector<64x128xf32>
    %62 = tpu.matmul %58, %61, %cst_76 {dimension_numbers = #tpu.dot_dimension_numbers<[1], [0], [0], [1], [0, 0, 1, 1], [], []>} : vector<64x128xbf16>, vector<128x128xbf16>, vector<64x128xf32> -> vector<64x128xf32>
    %63 = arith.addf %59, %62 : vector<64x128xf32>
    %c0_77 = arith.constant 0 : index
    %c0_78 = arith.constant 0 : index
    %64 = vector.load %arg8[%c0_77, %c0_78] : memref<64x128xf32, #tpu.memory_space<vmem>>, vector<64x128xf32>
    tpu.vector_store %arg8[%c0_77, %c0_78], %63 {strides = array<i32>} : memref<64x128xf32, #tpu.memory_space<vmem>>, vector<64x128xf32>,
    %c0_79 = arith.constant 0 : index
    %c2_80 = arith.constant 2 : index
    %c1_81 = arith.constant 1 : index
    %c0_82 = arith.constant 0 : index
    %65 = vector.load %arg1[%c0_79, %c2_80, %c1_81, %c0_82] : memref<1x10x10x128xbf16, #tpu.memory_space<vmem>>, vector<1x8x8x128xbf16>
    %66 = vector.shape_cast %65 : vector<1x8x8x128xbf16> to vector<8x8x128xbf16>
    %67 = vector.shape_cast %66 : vector<8x8x128xbf16> to vector<64x128xbf16>
    %c0_83 = arith.constant 0 : index
    %c0_84 = arith.constant 0 : index
    %68 = vector.load %arg8[%c0_83, %c0_84] : memref<64x128xf32, #tpu.memory_space<vmem>>, vector<64x128xf32>
    %c7 = arith.constant 7 : index
    %c0_85 = arith.constant 0 : index
    %c0_86 = arith.constant 0 : index
    %69 = vector.load %arg2[%c7, %c0_85, %c0_86] : memref<9x128x128xbf16, #tpu.memory_space<vmem>>, vector<1x128x128xbf16>
    %70 = vector.shape_cast %69 : vector<1x128x128xbf16> to vector<128x128xbf16>
    %cst_87 = arith.constant dense<0.000000e+00> : vector<64x128xf32>
    %71 = tpu.matmul %67, %70, %cst_87 {dimension_numbers = #tpu.dot_dimension_numbers<[1], [0], [0], [1], [0, 0, 1, 1], [], []>} : vector<64x128xbf16>, vector<128x128xbf16>, vector<64x128xf32> -> vector<64x128xf32>
    %72 = arith.addf %68, %71 : vector<64x128xf32>
    %c0_88 = arith.constant 0 : index
    %c0_89 = arith.constant 0 : index
    %73 = vector.load %arg8[%c0_88, %c0_89] : memref<64x128xf32, #tpu.memory_space<vmem>>, vector<64x128xf32>
    tpu.vector_store %arg8[%c0_88, %c0_89], %72 {strides = array<i32>} : memref<64x128xf32, #tpu.memory_space<vmem>>, vector<64x128xf32>,
    %c0_90 = arith.constant 0 : index
    %c2_91 = arith.constant 2 : index
    %c2_92 = arith.constant 2 : index
    %c0_93 = arith.constant 0 : index
    %74 = vector.load %arg1[%c0_90, %c2_91, %c2_92, %c0_93] : memref<1x10x10x128xbf16, #tpu.memory_space<vmem>>, vector<1x8x8x128xbf16>
    %75 = vector.shape_cast %74 : vector<1x8x8x128xbf16> to vector<8x8x128xbf16>
    %76 = vector.shape_cast %75 : vector<8x8x128xbf16> to vector<64x128xbf16>
    %c0_94 = arith.constant 0 : index
    %c0_95 = arith.constant 0 : index
    %77 = vector.load %arg8[%c0_94, %c0_95] : memref<64x128xf32, #tpu.memory_space<vmem>>, vector<64x128xf32>
    %c8 = arith.constant 8 : index
    %c0_96 = arith.constant 0 : index
    %c0_97 = arith.constant 0 : index
    %78 = vector.load %arg2[%c8, %c0_96, %c0_97] : memref<9x128x128xbf16, #tpu.memory_space<vmem>>, vector<1x128x128xbf16>
    %79 = vector.shape_cast %78 : vector<1x128x128xbf16> to vector<128x128xbf16>
    %cst_98 = arith.constant dense<0.000000e+00> : vector<64x128xf32>
    %80 = tpu.matmul %76, %79, %cst_98 {dimension_numbers = #tpu.dot_dimension_numbers<[1], [0], [0], [1], [0, 0, 1, 1], [], []>} : vector<64x128xbf16>, vector<128x128xbf16>, vector<64x128xf32> -> vector<64x128xf32>
    %81 = arith.addf %77, %80 : vector<64x128xf32>
    %c0_99 = arith.constant 0 : index
    %c0_100 = arith.constant 0 : index
    %82 = vector.load %arg8[%c0_99, %c0_100] : memref<64x128xf32, #tpu.memory_space<vmem>>, vector<64x128xf32>
    tpu.vector_store %arg8[%c0_99, %c0_100], %81 {strides = array<i32>} : memref<64x128xf32, #tpu.memory_space<vmem>>, vector<64x128xf32>,
    %c0_101 = arith.constant 0 : index
    %c0_102 = arith.constant 0 : index
    %83 = vector.load %arg8[%c0_101, %c0_102] : memref<64x128xf32, #tpu.memory_space<vmem>>, vector<64x128xf32>
    %c0_103 = arith.constant 0 : index
    %c0_104 = arith.constant 0 : index
    %84 = vector.load %arg3[%c0_103, %c0_104] : memref<1x128xf32, #tpu.memory_space<vmem>>, vector<1x128xf32>
    %85 = vector.broadcast %84 : vector<1x128xf32> to vector<64x128xf32>
    %86 = arith.addf %83, %85 : vector<64x128xf32>
    %c0_105 = arith.constant 0 : index
    %c0_106 = arith.constant 0 : index
    %c0_107 = arith.constant 0 : index
    %87 = vector.load %arg4[%c0_105, %c0_106, %c0_107] : memref<1x64x4xbf16, #tpu.memory_space<vmem>>, vector<1x64x4xbf16>
    %88 = vector.shape_cast %87 : vector<1x64x4xbf16> to vector<64x4xbf16>
    %c0_108 = arith.constant 0 : index
    %c0_109 = arith.constant 0 : index
    %89 = vector.load %arg5[%c0_108, %c0_109] : memref<4x128xbf16, #tpu.memory_space<vmem>>, vector<4x128xbf16>
    %cst_110 = arith.constant dense<0.000000e+00> : vector<64x128xf32>
    %90 = tpu.matmul %88, %89, %cst_110 {dimension_numbers = #tpu.dot_dimension_numbers<[1], [0], [0], [1], [0, 0, 1, 1], [], []>} : vector<64x4xbf16>, vector<4x128xbf16>, vector<64x128xf32> -> vector<64x128xf32>
    %91 = arith.addf %86, %90 : vector<64x128xf32>
    %c0_111 = arith.constant 0 : index
    %c0_112 = arith.constant 0 : index
    %92 = vector.load %arg6[%c0_111, %c0_112] : memref<1x128xf32, #tpu.memory_space<vmem>>, vector<1x128xf32>
    %93 = vector.broadcast %92 : vector<1x128xf32> to vector<64x128xf32>
    %94 = arith.addf %91, %93 : vector<64x128xf32>
    %cst_113 = arith.constant 0.000000e+00 : f32
    %95 = vector.broadcast %cst_113 : f32 to vector<64x128xf32>
    %96 = arith.maximumf %94, %95 : vector<64x128xf32>
    %c0_114 = arith.constant 0 : index
    %c0_115 = arith.constant 0 : index
    %c0_116 = arith.constant 0 : index
    %97 = vector.load %arg7[%c0_114, %c0_115, %c0_116] : memref<1x64x128xf32, #tpu.memory_space<vmem>>, vector<1x64x128xf32>
    %98 = vector.shape_cast %97 : vector<1x64x128xf32> to vector<64x128xf32>
    %99 = vector.shape_cast %96 : vector<64x128xf32> to vector<1x64x128xf32>
    tpu.vector_store %arg7[%c0_114, %c0_115, %c0_116], %99 {strides = array<i32>} : memref<1x64x128xf32, #tpu.memory_space<vmem>>, vector<1x64x128xf32>,
    return
  }
  func.func @transform_0(%arg0: i32) -> (i32, i32, i32, i32) {
    %c0_i32 = arith.constant 0 : i32
    %c0_i32_0 = arith.constant 0 : i32
    %c0_i32_1 = arith.constant 0 : i32
    %c0_i32_2 = arith.constant 0 : i32
    return %arg0, %c0_i32, %c0_i32_0, %c0_i32_1 : i32, i32, i32, i32
  }
  func.func @transform_1(%arg0: i32) -> (i32, i32, i32) {
    %c0_i32 = arith.constant 0 : i32
    %c0_i32_0 = arith.constant 0 : i32
    %c0_i32_1 = arith.constant 0 : i32
    %c0_i32_2 = arith.constant 0 : i32
    return %c0_i32, %c0_i32_0, %c0_i32_1 : i32, i32, i32
  }
  func.func @transform_2(%arg0: i32) -> (i32, i32) {
    %c0_i32 = arith.constant 0 : i32
    %c0_i32_0 = arith.constant 0 : i32
    %c0_i32_1 = arith.constant 0 : i32
    return %c0_i32, %c0_i32_0 : i32, i32
  }
  func.func @transform_3(%arg0: i32) -> (i32, i32, i32) {
    %c0_i32 = arith.constant 0 : i32
    %c0_i32_0 = arith.constant 0 : i32
    %c0_i32_1 = arith.constant 0 : i32
    return %arg0, %c0_i32, %c0_i32_0 : i32, i32, i32
  }
  func.func @transform_4(%arg0: i32) -> (i32, i32) {
    %c0_i32 = arith.constant 0 : i32
    %c0_i32_0 = arith.constant 0 : i32
    %c0_i32_1 = arith.constant 0 : i32
    return %c0_i32, %c0_i32_0 : i32, i32
  }
  func.func @transform_5(%arg0: i32) -> (i32, i32) {
    %c0_i32 = arith.constant 0 : i32
    %c0_i32_0 = arith.constant 0 : i32
    %c0_i32_1 = arith.constant 0 : i32
    return %c0_i32, %c0_i32_0 : i32, i32
  }
  func.func @transform_6(%arg0: i32) -> (i32, i32, i32) {
    %c0_i32 = arith.constant 0 : i32
    %c0_i32_0 = arith.constant 0 : i32
    %c0_i32_1 = arith.constant 0 : i32
    return %arg0, %c0_i32, %c0_i32_0 : i32, i32, i32
  }
}

</mosaic_0001>

<bundles_post_ra>
// kernel: basic_block_forward.2
= control target key start
LH: loop header
LB: loop body
LE: loop exit
PB: predicated region body
PF: predicated region fallthrough
CT: control target
= control target key end

     0   :  { %s2268_s12 = smov 0   ;;  %s2528_s0 = inlined_call_operand.vmem [shape: bf16[2,36,9,4], index: 0, kind: input, shape index: {}]   ;;  %s2529_s1 = inlined_call_operand.vmem [shape: bf16[9,4,128], index: 1, kind: input, shape index: {}]   ;;  %s2530_s2 = inlined_call_operand.vmem [shape: f32[1,128], index: 2, kind: input, shape index: {}]   ;;  %s2531_s3 = inlined_call_operand.vmem [shape: bf16[2,64,128], index: 3, kind: output, shape index: {}]  }
   0x1 LB: > { %s1857_s13 = sadd.s32 4294967295, %s2246_s12   ;;  %p1861_p0 = scmp.ge.s32.totalorder %s2246_s12, 1  ;;  %s2246_s12 = sphi %s2268_s12, %s13_s12  }
   0x2   : > { %p137_p1 = scmp.lt.s32.totalorder %s2246_s12, 3 }
   0x4   : > { %p138_p2 = pnand %p1861_p0, %p137_p1 }
   0x5   : > { %p161_p3 = scmp.lt.s32.totalorder (!%p138_p2), %s1857_s13, 1 }
   0x6   : > { %141 = sbr.rel (%p138_p2) target bundleno = 300 (0x12c), region = 32 }
   0xb   : > { %v196_v0 = vld [vmem:[%s2529_s1] sm:$0x3]  ;;  %vm230_vm0 = vcmask 1041408   ;;  %v1881_v2 = vld [vmem:[%s2529_s1 + $0x2] sm:$0x3]  ;;  %s2535_s13 = smov (!%p161_p3, %s1857_s13), 1 }
   0xc   : > { %2198 = vmatprep.subr.msk.bf16.mxu1 %vm230_vm0, %v196_v0  ;;  %2197 = vmatprep.subr.msk.bf16.mxu0 %vm230_vm0, %v196_v0  ;;  %v232_v1 = vsel %vm230_vm0, %v196_v0, 0  ;;  %v1890_v3 = vld [vmem:[%s2529_s1 + $0x4] sm:$0x3]  ;;  %s2207_s20 = smul.u32 288, %s2535_s13  ;;  %vm217_vm1 = vcmask 31744   ;;  %v367_v4 = vsel %vm230_vm0, %v1881_v2, 0 }
   0xd   : > { %2196 = vmatpush3.bf16.msra.mxu1 %v232_v1  ;;  %2106 = vmatpush3.bf16.msra.mxu0 %v232_v1  ;;  %v616_v5 = vsel %vm230_vm0, %v1890_v3, 0  ;;  %v1907_v7 = vld [vmem:[%s2529_s1 + $0x6] sm:$0x3]  ;;  %v1924_v8 = vld [vmem:[%s2529_s1 + $0x8] sm:$0x3]  ;;  %s2028_s11 = sshll.u32 %s2535_s13, 5 }
   0xe   : > { %2199 = vmatprep.subr.msk.bf16.mxu1 %vm230_vm0, %v1881_v2  ;;  %2200 = vmatprep.subr.msk.bf16.mxu0 %vm230_vm0, %v1890_v3  ;;  %s2296_s23 = scalar_lea.vmem %s2528_s0, %s2207_s20  ;;  %vm466_vm2 = vsmask.f32 3328  ;;  %vm467_vm3 = vsmask.f32 7440  ;;  %v751_v13 = vsel %vm230_vm0, %v1907_v7, 0  ;;  %v2317_v14 = vsel %vm230_vm0, %v1924_v8, 0  ;;  %s170_s16 = scalar_lea.vmem %s2531_s3, %s2028_s11 }
   0xf   : > { %v2216_v6 = vld [vmem:[%s2296_s23] ss:$8 sps:$4 sm:$0xff]   ;;  %v2218_v10 = vld [vmem:[%s2296_s23 + $0x10] ss:$8 sps:$4 sm:$0xff]   ;;  %v451_v16 = vld [vmem:[%s2296_s23 + $0x4] sm:$0x1] }
  0x10   : > { %v2217_v9 = vld [vmem:[%s2296_s23 + $0x20] ss:$8 sps:$4 sm:$0xff]   ;;  %2107 = vmatprep.mubr.msk.bf16.mxu0 %vm217_vm1, %v2216_v6  ;;  %v2219_v11 = vld [vmem:[%s2296_s23 + $0x30] ss:$8 sps:$4 sm:$0xff]   ;;  %v453_v19 = vld [vmem:[%s2296_s23 + $0xc] sm:$0x1] }
  0x11   : > { %2111 = vmatprep.mubr.msk.bf16.mxu1 %vm217_vm1, %v2217_v9  ;;  %2108 = vmatmul.mubr.msk.bf16.vlgmr.msra.gmra.mxu0 %vm217_vm1, %v2218_v10  ;;  %v2220_v12 = vld [vmem:[%s2296_s23 + $0x48] ss:$8 sps:$4 sm:$0xff]   ;;  %v450_v15 = vld [vmem:[%s2296_s23] sm:$0xf]  ;;  %v479_v22 = vshll.u32 %v451_v16, 16  ;;  %v493_v25 = vshll.u32 %v453_v19, 16  ;;  %vm2338_vm4 = vmor %vm466_vm2, %vm467_vm3 }
  0x12   : > { %2112 = vmatmul.mubr.msk.bf16.vlgmr.msra.gmra.mxu1 %vm217_vm1, %v2219_v11  ;;  %2126 = vmatpush3.bf16.msra.mxu0 %v616_v5  ;;  %v452_v17 = vld [vmem:[%s2296_s23 + $0x8] sm:$0xf]  ;;  %v2221_v18 = vld [vmem:[%s2296_s23 + $0x58] ss:$8 sps:$4 sm:$0xff]   ;;  %v470_v20 = vshrl.u32 %v450_v15, 16  ;;  %v473_v21 = vshll.u32 %v450_v15, 16 }
  0x13   : > { %2116 = vmatpush3.bf16.msra.mxu1 %v367_v4  ;;  %2117 = vmatprep.mubr.msk.bf16.mxu1 %vm217_vm1, %v2220_v12  ;;  %v484_v23 = vshrl.u32 %v452_v17, 16  ;;  %v487_v24 = vshll.u32 %v452_v17, 16  ;;  %v454_v26 = vld [vmem:[%s2296_s23 + $0x10] sm:$0xf]  ;;  %v455_v27 = vld [vmem:[%s2296_s23 + $0x14] sm:$0x1] }
  0x14   : > { %2201 = vmatprep.subr.msk.bf16.mxu1 %vm230_vm0, %v1907_v7  ;;  %2202 = vmatprep.subr.msk.bf16.mxu0 %vm230_vm0, %v1924_v8  ;;  %v472_v28 = vrot.slane %v470_v20, 4  ;;  %v475_v29 = vrot.slane %v473_v21, 5  ;;  %v481_v30 = vrot.slane %v479_v22, 5  ;;  %v456_v32 = vld [vmem:[%s2296_s23 + $0x18] sm:$0xf]  ;;  %v495_v34 = vrot.slane %v493_v25, 5 }
  0x15   : > { %v486_v31 = vrot.slane %v484_v23, 4  ;;  %v489_v33 = vrot.slane %v487_v24, 5  ;;  %v457_v35 = vld [vmem:[%s2296_s23 + $0x1c] sm:$0x1]  ;;  %v498_v36 = vshrl.u32 %v454_v26, 16  ;;  %v501_v37 = vshll.u32 %v454_v26, 16 }
  0x16   : > { %v2334_v38 = vld [vmem:[%s2529_s1 + $0xa] sm:$0x3]  ;;  %v476_v39 = vor.u32 %v475_v29, %v472_v28  ;;  %v507_v40 = vshll.u32 %v455_v27, 16  ;;  %v512_v41 = vshrl.u32 %v456_v32, 16  ;;  %v515_v42 = vshll.u32 %v456_v32, 16 }
  0x17   : > { %v490_v44 = vor.u32 %v489_v33, %v486_v31  ;;  %v500_v45 = vrot.slane %v498_v36, 4  ;;  %v503_v46 = vrot.slane %v501_v37, 5  ;;  %v521_v47 = vshll.u32 %v457_v35, 16  ;;  %v2222_v52 = vld [vmem:[%s2296_s23 + $0x68] ss:$8 sps:$4 sm:$0xff]  }
  0x18   : > { %v477_v48 = vrot.slane %v476_v39, 4  ;;  %v509_v49 = vrot.slane %v507_v40, 5  ;;  %v514_v50 = vrot.slane %v512_v41, 4  ;;  %v517_v51 = vrot.slane %v515_v42, 5  ;;  %v2223_v58 = vld [vmem:[%s2296_s23 + $0x78] ss:$8 sps:$4 sm:$0xff]  }
  0x19   : > { %v491_v53 = vrot.slane %v490_v44, 4  ;;  %v504_v54 = vor.u32 %v503_v46, %v500_v45  ;;  %v523_v55 = vrot.slane %v521_v47, 5  ;;  %v458_v59 = vld [vmem:[%s2296_s23 + $0x20] sm:$0xf]  ;;  %v459_v60 = vld [vmem:[%s2296_s23 + $0x24] sm:$0x1] }
  0x1a   : > { %2118 = vmatmul.mubr.msk.bf16.vlgmr.msra.gmra.mxu1 %vm217_vm1, %v2221_v18  ;;  %v482_v56 = vsel %vm2338_vm4, %v477_v48, %v481_v30  ;;  %v518_v57 = vor.u32 %v517_v51, %v514_v50  ;;  %v460_v63 = vld [vmem:[%s2296_s23 + $0x28] sm:$0xf]  ;;  %v461_v0 = vld [vmem:[%s2296_s23 + $0x2c] sm:$0x1]  ;;  %v526_v1 = vshrl.u32 %v458_v59, 16  ;;  %v529_v4 = vshll.u32 %v458_v59, 16 }
  0x1b   : > { %2136 = vmatpush3.bf16.msra.mxu1 %v751_v13  ;;  %2121 = vmatprep.mubr.msk.bf16.mxu1 %vm217_vm1, %v2222_v52  ;;  %v496_v61 = vsel %vm2338_vm4, %v491_v53, %v495_v34  ;;  %v505_v62 = vrot.slane %v504_v54, 4  ;;  %v535_v5 = vshll.u32 %v459_v60, 16  ;;  %v462_v6 = vld [vmem:[%s2296_s23 + $0x30] sm:$0xf]  ;;  %v540_v9 = vshrl.u32 %v460_v63, 16 }
  0x1c   : > { %2203 = vmatprep.subr.msk.bf16.mxu1 %vm230_vm0, %v2334_v38  ;;  %v1891_v2 = vcombine.low %v482_v56, %v496_v61  ;;  %v519_v3 = vrot.slane %v518_v57, 4  ;;  %v528_v8 = vrot.slane %v526_v1, 4  ;;  %v543_v10 = vshll.u32 %v460_v63, 16  ;;  %v463_v11 = vld [vmem:[%s2296_s23 + $0x34] sm:$0x1] }
  0x1d   : > { %v510_v7 = vsel %vm2338_vm4, %v505_v62, %v509_v49  ;;  %v531_v13 = vrot.slane %v529_v4, 5  ;;  %v537_v15 = vrot.slane %v535_v5, 5  ;;  %v549_v16 = vshll.u32 %v461_v0, 16  ;;  %v464_v17 = vld [vmem:[%s2296_s23 + $0x38] sm:$0xf] }
  0x1e   : > { %2127 = vmatprep.mubr.msk.bf16.mxu0 %vm217_vm1, %v1891_v2  ;;  %v524_v12 = vsel %vm2338_vm4, %v519_v3, %v523_v55  ;;  %v1966_v18 = vld [vmem:[%s2529_s1 + $0xc] sm:$0x3]  ;;  %v542_v20 = vrot.slane %v540_v9, 4  ;;  %v545_v21 = vrot.slane %v543_v10, 5  ;;  %v465_v22 = vld [vmem:[%s2296_s23 + $0x3c] sm:$0x1] }
  0x1f   : > { %v1892_v19 = vcombine.low %v510_v7, %v524_v12  ;;  %v554_v23 = vshrl.u32 %v462_v6, 16  ;;  %v532_v24 = vor.u32 %v531_v13, %v528_v8  ;;  %v551_v25 = vrot.slane %v549_v16, 5  ;;  %v2224_v35 = vld [vmem:[%s2296_s23 + $0x90] ss:$8 sps:$4 sm:$0xff]   ;;  %v2225_v44 = vld [vmem:[%s2296_s23 + $0xa0] ss:$8 sps:$4 sm:$0xff]  }
  0x20   : > { %v557_v26 = vshll.u32 %v462_v6, 16  ;;  %v563_v27 = vshll.u32 %v463_v11, 16  ;;  %v546_v28 = vor.u32 %v545_v21, %v542_v20  ;;  %v568_v30 = vshrl.u32 %v464_v17, 16  ;;  %v1983_v51 = vld [vmem:[%s2529_s1 + $0xe] sm:$0x3] }
  0x21   : > { %2128 = vmatmul.mubr.msk.bf16.vlgmr.msra.gmra.mxu0 %vm217_vm1, %v1892_v19  ;;  %v556_v29 = vrot.slane %v554_v23, 4  ;;  %v571_v31 = vshll.u32 %v464_v17, 16  ;;  %v533_v32 = vrot.slane %v532_v24, 4  ;;  %v577_v34 = vshll.u32 %v465_v22, 16  ;;  %v2228_v53 = vld [vmem:[%s2296_s23 + $0xb0] ss:$8 sps:$4 sm:$0xff]  }
  0x22   : > { %2122 = vmatmul.mubr.msk.bf16.gmra.mxu1 %vm217_vm1, %v2223_v58  ;;  %2146 = vmatpush3.bf16.msra.mxu0 %v2317_v14  ;;  %v559_v33 = vrot.slane %v557_v26, 5  ;;  %v547_v36 = vrot.slane %v546_v28, 4  ;;  %v570_v37 = vrot.slane %v568_v30, 4  ;;  %v565_v42 = vrot.slane %v563_v27, 5  ;;  %v2229_v57 = vld [vmem:[%s2296_s23 + $0xc0] ss:$8 sps:$4 sm:$0xff]  }
  0x23   : > { %v573_v39 = vrot.slane %v571_v31, 5  ;;  %2204 = vmatprep.subr.msk.bf16.mxu0 %vm230_vm0, %v1966_v18  ;;  %v538_v40 = vsel %vm2338_vm4, %v533_v32, %v537_v15  ;;  %2137 = vmatprep.mubr.msk.bf16.mxu1 %vm217_vm1, %v2224_v35  ;;  %v579_v46 = vrot.slane %v577_v34, 5  ;;  %v1132_v49 = vsel %vm230_vm0, %v2334_v38, 0  ;;  %v2226_v38 = vld [vmem:[%s2296_s23 + $0xd8] ss:$8 sps:$4 sm:$0xff]  }
  0x24   : > { %v560_v41 = vor.u32 %v559_v33, %v556_v29  ;;  %v552_v14 = vsel %vm2338_vm4, %v547_v36, %v551_v25  ;;  %v1267_v56 = vsel %vm230_vm0, %v1966_v18, 0  ;;  %v1933_v58 = vld [vmem:[%s2296_s23 + $0x90] sm:$0xf]  ;;  %v1934_v59 = vld [vmem:[%s2296_s23 + $0x94] sm:$0x1]  ;;  %v1402_v31 = vsel %vm230_vm0, %v1983_v51, 0 }
  0x25   : > { %v574_v45 = vor.u32 %v573_v39, %v570_v37  ;;  %v1893_v47 = vcombine.low %v538_v40, %v552_v14  ;;  %v1935_v60 = vld [vmem:[%s2296_s23 + $0x98] sm:$0xf]  ;;  %v1936_v61 = vld [vmem:[%s2296_s23 + $0x9c] sm:$0x1]  ;;  %v986_v62 = vshrl.u32 %v1933_v58, 16  ;;  %v989_v63 = vshll.u32 %v1933_v58, 16 }
  0x26   : > { %v561_v48 = vrot.slane %v560_v41, 4  ;;  %v995_v0 = vshll.u32 %v1934_v59, 16  ;;  %v1000_v1 = vshrl.u32 %v1935_v60, 16  ;;  %v1937_v2 = vld [vmem:[%s2296_s23 + $0xa0] sm:$0xf]  ;;  %v1003_v4 = vshll.u32 %v1935_v60, 16 }
  0x27   : > { %v575_v50 = vrot.slane %v574_v45, 4  ;;  %2131 = vmatprep.mubr.msk.bf16.mxu0 %vm217_vm1, %v1893_v47  ;;  %v2227_v3 = vld [vmem:[%s2296_s23 + $0xe8] ss:$8 sps:$4 sm:$0xff]   ;;  %v1009_v5 = vshll.u32 %v1936_v61, 16  ;;  %v1938_v6 = vld [vmem:[%s2296_s23 + $0xa4] sm:$0x1] }
  0x28   : > { %v566_v52 = vsel %vm2338_vm4, %v561_v48, %v565_v42  ;;  %v1939_v7 = vld [vmem:[%s2296_s23 + $0xa8] sm:$0xf]  ;;  %v2230_v8 = vld [vmem:[%s2296_s23 + $0xf8] ss:$8 sps:$4 sm:$0xff]   ;;  %v988_v9 = vrot.slane %v986_v62, 4  ;;  %v991_v10 = vrot.slane %v989_v63, 5 }
  0x29   : > { %v580_v54 = vsel %vm2338_vm4, %v575_v50, %v579_v46  ;;  %v997_v11 = vrot.slane %v995_v0, 5  ;;  %v1002_v12 = vrot.slane %v1000_v1, 4  ;;  %v1940_v13 = vld [vmem:[%s2296_s23 + $0xac] sm:$0x1]  ;;  %v1005_v15 = vrot.slane %v1003_v4, 5 }
  0x2a   : > { %2138 = vmatmul.mubr.msk.bf16.vlgmr.msra.gmra.mxu1 %vm217_vm1, %v2225_v44  ;;  %v1894_v55 = vcombine.low %v566_v52, %v580_v54  ;;  %v1011_v16 = vrot.slane %v1009_v5, 5  ;;  %v1014_v17 = vshrl.u32 %v1937_v2, 16  ;;  %v1017_v18 = vshll.u32 %v1937_v2, 16  ;;  %v2412_v27 = vld [vmem:[%s2529_s1 + $0x10] sm:$0x3] }
  0x2b   : > { %2156 = vmatpush3.bf16.msra.mxu1 %v1132_v49  ;;  %2141 = vmatprep.mubr.msk.bf16.mxu1 %vm217_vm1, %v2228_v53  ;;  %v992_v19 = vor.u32 %v991_v10, %v988_v9  ;;  %v1023_v20 = vshll.u32 %v1938_v6, 16  ;;  %v1028_v21 = vshrl.u32 %v1939_v7, 16  ;;  %v1031_v22 = vshll.u32 %v1939_v7, 16  ;;  %v1941_v39 = vld [vmem:[%s2296_s23 + $0xb0] sm:$0xf] }
  0x2c   : > { %2205 = vmatprep.subr.msk.bf16.mxu1 %vm230_vm0, %v1983_v51  ;;  %2132 = vmatmul.mubr.msk.bf16.gmra.mxu0 %vm217_vm1, %v1894_v55  ;;  %v1006_v23 = vor.u32 %v1005_v15, %v1002_v12  ;;  %v1016_v24 = vrot.slane %v1014_v17, 4  ;;  %v1019_v25 = vrot.slane %v1017_v18, 5  ;;  %v1037_v26 = vshll.u32 %v1940_v13, 16  ;;  %v1942_v40 = vld [vmem:[%s2296_s23 + $0xb4] sm:$0x1] }
  0x2d   : > { %2147 = vmatprep.mubr.msk.bf16.mxu0 %vm217_vm1, %v2226_v38  ;;  %v993_v28 = vrot.slane %v992_v19, 4  ;;  %v1030_v29 = vrot.slane %v1028_v21, 4  ;;  %v1033_v30 = vrot.slane %v1031_v22, 5  ;;  %v1025_v34 = vrot.slane %v1023_v20, 5  ;;  %v1943_v41 = vld [vmem:[%s2296_s23 + $0xb8] sm:$0xf] }
  0x2e   : > { %v1007_v32 = vrot.slane %v1006_v23, 4  ;;  %v1020_v33 = vor.u32 %v1019_v25, %v1016_v24  ;;  %v1039_v35 = vrot.slane %v1037_v26, 5  ;;  %v2231_v42 = vld [vmem:[%s2296_s23 + $0x108] ss:$8 sps:$4 sm:$0xff]   ;;  %v1944_v45 = vld [vmem:[%s2296_s23 + $0xbc] sm:$0x1] }
  0x2f   : > { %v998_v36 = vsel %vm2338_vm4, %v993_v28, %v997_v11  ;;  %v1034_v37 = vor.u32 %v1033_v30, %v1030_v29  ;;  %v1042_v46 = vshrl.u32 %v1941_v39, 16  ;;  %v1045_v47 = vshll.u32 %v1941_v39, 16  ;;  %v2232_v50 = vld [vmem:[%s2296_s23 + $0x8] ss:$8 sps:$4 sm:$0xff]   ;;  %v1945_v53 = vld [vmem:[%s2296_s23 + $0xc0] sm:$0xf] }
  0x30   : > { %v1012_v44 = vsel %vm2338_vm4, %v1007_v32, %v1011_v16  ;;  %v1021_v14 = vrot.slane %v1020_v33, 4  ;;  %v1051_v51 = vshll.u32 %v1942_v40, 16  ;;  %v1056_v52 = vshrl.u32 %v1943_v41, 16  ;;  %v1947_v62 = vld [vmem:[%s2296_s23 + $0xc8] sm:$0xf] }
  0x31   : > { %v1950_v48 = vcombine.low %v998_v36, %v1012_v44  ;;  %v1035_v49 = vrot.slane %v1034_v37, 4  ;;  %v1044_v38 = vrot.slane %v1042_v46, 4  ;;  %v1047_v55 = vrot.slane %v1045_v47, 5  ;;  %v1948_v2 = vld [vmem:[%s2296_s23 + $0xcc] sm:$0x1] }
  0x32   : > { %2142 = vmatmul.mubr.msk.bf16.gmra.mxu1 %vm217_vm1, %v2229_v57  ;;  %v1026_v54 = vsel %vm2338_vm4, %v1021_v14, %v1025_v34  ;;  %v1946_v57 = vld [vmem:[%s2296_s23 + $0xc4] sm:$0x1]  ;;  %v1053_v59 = vrot.slane %v1051_v51, 5  ;;  %v1058_v60 = vrot.slane %v1056_v52, 4  ;;  %v1065_v61 = vshll.u32 %v1944_v45, 16 }
  0x33   : > { %2157 = vmatprep.mubr.msk.bf16.mxu1 %vm217_vm1, %v1950_v48  ;;  %v1040_v58 = vsel %vm2338_vm4, %v1035_v49, %v1039_v35  ;;  %v1048_v0 = vor.u32 %v1047_v55, %v1044_v38  ;;  %v1073_v5 = vshll.u32 %v1945_v53, 16  ;;  %v1079_v6 = vshll.u32 %v1946_v57, 16  ;;  %v2233_v16 = vld [vmem:[%s2296_s23 + $0x18] ss:$8 sps:$4 sm:$0xff]   ;;  %v2234_v29 = vld [vmem:[%s2296_s23 + $0x28] ss:$8 sps:$4 sm:$0xff]  }
  0x34   : > { %2148 = vmatmul.mubr.msk.bf16.vlgmr.msra.gmra.mxu0 %vm217_vm1, %v2227_v3  ;;  %v1951_v63 = vcombine.low %v1026_v54, %v1040_v58  ;;  %v1070_v3 = vshrl.u32 %v1945_v53, 16  ;;  %v1067_v4 = vrot.slane %v1065_v61, 5  ;;  %v1084_v7 = vshrl.u32 %v1947_v62, 16  ;;  %v1992_v30 = vld [vmem:[%s2296_s23 + $0x8] sm:$0xf] }
  0x35   : > { %2166 = vmatpush3.bf16.msra.mxu0 %v1267_v56  ;;  %2151 = vmatprep.mubr.msk.bf16.mxu0 %vm217_vm1, %v2230_v8  ;;  %v1059_v56 = vshll.u32 %v1943_v41, 16  ;;  %v1049_v8 = vrot.slane %v1048_v0, 4  ;;  %v1087_v11 = vshll.u32 %v1947_v62, 16  ;;  %v1075_v12 = vrot.slane %v1073_v5, 5  ;;  %v2236_v32 = vld [vmem:[%s2296_s23 + $0x50] ss:$8 sps:$4 sm:$0xff]  }
  0x36   : > { %2206 = vmatprep.subr.msk.bf16.mxu0 %vm230_vm0, %v2412_v27  ;;  %v1072_v10 = vrot.slane %v1070_v3, 4  ;;  %v1086_v13 = vrot.slane %v1084_v7, 4  ;;  %v1093_v15 = vshll.u32 %v1948_v2, 16  ;;  %v1081_v21 = vrot.slane %v1079_v6, 5  ;;  %v1993_v33 = vld [vmem:[%s2296_s23 + $0xc] sm:$0x1] }
  0x37   : > { %v1061_v1 = vrot.slane %v1059_v56, 5  ;;  %v1054_v17 = vsel %vm2338_vm4, %v1049_v8, %v1053_v59  ;;  %v1089_v19 = vrot.slane %v1087_v11, 5  ;;  %v1648_v25 = vsel %vm230_vm0, %v2412_v27, 0  ;;  %v1994_v34 = vld [vmem:[%s2296_s23 + $0x10] sm:$0xf] }
  0x38   : > { %v1076_v20 = vor.u32 %v1075_v12, %v1072_v10  ;;  %v1095_v24 = vrot.slane %v1093_v15, 5  ;;  %v1502_v35 = vshrl.u32 %v1992_v30, 16  ;;  %v1995_v37 = vld [vmem:[%s2296_s23 + $0x14] sm:$0x1]  ;;  %v1505_v39 = vshll.u32 %v1992_v30, 16 }
  0x39   : > { %v1062_v9 = vor.u32 %v1061_v1, %v1058_v60  ;;  %v1090_v23 = vor.u32 %v1089_v19, %v1086_v13  ;;  %v1511_v27 = vshll.u32 %v1993_v33, 16  ;;  %v1516_v40 = vshrl.u32 %v1994_v34, 16  ;;  %v1996_v45 = vld [vmem:[%s2296_s23 + $0x18] sm:$0xf]  ;;  %v1998_v54 = vld [vmem:[%s2296_s23 + $0x20] sm:$0xf] }
  0x3a   : > { %2158 = vmatmul.mubr.msk.bf16.vlgmr.msra.gmra.mxu1 %vm217_vm1, %v1951_v63  ;;  %v1077_v28 = vrot.slane %v1076_v20, 4  ;;  %v1519_v44 = vshll.u32 %v1994_v34, 16  ;;  %v1525_v14 = vshll.u32 %v1995_v37, 16  ;;  %v1507_v47 = vrot.slane %v1505_v39, 5  ;;  %v2235_v51 = vld [vmem:[%s2296_s23 + $0x38] ss:$8 sps:$4 sm:$0xff]  }
  0x3b   : > { %2176 = vmatpush3.bf16.msra.mxu1 %v1402_v31  ;;  %v1063_v18 = vrot.slane %v1062_v9, 4  ;;  %v1091_v31 = vrot.slane %v1090_v23, 4  ;;  %v1513_v48 = vrot.slane %v1511_v27, 5  ;;  %v1518_v49 = vrot.slane %v1516_v40, 4  ;;  %v1999_v38 = vld [vmem:[%s2296_s23 + $0x24] sm:$0x1] }
  0x3c   : > { %2152 = vmatmul.mubr.msk.bf16.gmra.mxu0 %vm217_vm1, %v2231_v42  ;;  %v1082_v36 = vsel %vm2338_vm4, %v1077_v28, %v1081_v21  ;;  %v1504_v42 = vrot.slane %v1502_v35, 4  ;;  %v1521_v52 = vrot.slane %v1519_v44, 5  ;;  %v1527_v53 = vrot.slane %v1525_v14, 5  ;;  %v2237_v63 = vld [vmem:[%s2296_s23 + $0x60] ss:$8 sps:$4 sm:$0xff]  }
  0x3d   : > { %2167 = vmatprep.mubr.msk.bf16.mxu0 %vm217_vm1, %v2232_v50  ;;  %v1068_v22 = vsel %vm2338_vm4, %v1063_v18, %v1067_v4  ;;  %v1096_v41 = vsel %vm2338_vm4, %v1091_v31, %v1095_v24  ;;  %v1997_v50 = vld [vmem:[%s2296_s23 + $0x1c] sm:$0x1]  ;;  %v1530_v56 = vshrl.u32 %v1996_v45, 16  ;;  %v1533_v57 = vshll.u32 %v1996_v45, 16  ;;  %v2238_v6 = vld [vmem:[%s2296_s23 + $0x70] ss:$8 sps:$4 sm:$0xff]  }
  0x3e   : > { %v1952_v26 = vcombine.low %v1054_v17, %v1068_v22  ;;  %v1953_v46 = vcombine.low %v1082_v36, %v1096_v41  ;;  %v1508_v55 = vor.u32 %v1507_v47, %v1504_v42  ;;  %v1539_v58 = vshll.u32 %v1997_v50, 16  ;;  %v2000_v11 = vld [vmem:[%s2296_s23 + $0x28] sm:$0xf]  ;;  %v2001_v15 = vld [vmem:[%s2296_s23 + $0x2c] sm:$0x1] }
  0x3f   : > { %v1522_v59 = vor.u32 %v1521_v52, %v1518_v49  ;;  %v1544_v60 = vshrl.u32 %v1998_v54, 16  ;;  %v1547_v61 = vshll.u32 %v1998_v54, 16  ;;  %v1553_v62 = vshll.u32 %v1999_v38, 16  ;;  %v2003_v17 = vld [vmem:[%s2296_s23 + $0x34] sm:$0x1] }
  0x40   : > { %2161 = vmatprep.mubr.msk.bf16.mxu1 %vm217_vm1, %v1952_v26  ;;  %v1509_v0 = vrot.slane %v1508_v55, 4  ;;  %v1532_v1 = vrot.slane %v1530_v56, 4  ;;  %v1535_v2 = vrot.slane %v1533_v57, 5  ;;  %v1541_v9 = vrot.slane %v1539_v58, 5  ;;  %v2004_v22 = vld [vmem:[%s2296_s23 + $0x38] sm:$0xf] }
  0x41   : > { %v1523_v3 = vrot.slane %v1522_v59, 4  ;;  %v1546_v4 = vrot.slane %v1544_v60, 4  ;;  %v1549_v5 = vrot.slane %v1547_v61, 5  ;;  %v1555_v10 = vrot.slane %v1553_v62, 5  ;;  %v2005_v28 = vld [vmem:[%s2296_s23 + $0x3c] sm:$0x1] }
  0x42   : > { %2162 = vmatmul.mubr.msk.bf16.gmra.mxu1 %vm217_vm1, %v1953_v46  ;;  %v1514_v7 = vsel %vm2338_vm4, %v1509_v0, %v1513_v48  ;;  %v1536_v8 = vor.u32 %v1535_v2, %v1532_v1  ;;  %v1558_v20 = vshrl.u32 %v2000_v11, 16  ;;  %v1561_v21 = vshll.u32 %v2000_v11, 16  ;;  %v2006_v33 = vld [vmem:[%s2296_s23 + $0x40] sm:$0xf]  ;;  %v2007_v39 = vld [vmem:[%s2296_s23 + $0x44] sm:$0x1] }
  0x43   : > { %2177 = vmatprep.mubr.msk.bf16.mxu1 %vm217_vm1, %v2236_v32  ;;  %v1528_v12 = vsel %vm2338_vm4, %v1523_v3, %v1527_v53  ;;  %v1550_v13 = vor.u32 %v1549_v5, %v1546_v4  ;;  %v1567_v24 = vshll.u32 %v2001_v15, 16  ;;  %v1581_v32 = vshll.u32 %v2003_v17, 16  ;;  %v2239_v47 = vld [vmem:[%s2296_s23 + $0x80] ss:$8 sps:$4 sm:$0xff]  }
  0x44   : > { %2168 = vmatmul.mubr.msk.bf16.vlgmr.msra.gmra.mxu0 %vm217_vm1, %v2233_v16  ;;  %v2002_v16 = vld [vmem:[%s2296_s23 + $0x30] sm:$0xf]  ;;  %v2009_v18 = vcombine.low %v1514_v7, %v1528_v12  ;;  %v1537_v19 = vrot.slane %v1536_v8, 4  ;;  %v1560_v30 = vrot.slane %v1558_v20, 4  ;;  %v1563_v31 = vrot.slane %v1561_v21, 5 }
  0x45   : > { %2186 = vmatpush3.bf16.msra.mxu0 %v1648_v25  ;;  %2171 = vmatprep.mubr.msk.bf16.mxu0 %vm217_vm1, %v2234_v29  ;;  %v1551_v23 = vrot.slane %v1550_v13, 4  ;;  %v1572_v25 = vshrl.u32 %v2002_v16, 16  ;;  %v1575_v26 = vshll.u32 %v2002_v16, 16  ;;  %v1569_v35 = vrot.slane %v1567_v24, 5 }
  0x46   : > { %v1542_v29 = vsel %vm2338_vm4, %v1537_v19, %v1541_v9  ;;  %v1564_v40 = vor.u32 %v1563_v31, %v1560_v30  ;;  %v1583_v41 = vrot.slane %v1581_v32, 5  ;;  %v1586_v42 = vshrl.u32 %v2004_v22, 16 }
  0x47   : > { %v1556_v34 = vsel %vm2338_vm4, %v1551_v23, %v1555_v10  ;;  %v1574_v36 = vrot.slane %v1572_v25, 4  ;;  %v1577_v37 = vrot.slane %v1575_v26, 5  ;;  %v1589_v14 = vshll.u32 %v2004_v22, 16 }
  0x48   : > { %v2010_v27 = vcombine.low %v1542_v29, %v1556_v34  ;;  %v1595_v45 = vshll.u32 %v2005_v28, 16  ;;  %v1600_v46 = vshrl.u32 %v2006_v33, 16  ;;  %v1565_v48 = vrot.slane %v1564_v40, 4 }
  0x49   : > { %v1578_v44 = vor.u32 %v1577_v37, %v1574_v36  ;;  %v1588_v49 = vrot.slane %v1586_v42, 4  ;;  %v1603_v50 = vshll.u32 %v2006_v33, 16  ;;  %v1591_v53 = vrot.slane %v1589_v14, 5 }
  0x4a   : > { %2178 = vmatmul.mubr.msk.bf16.vlgmr.msra.gmra.mxu1 %vm217_vm1, %v2237_v63  ;;  %v1602_v54 = vrot.slane %v1600_v46, 4  ;;  %v1570_v38 = vsel %vm2338_vm4, %v1565_v48, %v1569_v35  ;;  %v1597_v58 = vrot.slane %v1595_v45, 5 }
  0x4b   : > { %2181 = vmatprep.mubr.msk.bf16.mxu1 %vm217_vm1, %v2238_v6  ;;  %v1579_v52 = vrot.slane %v1578_v44, 4  ;;  %v1605_v55 = vrot.slane %v1603_v50, 5  ;;  %v1592_v57 = vor.u32 %v1591_v53, %v1588_v49 }
  0x4c   : > { %2172 = vmatmul.mubr.msk.bf16.gmra.mxu0 %vm217_vm1, %v2235_v51  ;;  %v1609_v51 = vshll.u32 %v2007_v39, 16 }
  0x4d   : > { %2187 = vmatprep.mubr.msk.bf16.mxu0 %vm217_vm1, %v2009_v18  ;;  %v1584_v56 = vsel %vm2338_vm4, %v1579_v52, %v1583_v41  ;;  %v1606_v60 = vor.u32 %v1605_v55, %v1602_v54  ;;  %v1593_v62 = vrot.slane %v1592_v57, 4 }
  0x4e   : > { %v2011_v59 = vcombine.low %v1570_v38, %v1584_v56  ;;  %v1611_v61 = vrot.slane %v1609_v51, 5 }
  0x4f   : > { %v1607_v63 = vrot.slane %v1606_v60, 4  ;;  %v1598_v0 = vsel %vm2338_vm4, %v1593_v62, %v1597_v58 }
  0x51   : > { %v1612_v1 = vsel %vm2338_vm4, %v1607_v63, %v1611_v61 }
  0x52   : > { %2182 = vmatmul.mubr.msk.bf16.gmra.mxu1 %vm217_vm1, %v2239_v47  ;;  %v2012_v2 = vcombine.low %v1598_v0, %v1612_v1 }
  0x54   : > { %2188 = vmatmul.mubr.msk.bf16.vlgmr.msra.gmra.mxu0 %vm217_vm1, %v2010_v27 }
  0x55   : > { %2191 = vmatprep.mubr.msk.bf16.mxu0 %vm217_vm1, %v2011_v59 }
  0x5c   : > { %2192 = vmatmul.mubr.msk.bf16.gmra.mxu0 %vm217_vm1, %v2012_v2 }
  0xd1   : > { %v2109_v5 = vpop.f32.mrf.mxu0 }
  0xd2   : > { %v2113_v3 = vpop.f32.mrf.mxu1 }
  0xd3   : > { %v268_v8 = vpop.f32.mrf.mxu0 }
  0xd4   : > { %v284_v4 = vpop.f32.mrf.mxu1 }
  0xd5   : > { %v2110_v11 = vpop.f32.mrf.mxu0 }
  0xd6   : > { %v2503_v6 = vpop.f32.mrf.mxu1 }
  0xd7   : > { %v271_v15 = vpop.f32.mrf.mxu0 }
  0xd8   : > { %v2505_v7 = vpop.f32.mrf.mxu1 }
  0xda   : > { %v2119_v9 = vpop.f32.mrf.mxu1 }
  0xdb   : > { %v436_v14 = vadd.f32 %v2119_v9, %v2109_v5 }
  0xdc   : > { %v403_v10 = vpop.f32.mrf.mxu1 }
  0xdd   : > { %v434_v47 = vadd.f32 %v403_v10, %v268_v8 }
  0xde   : > { %v2120_v12 = vpop.f32.mrf.mxu1 }
  0xdf   : > { %v437_v50 = vadd.f32 %v2120_v12, %v2110_v11 }
  0xe0   : > { %v406_v13 = vpop.f32.mrf.mxu1 }
  0xe1   : > { %v2129_v43 = vpop.f32.mrf.mxu0  ;;  %v435_v54 = vadd.f32 %v406_v13, %v271_v15 }
  0xe2   : > { %v2123_v16 = vpop.f32.mrf.mxu1  ;;  %v685_v49 = vadd.f32 %v2129_v43, %v436_v14 }
  0xe3   : > { %v652_v18 = vpop.f32.mrf.mxu0  ;;  %v440_v61 = vadd.f32 %v2123_v16, %v2113_v3 }
  0xe4   : > { %v419_v17 = vpop.f32.mrf.mxu1  ;;  %v683_v53 = vadd.f32 %v652_v18, %v434_v47 }
  0xe5   : > { %v2130_v20 = vpop.f32.mrf.mxu0  ;;  %v438_v1 = vadd.f32 %v419_v17, %v284_v4 }
  0xe6   : > { %v2124_v19 = vpop.f32.mrf.mxu1  ;;  %v686_v56 = vadd.f32 %v2130_v20, %v437_v50 }
  0xe7   : > { %v655_v22 = vpop.f32.mrf.mxu0  ;;  %v441_v11 = vadd.f32 %v2124_v19, %v2503_v6 }
  0xe8   : > { %v422_v21 = vpop.f32.mrf.mxu1  ;;  %v684_v60 = vadd.f32 %v655_v22, %v435_v54 }
  0xe9   : > { %v439_v22 = vadd.f32 %v422_v21, %v2505_v7 }
  0xea   : > { %v2139_v23 = vpop.f32.mrf.mxu1 }
  0xeb   : > { %v820_v38 = vadd.f32 %v2139_v23, %v685_v49 }
  0xec   : > { %v787_v24 = vpop.f32.mrf.mxu1  ;;  %v2133_v25 = vpop.f32.mrf.mxu0 }
  0xed   : > { %v818_v57 = vadd.f32 %v787_v24, %v683_v53  ;;  %v689_v13 = vadd.f32 %v2133_v25, %v440_v61 }
  0xee   : > { %v2140_v26 = vpop.f32.mrf.mxu1  ;;  %v668_v28 = vpop.f32.mrf.mxu0 }
  0xef   : > { %v821_v63 = vadd.f32 %v2140_v26, %v686_v56  ;;  %v687_v20 = vadd.f32 %v668_v28, %v438_v1 }
  0xf0   : > { %v790_v29 = vpop.f32.mrf.mxu1  ;;  %v2134_v30 = vpop.f32.mrf.mxu0 }
  0xf1   : > { %v819_v8 = vadd.f32 %v790_v29, %v684_v60  ;;  %v690_v26 = vadd.f32 %v2134_v30, %v441_v11 }
  0xf2   : > { %v2143_v31 = vpop.f32.mrf.mxu1  ;;  %v671_v32 = vpop.f32.mrf.mxu0 }
  0xf3   : > { %v824_v23 = vadd.f32 %v2143_v31, %v689_v13  ;;  %v688_v25 = vadd.f32 %v671_v32, %v439_v22  ;;  %v2017_v32 = vld [vmem:[%s2530_s2] ss:$0 sm:$0xff] }
  0xf4   : > { %v803_v33 = vpop.f32.mrf.mxu1  ;;  %v2149_v34 = vpop.f32.mrf.mxu0 }
  0xf5   : > { %v955_v62 = vadd.f32 %v2149_v34, %v820_v38  ;;  %v822_v29 = vadd.f32 %v803_v33, %v687_v20 }
  0xf6   : > { %v2144_v35 = vpop.f32.mrf.mxu1  ;;  %v922_v36 = vpop.f32.mrf.mxu0 }
  0xf7   : > { %v953_v5 = vadd.f32 %v922_v36, %v818_v57 }
  0xf8   : > { %v2150_v37 = vpop.f32.mrf.mxu0  ;;  %v2507_v39 = vpop.f32.mrf.mxu1 }
  0xf9   : > { %v956_v15 = vadd.f32 %v2150_v37, %v821_v63  ;;  %v825_v37 = vadd.f32 %v2144_v35, %v690_v26  ;;  %v823_v31 = vadd.f32 %v2507_v39, %v688_v25 }
  0xfa   : > { %v925_v27 = vpop.f32.mrf.mxu0  ;;  %v2159_v41 = vpop.f32.mrf.mxu1 }
  0xfb   : > { %v1201_v9 = vadd.f32 %v2159_v41, %v955_v62  ;;  %v954_v16 = vadd.f32 %v925_v27, %v819_v8 }
  0xfc   : > { %v2153_v40 = vpop.f32.mrf.mxu0  ;;  %v1168_v44 = vpop.f32.mrf.mxu1 }
  0xfd   : > { %v1199_v43 = vadd.f32 %v1168_v44, %v953_v5  ;;  %v959_v14 = vadd.f32 %v2153_v40, %v824_v23 }
  0xfe   : > { %v938_v42 = vpop.f32.mrf.mxu0  ;;  %v2160_v46 = vpop.f32.mrf.mxu1 }
  0xff   : > { %v1202_v4 = vadd.f32 %v2160_v46, %v956_v15  ;;  %v957_v21 = vadd.f32 %v938_v42, %v822_v29 }
 0x100   : > { %v2509_v45 = vpop.f32.mrf.mxu0  ;;  %v1171_v51 = vpop.f32.mrf.mxu1 }
 0x101   : > { %v1200_v41 = vadd.f32 %v1171_v51, %v954_v16  ;;  %v960_v51 = vadd.f32 %v2509_v45, %v825_v37 }
 0x102   : > { %v2511_v48 = vpop.f32.mrf.mxu0  ;;  %v2163_v58 = vpop.f32.mrf.mxu1 }
 0x103   : > { %v1205_v49 = vadd.f32 %v2163_v58, %v959_v14  ;;  %v958_v39 = vadd.f32 %v2511_v48, %v823_v31 }
 0x104   : > { %v2169_v52 = vpop.f32.mrf.mxu0  ;;  %v1184_v0 = vpop.f32.mrf.mxu1 }
 0x105   : > { %v1336_v24 = vadd.f32 %v2169_v52, %v1201_v9  ;;  %v1203_v40 = vadd.f32 %v1184_v0, %v957_v21 }
 0x106   : > { %v1303_v55 = vpop.f32.mrf.mxu0  ;;  %v2164_v10 = vpop.f32.mrf.mxu1 }
 0x107   : > { %v1334_v36 = vadd.f32 %v1303_v55, %v1199_v43  ;;  %v1206_v54 = vadd.f32 %v2164_v10, %v960_v51 }
 0x108   : > { %v2170_v59 = vpop.f32.mrf.mxu0  ;;  %v1187_v18 = vpop.f32.mrf.mxu1 }
 0x109   : > { %v1337_v28 = vadd.f32 %v2170_v59, %v1202_v4  ;;  %v1204_v59 = vadd.f32 %v1187_v18, %v958_v39 }
 0x10a   : > { %v1306_v2 = vpop.f32.mrf.mxu0  ;;  %v2179_v17 = vpop.f32.mrf.mxu1 }
 0x10b   : > { %v1471_v6 = vadd.f32 %v2179_v17, %v1336_v24  ;;  %v1335_v46 = vadd.f32 %v1306_v2, %v1200_v41 }
 0x10c   : > { %v2173_v12 = vpop.f32.mrf.mxu0  ;;  %v1438_v19 = vpop.f32.mrf.mxu1 }
 0x10d   : > { %v1469_v47 = vadd.f32 %v1438_v19, %v1334_v36  ;;  %v1340_v55 = vadd.f32 %v2173_v12, %v1205_v49 }
 0x10e   : > { %v1319_v3 = vpop.f32.mrf.mxu0  ;;  %v2180_v7 = vpop.f32.mrf.mxu1 }
 0x10f   : > { %v1472_v33 = vadd.f32 %v2180_v7, %v1337_v28  ;;  %v1338_v61 = vadd.f32 %v1319_v3, %v1203_v40 }
 0x110   : > { %v2174_v34 = vpop.f32.mrf.mxu0  ;;  %v1441_v50 = vpop.f32.mrf.mxu1 }
 0x111   : > { %v1470_v53 = vadd.f32 %v1441_v50, %v1335_v46  ;;  %v1341_v2 = vadd.f32 %v2174_v34, %v1206_v54 }
 0x112   : > { %v1322_v44 = vpop.f32.mrf.mxu0  ;;  %v2183_v42 = vpop.f32.mrf.mxu1 }
 0x113   : > { %v1475_v1 = vadd.f32 %v2183_v42, %v1340_v55  ;;  %v1339_v10 = vadd.f32 %v1322_v44, %v1204_v59 }
 0x114   : > { %v2189_v27 = vpop.f32.mrf.mxu0  ;;  %v1454_v58 = vpop.f32.mrf.mxu1 }
 0x115   : > { %v1717_v30 = vadd.f32 %v2189_v27, %v1471_v6  ;;  %v1473_v48 = vadd.f32 %v1454_v58, %v1338_v61 }
 0x116   : > { %v1684_v35 = vpop.f32.mrf.mxu0  ;;  %v2184_v0 = vpop.f32.mrf.mxu1 }
 0x117   : > { %v1715_v52 = vadd.f32 %v1684_v35, %v1469_v47  ;;  %v1748_v56 = vadd.f32 %v2017_v32, %v1717_v30  ;;  %v1476_v20 = vadd.f32 %v2184_v0, %v1341_v2 }
 0x118   : > { %v2190_v38 = vpop.f32.mrf.mxu0  ;;  %v1457_v13 = vpop.f32.mrf.mxu1 }
 0x119   : > { %v1718_v57 = vadd.f32 %v2190_v38, %v1472_v33  ;;  %v1746_v45 = vadd.f32 %v2017_v32, %v1715_v52  ;;  %v1756_v5 = vmax.f32 %v1748_v56, 0.0  ;;  %v1474_v23 = vadd.f32 %v1457_v13, %v1339_v10 }
 0x11a   : > { %v1687_v60 = vpop.f32.mrf.mxu0 }
 0x11b   : > { %v1749_v62 = vadd.f32 %v2017_v32, %v1718_v57  ;;  %v1716_v63 = vadd.f32 %v1687_v60, %v1470_v53  ;;  %v1754_v11 = vmax.f32 %v1746_v45, 0.0 }
 0x11c   : > { %v2193_v12 = vpop.f32.mrf.mxu0 }
 0x11d   : > { %v1757_v8 = vmax.f32 %v1749_v62, 0.0  ;;  %v1747_v9 = vadd.f32 %v2017_v32, %v1716_v63  ;;  %v1721_v18 = vadd.f32 %v2193_v12, %v1475_v1 }
 0x11e   : > { %v1700_v22 = vpop.f32.mrf.mxu0 }
 0x11f   : > { %v2045_v15 = vpack.c.bf16 %v1757_v8, %v1756_v5  ;;  %v1755_v43 = vmax.f32 %v1747_v9, 0.0  ;;  %v1719_v16 = vadd.f32 %v1700_v22, %v1473_v48  ;;  %v1752_v4 = vadd.f32 %v2017_v32, %v1721_v18 }
 0x120   : > { %v2194_v24 = vpop.f32.mrf.mxu0 }
 0x121   : > { %2057 = vst [vmem:[%s170_s16 + $0x8] sm:$0xff] %v2045_v15   ;;  %v2040_v3 = vpack.c.bf16 %v1755_v43, %v1754_v11  ;;  %v1722_v17 = vadd.f32 %v2194_v24, %v1476_v20  ;;  %v1750_v29 = vadd.f32 %v2017_v32, %v1719_v16  ;;  %v1760_v41 = vmax.f32 %v1752_v4, 0.0 }
 0x122   : > { %v1703_v26 = vpop.f32.mrf.mxu0 }
 0x123   : > { %2041 = vst [vmem:[%s170_s16] sm:$0xff] %v2040_v3   ;;  %v1753_v34 = vadd.f32 %v2017_v32, %v1722_v17  ;;  %v1720_v36 = vadd.f32 %v1703_v26, %v1474_v23  ;;  %v1758_v25 = vmax.f32 %v1750_v29, 0.0 }
 0x125   : > { %v1761_v6 = vmax.f32 %v1753_v34, 0.0  ;;  %v1751_v19 = vadd.f32 %v2017_v32, %v1720_v36 }
 0x127   : > { %v2055_v37 = vpack.c.bf16 %v1761_v6, %v1760_v41  ;;  %v1759_v44 = vmax.f32 %v1751_v19, 0.0 }
 0x129   : > { %2059 = vst [vmem:[%s170_s16 + $0x18] sm:$0xff] %v2055_v37   ;;  %v2050_v14 = vpack.c.bf16 %v1759_v44, %v1758_v25 }
 0x12b   : > { %2058 = vst [vmem:[%s170_s16 + $0x10] sm:$0xff] %v2050_v14  }
 0x12c PF: > { %s13_s12 = sadd.s32 1, %s2246_s12  }
 0x12d   : > { %p10_p4 = scmp.ge.s32.totalorder %s13_s12, 4  }
 0x12f   :  { %12 = sbr.rel (!%p10_p4) target bundleno = 1 (0x1), region = 75 }

// kernel: basic_block_forward.3
= control target key start
LH: loop header
LB: loop body
LE: loop exit
PB: predicated region body
PF: predicated region fallthrough
CT: control target
= control target key end

     0   :  { %s3526_s21 = smov 0   ;;  %s4094_s0 = inlined_call_operand.vmem [shape: bf16[2,10,10,128], index: 0, kind: input, shape index: {}]   ;;  %s4095_s1 = inlined_call_operand.vmem [shape: bf16[9,128,128], index: 1, kind: input, shape index: {}]   ;;  %s4096_s2 = inlined_call_operand.vmem [shape: f32[1,128], index: 2, kind: input, shape index: {}]   ;;  %s4097_s3 = inlined_call_operand.vmem [shape: bf16[2,64,4], index: 3, kind: input, shape index: {}]   ;;  %s4098_s4 = inlined_call_operand.vmem [shape: bf16[4,128], index: 4, kind: input, shape index: {}]   ;;  %s4099_s5 = inlined_call_operand.vmem [shape: f32[1,128], index: 5, kind: input, shape index: {}]   ;;  %s4100_s6 = inlined_call_operand.vmem [shape: f32[2,64,128], index: 6, kind: output, shape index: {}]  }
   0x1 LB: > { %s2682_s22 = sadd.s32 4294967295, %s3489_s21   ;;  %p2686_p0 = scmp.ge.s32.totalorder %s3489_s21, 1  ;;  %s3489_s21 = sphi %s3526_s21, %s16_s21  }
   0x2   : > { %p222_p1 = scmp.lt.s32.totalorder %s3489_s21, 3 }
   0x4   : > { %p223_p2 = pnand %p2686_p0, %p222_p1 }
   0x6   : > { %226 = sbr.rel (%p223_p2) target bundleno = 390 (0x186), region = 44 }
   0xb   : > { %v3395_v0 = vld [vmem:[%s4095_s1 + $0x38] sm:$0xff]   ;;  %v3397_v2 = vld [vmem:[%s4095_s1 + $0x30] sm:$0xff]   ;;  %p257_p3 = scmp.lt.s32.totalorder %s2682_s22, 1  ;;  %v3399_v4 = vld [vmem:[%s4095_s1 + $0x28] sm:$0xff]   ;;  %vm482_vm0 = vsmask.f32 3328 }
   0xc   : > { %v3396_v1 = vld [vmem:[%s4095_s1 + $0x78] sm:$0xff]   ;;  %3159 = vmatprep.subr.bf16.mxu0 %v3395_v0  ;;  %v3398_v3 = vld [vmem:[%s4095_s1 + $0x70] sm:$0xff]   ;;  %v3400_v5 = vld [vmem:[%s4095_s1 + $0x68] sm:$0xff]   ;;  %vm483_vm1 = vsmask.f32 7440  ;;  %vm799_vm3 = vcmask 1042432  }
   0xd   : > { %3183 = vmatprep.subr.bf16.mxu1 %v3396_v1  ;;  %3160 = vmatpush3.bf16.msra.mxu0 %v3395_v0  ;;  %s4122_s22 = smov (!%p257_p3, %s2682_s22), 1  ;;  %v3401_v6 = vld [vmem:[%s4095_s1 + $0x20] sm:$0xff]   ;;  %v3403_v8 = vld [vmem:[%s4095_s1 + $0x18] sm:$0xff]   ;;  %v3405_v10 = vld [vmem:[%s4095_s1 + $0x10] sm:$0xff]   ;;  %vm800_vm4 = vcmask 1046532   ;;  %vm2507_vm6 = vcmask 1041408  }
   0xe   : > { %3184 = vmatpush3.bf16.msra.mxu1 %v3396_v1  ;;  %3161 = vmatprep.subr.bf16.mxu0 %v3397_v2  ;;  %v3402_v7 = vld [vmem:[%s4095_s1 + $0x60] sm:$0xff]   ;;  %s3386_s15 = smul.u32 80, %s4122_s22  ;;  %v3404_v9 = vld [vmem:[%s4095_s1 + $0x58] sm:$0xff]   ;;  %v3406_v11 = vld [vmem:[%s4095_s1 + $0x50] sm:$0xff]   ;;  %s3044_s10 = sshll.u32 %s4122_s22, 5  ;;  %vm2494_vm7 = vcmask 31744  }
   0xf   : > { %3185 = vmatprep.subr.bf16.mxu1 %v3398_v3  ;;  %v3407_v16 = vld [vmem:[%s4095_s1 + $0x8] sm:$0xff]   ;;  %v3409_v39 = vld [vmem:[%s4095_s1] sm:$0xff]   ;;  %vm3598_vm2 = vmor %vm482_vm0, %vm483_vm1  ;;  %s3930_s17 = scalar_lea.vmem %s4097_s3, %s3044_s10  ;;  %s3045_s8 = sshll.u32 %s4122_s22, 6 }
  0x10   : > { %s3573_s26 = scalar_lea.vmem %s4094_s0, %s3386_s15  ;;  %v3408_v18 = vld [vmem:[%s4095_s1 + $0x48] sm:$0xff]   ;;  %v3410_v45 = vld [vmem:[%s4095_s1 + $0x40] sm:$0xff]   ;;  %v3413_v59 = vld [vmem:[%s4095_s1 + $0xb8] sm:$0xff]   ;;  %s4074_s10 = scalar_lea.vmem %s4100_s6, %s3045_s8 }
  0x11   : > { %3162 = vmatpush3.bf16.msra.mxu0 %v3397_v2  ;;  %v3411_v12 = vld [vmem:[%s3573_s26] ss:$8 sps:$4 sm:$0xff]   ;;  %v467_v14 = vld [vmem:[%s3573_s26 + $0x4] sm:$0x1]  ;;  %v469_v17 = vld [vmem:[%s3573_s26 + $0xc] sm:$0x1] }
  0x12   : > { %3186 = vmatpush3.bf16.msra.mxu1 %v3398_v3  ;;  %3163 = vmatprep.subr.bf16.mxu0 %v3399_v4  ;;  %v466_v13 = vld [vmem:[%s3573_s26] sm:$0xf]  ;;  %v468_v15 = vld [vmem:[%s3573_s26 + $0x8] sm:$0xf]  ;;  %v495_v21 = vshll.u32 %v467_v14, 16  ;;  %v509_v24 = vshll.u32 %v469_v17, 16  ;;  %vm3659_vm5 = vmor %vm799_vm3, %vm800_vm4 }
  0x13   : > { %3187 = vmatprep.subr.bf16.mxu1 %v3400_v5  ;;  %3175 = vmatprep.mubr.bf16.mxu0 %v3411_v12  ;;  %v486_v19 = vshrl.u32 %v466_v13, 16  ;;  %v489_v20 = vshll.u32 %v466_v13, 16  ;;  %v500_v22 = vshrl.u32 %v468_v15, 16  ;;  %v503_v23 = vshll.u32 %v468_v15, 16  ;;  %v470_v29 = vld [vmem:[%s3573_s26 + $0x10] sm:$0xf] }
  0x14   : > { %v497_v27 = vrot.slane %v495_v21, 5  ;;  %v511_v31 = vrot.slane %v509_v24, 5  ;;  %v471_v32 = vld [vmem:[%s3573_s26 + $0x14] sm:$0x1]  ;;  %v472_v33 = vld [vmem:[%s3573_s26 + $0x18] sm:$0xf] }
  0x15   : > { %3164 = vmatpush3.bf16.msra.mxu0 %v3399_v4  ;;  %v488_v25 = vrot.slane %v486_v19, 4  ;;  %v491_v26 = vrot.slane %v489_v20, 5  ;;  %v502_v28 = vrot.slane %v500_v22, 4  ;;  %v505_v30 = vrot.slane %v503_v23, 5  ;;  %v473_v35 = vld [vmem:[%s3573_s26 + $0x1c] sm:$0x1] }
  0x16   : > { %3188 = vmatpush3.bf16.msra.mxu1 %v3400_v5  ;;  %3165 = vmatprep.subr.bf16.mxu0 %v3401_v6  ;;  %v514_v36 = vshrl.u32 %v470_v29, 16  ;;  %v517_v37 = vshll.u32 %v470_v29, 16  ;;  %v523_v38 = vshll.u32 %v471_v32, 16  ;;  %v528_v42 = vshrl.u32 %v472_v33, 16  ;;  %v3412_v56 = vld [vmem:[%s3573_s26 + $0x10] ss:$8 sps:$4 sm:$0xff]  }
  0x17   : > { %3189 = vmatprep.subr.bf16.mxu1 %v3402_v7  ;;  %v492_v34 = vor.u32 %v491_v26, %v488_v25  ;;  %v506_v41 = vor.u32 %v505_v30, %v502_v28  ;;  %v531_v43 = vshll.u32 %v472_v33, 16  ;;  %v537_v44 = vshll.u32 %v473_v35, 16  ;;  %v3414_v62 = vld [vmem:[%s4095_s1 + $0xf8] sm:$0xff]   ;;  %v3415_v2 = vld [vmem:[%s4095_s1 + $0xb0] sm:$0xff]   ;;  %v3417_v5 = vld [vmem:[%s4095_s1 + $0xa8] sm:$0xff]  }
  0x18   : > { %v516_v47 = vrot.slane %v514_v36, 4  ;;  %v519_v48 = vrot.slane %v517_v37, 5  ;;  %v525_v50 = vrot.slane %v523_v38, 5  ;;  %v530_v51 = vrot.slane %v528_v42, 4  ;;  %v3416_v4 = vld [vmem:[%s4095_s1 + $0xf0] sm:$0xff]   ;;  %v3420_v21 = vld [vmem:[%s4095_s1 + $0xe0] sm:$0xff]  }
  0x19   : > { %3166 = vmatpush3.bf16.msra.mxu0 %v3401_v6  ;;  %v493_v46 = vrot.slane %v492_v34, 4  ;;  %v507_v49 = vrot.slane %v506_v41, 4  ;;  %v533_v52 = vrot.slane %v531_v43, 5  ;;  %v539_v58 = vrot.slane %v537_v44, 5  ;;  %v3418_v6 = vld [vmem:[%s4095_s1 + $0xe8] sm:$0xff]   ;;  %v3421_v42 = vld [vmem:[%s4095_s1 + $0x98] sm:$0xff]  }
  0x1a   : > { %3190 = vmatpush3.bf16.msra.mxu1 %v3402_v7  ;;  %3167 = vmatprep.subr.bf16.mxu0 %v3403_v8  ;;  %v520_v54 = vor.u32 %v519_v48, %v516_v47  ;;  %v3422_v7 = vld [vmem:[%s3573_s26 + $0x20] ss:$8 sps:$4 sm:$0xff]   ;;  %v478_v28 = vld [vmem:[%s3573_s26 + $0x30] sm:$0xf]  ;;  %v479_v30 = vld [vmem:[%s3573_s26 + $0x34] sm:$0x1] }
  0x1b   : > { %3191 = vmatprep.subr.bf16.mxu1 %v3404_v9  ;;  %v498_v53 = vsel %vm3598_vm2, %v493_v46, %v497_v27  ;;  %v512_v55 = vsel %vm3598_vm2, %v507_v49, %v511_v31  ;;  %v534_v57 = vor.u32 %v533_v52, %v530_v51  ;;  %v3424_v27 = vld [vmem:[%s3573_s26 + $0x30] ss:$8 sps:$4 sm:$0xff]   ;;  %v481_v32 = vld [vmem:[%s3573_s26 + $0x3c] sm:$0x1]  ;;  %v570_v34 = vshrl.u32 %v478_v28, 16 }
  0x1c   : > { %v2720_v60 = vcombine.low %v498_v53, %v512_v55  ;;  %v521_v61 = vrot.slane %v520_v54, 4  ;;  %v480_v31 = vld [vmem:[%s3573_s26 + $0x38] sm:$0xf]  ;;  %v573_v35 = vshll.u32 %v478_v28, 16  ;;  %v579_v36 = vshll.u32 %v479_v30, 16 }
  0x1d   : > { %3168 = vmatpush3.bf16.msra.mxu0 %v3403_v8  ;;  %v535_v63 = vrot.slane %v534_v57, 4  ;;  %v474_v8 = vld [vmem:[%s3573_s26 + $0x20] sm:$0xf]  ;;  %v584_v38 = vshrl.u32 %v480_v31, 16  ;;  %v593_v41 = vshll.u32 %v481_v32, 16  ;;  %v572_v44 = vrot.slane %v570_v34, 4 }
  0x1e   : > { %3192 = vmatpush3.bf16.msra.mxu1 %v3404_v9  ;;  %3169 = vmatprep.subr.bf16.mxu0 %v3405_v10  ;;  %v526_v0 = vsel %vm3598_vm2, %v521_v61, %v525_v50  ;;  %v475_v9 = vld [vmem:[%s3573_s26 + $0x24] sm:$0x1]  ;;  %v542_v12 = vshrl.u32 %v474_v8, 16  ;;  %v545_v13 = vshll.u32 %v474_v8, 16  ;;  %v3423_v47 = vld [vmem:[%s4095_s1 + $0xd8] sm:$0xff]   ;;  %v581_v48 = vrot.slane %v579_v36, 5 }
  0x1f   : > { %3193 = vmatprep.subr.bf16.mxu1 %v3406_v11  ;;  %3199 = vmatprep.mubr.bf16.mxu1 %v2720_v60  ;;  %v540_v1 = vsel %vm3598_vm2, %v535_v63, %v539_v58  ;;  %v551_v14 = vshll.u32 %v475_v9, 16  ;;  %v586_v49 = vrot.slane %v584_v38, 4  ;;  %v595_v54 = vrot.slane %v593_v41, 5  ;;  %v3425_v57 = vld [vmem:[%s4095_s1 + $0x90] sm:$0xff]   ;;  %v767_v60 = vld [vmem:[%s3573_s26] sm:$0xe] }
  0x20   : > { %v2721_v3 = vcombine.low %v526_v0, %v540_v1  ;;  %v544_v19 = vrot.slane %v542_v12, 4  ;;  %v547_v20 = vrot.slane %v545_v13, 5  ;;  %v769_v63 = vld [vmem:[%s3573_s26 + $0x8] sm:$0xe]  ;;  %v770_v0 = vld [vmem:[%s3573_s26 + $0xc] sm:$0x1] }
  0x21   : > { %3170 = vmatpush3.bf16.msra.mxu0 %v3405_v10  ;;  %v476_v10 = vld [vmem:[%s3573_s26 + $0x28] sm:$0xf]  ;;  %v553_v22 = vrot.slane %v551_v14, 5  ;;  %v808_v9 = vrot.slane %v770_v0, 5  ;;  %v774_v13 = vld [vmem:[%s3573_s26 + $0x1c] sm:$0x1] }
  0x22   : > { %3194 = vmatpush3.bf16.msra.mxu1 %v3406_v11  ;;  %3171 = vmatprep.subr.bf16.mxu0 %v3407_v16  ;;  %v477_v11 = vld [vmem:[%s3573_s26 + $0x2c] sm:$0x1]  ;;  %v556_v15 = vshrl.u32 %v476_v10, 16  ;;  %v548_v26 = vor.u32 %v547_v20, %v544_v19  ;;  %v816_v19 = vrot.slane %v774_v13, 5  ;;  %v776_v28 = vld [vmem:[%s3573_s26 + $0x24] sm:$0x1] }
  0x23   : > { %3195 = vmatprep.subr.bf16.mxu1 %v3408_v18  ;;  %v565_v17 = vshll.u32 %v477_v11, 16  ;;  %v3428_v8 = vld [vmem:[%s4095_s1 + $0xc8] sm:$0xff]   ;;  %v773_v11 = vld [vmem:[%s3573_s26 + $0x18] sm:$0xe]  ;;  %v820_v32 = vrot.slane %v776_v28, 5 }
  0x24   : > { %v558_v23 = vrot.slane %v556_v15, 4  ;;  %v549_v33 = vrot.slane %v548_v26, 4  ;;  %v3434_v26 = vld [vmem:[%s4095_s1 + $0x178] sm:$0xff]   ;;  %v778_v30 = vld [vmem:[%s3573_s26 + $0x2c] sm:$0x1] }
  0x25   : > { %3172 = vmatpush3.bf16.msra.mxu0 %v3407_v16  ;;  %v559_v16 = vshll.u32 %v476_v10, 16  ;;  %v567_v25 = vrot.slane %v565_v17, 5  ;;  %v772_v10 = vld [vmem:[%s3573_s26 + $0x14] sm:$0x1]  ;;  %v779_v36 = vld [vmem:[%s3573_s26 + $0x30] sm:$0xe] }
  0x26   : > { %3196 = vmatpush3.bf16.msra.mxu1 %v3408_v18  ;;  %3173 = vmatprep.subr.bf16.mxu0 %v3409_v39  ;;  %v3419_v18 = vld [vmem:[%s4095_s1 + $0xa0] sm:$0xff]   ;;  %v554_v43 = vsel %vm3598_vm2, %v549_v33, %v553_v22  ;;  %v812_v15 = vrot.slane %v772_v10, 5  ;;  %v781_v41 = vld [vmem:[%s3573_s26 + $0x38] sm:$0xe]  ;;  %v2805_v0 = vld [vmem:[%s3573_s26 + $0xc] sm:$0x1] }
  0x27   : > { %3197 = vmatprep.subr.bf16.mxu1 %v3410_v45  ;;  %v561_v24 = vrot.slane %v559_v16, 5  ;;  %v3429_v16 = vld [vmem:[%s4095_s1 + $0x80] sm:$0xff]  }
  0x28   : > { %v3430_v22 = vld [vmem:[%s4095_s1 + $0xc0] sm:$0xff]  }
  0x29   : > { %3174 = vmatpush3.bf16.msra.mxu0 %v3409_v39  ;;  %v562_v29 = vor.u32 %v561_v24, %v558_v23  ;;  %v587_v39 = vshll.u32 %v480_v31, 16  ;;  %v3431_v23 = vld [vmem:[%s4095_s1 + $0x138] sm:$0xff]  }
  0x2a   : > { %3198 = vmatpush3.bf16.msra.mxu1 %v3410_v45  ;;  %3207 = vmatprep.subr.bf16.mxu0 %v3413_v59  ;;  %v575_v45 = vrot.slane %v573_v35, 5  ;;  %v3433_v33 = vld [vmem:[%s3573_s26 + $0x18] ss:$8 sps:$4 sm:$0xff]   ;;  %v824_v35 = vrot.slane %v778_v30, 5 }
  0x2b   : > { %3231 = vmatprep.subr.bf16.mxu1 %v3414_v62  ;;  %v563_v37 = vrot.slane %v562_v29, 4  ;;  %v589_v50 = vrot.slane %v587_v39, 5  ;;  %v777_v29 = vld [vmem:[%s3573_s26 + $0x28] sm:$0xe] }
  0x2c   : > { %3176 = vmatmul.mubr.bf16.vlgmr.msra.gmra.mxu0 %v3412_v56  ;;  %v576_v52 = vor.u32 %v575_v45, %v572_v44  ;;  %v2737_v34 = vrot.slane %v777_v29, 9 }
  0x2d   : > { %3200 = vmatmul.mubr.bf16.vlgmr.msra.gmra.mxu1 %v2721_v3  ;;  %3208 = vmatpush3.bf16.msra.mxu0 %v3413_v59  ;;  %v568_v46 = vsel %vm3598_vm2, %v563_v37, %v567_v25  ;;  %v590_v53 = vor.u32 %v589_v50, %v586_v49  ;;  %v3426_v59 = vld [vmem:[%s4095_s1 + $0xd0] sm:$0xff]   ;;  %v2732_v3 = vrot.slane %v767_v60, 9  ;;  %v3442_v60 = vld [vmem:[%s4095_s1 + $0x160] sm:$0xff]  }
  0x2e   : > { %3232 = vmatpush3.bf16.msra.mxu1 %v3414_v62  ;;  %3209 = vmatprep.subr.bf16.mxu0 %v3415_v2  ;;  %v2722_v51 = vcombine.low %v554_v43, %v568_v46  ;;  %v577_v56 = vrot.slane %v576_v52, 4  ;;  %v768_v62 = vld [vmem:[%s3573_s26 + $0x4] sm:$0x1]  ;;  %v780_v37 = vld [vmem:[%s3573_s26 + $0x34] sm:$0x1]  ;;  %v2738_v43 = vrot.slane %v779_v36, 9  ;;  %v825_v45 = vsel %vm3659_vm5, %v2737_v34, %v824_v35 }
  0x2f   : > { %3233 = vmatprep.subr.bf16.mxu1 %v3416_v4  ;;  %3179 = vmatprep.mubr.bf16.mxu0 %v3422_v7  ;;  %v591_v58 = vrot.slane %v590_v53, 4  ;;  %v828_v44 = vrot.slane %v780_v37, 5  ;;  %v2739_v46 = vrot.slane %v781_v41, 9  ;;  %v3436_v49 = vld [vmem:[%s4095_s1 + $0x170] sm:$0xff]   ;;  %v2848_v35 = vld [vmem:[%s3573_s26 + $0x8] sm:$0xe] }
  0x30   : > { %3203 = vmatprep.mubr.bf16.mxu1 %v2722_v51  ;;  %v582_v61 = vsel %vm3598_vm2, %v577_v56, %v581_v48  ;;  %v3435_v48 = vld [vmem:[%s4095_s1 + $0x130] sm:$0xff]   ;;  %v3440_v56 = vld [vmem:[%s4095_s1 + $0x168] sm:$0xff]  }
  0x31   : > { %3210 = vmatpush3.bf16.msra.mxu0 %v3415_v2  ;;  %v596_v1 = vsel %vm3598_vm2, %v591_v58, %v595_v54  ;;  %v3427_v2 = vld [vmem:[%s4095_s1 + $0x88] sm:$0xff]   ;;  %v829_v52 = vsel %vm3659_vm5, %v2738_v43, %v828_v44  ;;  %v3439_v58 = vld [vmem:[%s3573_s26 + $0x38] ss:$8 sps:$4 sm:$0xff]  }
  0x32   : > { %3234 = vmatpush3.bf16.msra.mxu1 %v3416_v4  ;;  %3211 = vmatprep.subr.bf16.mxu0 %v3417_v5  ;;  %v804_v4 = vrot.slane %v768_v62, 5  ;;  %v2723_v7 = vcombine.low %v582_v61, %v596_v1  ;;  %v3438_v51 = vld [vmem:[%s3573_s26 + $0x28] ss:$8 sps:$4 sm:$0xff]   ;;  %v3443_v61 = vld [vmem:[%s4095_s1 + $0x118] sm:$0xff]   ;;  %v2849_v41 = vld [vmem:[%s3573_s26 + $0xc] sm:$0x1] }
  0x33   : > { %3235 = vmatprep.subr.bf16.mxu1 %v3418_v6  ;;  %v3437_v54 = vld [vmem:[%s4095_s1 + $0x128] sm:$0xff]   ;;  %v3444_v62 = vld [vmem:[%s4095_s1 + $0x158] sm:$0xff]   ;;  %v3445_v1 = vld [vmem:[%s4095_s1 + $0x110] sm:$0xff]  }
  0x34   : > { %3180 = vmatmul.mubr.bf16.gmra.mxu0 %v3424_v27  ;;  %v805_v12 = vsel %vm3659_vm5, %v2732_v3, %v804_v4  ;;  %v775_v27 = vld [vmem:[%s3573_s26 + $0x20] sm:$0xe]  ;;  %v2807_v3 = vld [vmem:[%s3573_s26 + $0x14] sm:$0x1] }
  0x35   : > { %3212 = vmatpush3.bf16.msra.mxu0 %v3417_v5  ;;  %v2733_v5 = vrot.slane %v769_v63, 9  ;;  %3204 = vmatmul.mubr.bf16.gmra.mxu1 %v2723_v7  ;;  %v2736_v31 = vrot.slane %v775_v27, 9  ;;  %v2804_v63 = vld [vmem:[%s3573_s26 + $0x8] sm:$0xf]  ;;  %v1217_v7 = vshll.u32 %v2805_v0, 16  ;;  %v1231_v10 = vshll.u32 %v2807_v3, 16 }
  0x36   : > { %3236 = vmatpush3.bf16.msra.mxu1 %v3418_v6  ;;  %3213 = vmatprep.subr.bf16.mxu0 %v3419_v18  ;;  %v771_v6 = vld [vmem:[%s3573_s26 + $0x10] sm:$0xe]  ;;  %v1208_v4 = vshrl.u32 %v2804_v63, 16 }
  0x37   : > { %3237 = vmatprep.subr.bf16.mxu1 %v3420_v21  ;;  %v2734_v14 = vrot.slane %v771_v6, 9  ;;  %v809_v17 = vsel %vm3659_vm5, %v2733_v5, %v808_v9  ;;  %v821_v39 = vsel %vm3659_vm5, %v2736_v31, %v820_v32  ;;  %v1211_v5 = vshll.u32 %v2804_v63, 16  ;;  %v3446_v6 = vld [vmem:[%s4095_s1 + $0x150] sm:$0xff]  }
  0x38   : > { %v2756_v20 = vcombine.low %v805_v12, %v809_v17  ;;  %v2758_v50 = vcombine.low %v821_v39, %v825_v45  ;;  %v1210_v12 = vrot.slane %v1208_v4, 4  ;;  %v2850_v45 = vld [vmem:[%s3573_s26 + $0x10] sm:$0xe]  ;;  %v3451_v4 = vld [vmem:[%s4095_s1 + $0x1b8] sm:$0xff]  }
  0x39   : > { %3214 = vmatpush3.bf16.msra.mxu0 %v3419_v18  ;;  %v2735_v18 = vrot.slane %v773_v11, 9  ;;  %v813_v24 = vsel %vm3659_vm5, %v2734_v14, %v812_v15  ;;  %v2808_v11 = vld [vmem:[%s3573_s26 + $0x18] sm:$0xf]  ;;  %v1213_v13 = vrot.slane %v1211_v5, 5  ;;  %v2809_v14 = vld [vmem:[%s3573_s26 + $0x1c] sm:$0x1] }
  0x3a   : > { %3238 = vmatpush3.bf16.msra.mxu1 %v3420_v21  ;;  %3215 = vmatprep.subr.bf16.mxu0 %v3421_v42  ;;  %v3432_v21 = vld [vmem:[%s3573_s26 + $0x8] ss:$8 sps:$4 sm:$0xff]   ;;  %v2810_v15 = vld [vmem:[%s3573_s26 + $0x20] sm:$0xf] }
  0x3b   : > { %3239 = vmatprep.subr.bf16.mxu1 %v3423_v47  ;;  %3223 = vmatprep.mubr.bf16.mxu0 %v2756_v20  ;;  %v817_v25 = vsel %vm3659_vm5, %v2735_v18, %v816_v19  ;;  %v1233_v19 = vrot.slane %v1231_v10, 5  ;;  %v2811_v20 = vld [vmem:[%s3573_s26 + $0x24] sm:$0x1]  ;;  %v1250_v28 = vshrl.u32 %v2810_v15, 16  ;;  %v1253_v29 = vshll.u32 %v2810_v15, 16 }
  0x3c   : > { %3247 = vmatprep.mubr.bf16.mxu1 %v3432_v21  ;;  %v2757_v38 = vcombine.low %v813_v24, %v817_v25  ;;  %v3447_v21 = vld [vmem:[%s4095_s1 + $0x108] sm:$0xff]   ;;  %v1239_v24 = vshll.u32 %v2808_v11, 16  ;;  %v1245_v25 = vshll.u32 %v2809_v14, 16  ;;  %v1259_v30 = vshll.u32 %v2811_v20, 16  ;;  %v3452_v14 = vld [vmem:[%s4095_s1 + $0x1f8] sm:$0xff]   ;;  %v3453_v20 = vld [vmem:[%s4095_s1 + $0x1b0] sm:$0xff]  }
  0x3d   : > { %3216 = vmatpush3.bf16.msra.mxu0 %v3421_v42  ;;  %v782_v42 = vld [vmem:[%s3573_s26 + $0x3c] sm:$0x1]  ;;  %v1252_v37 = vrot.slane %v1250_v28, 4  ;;  %v2812_v10 = vld [vmem:[%s3573_s26 + $0x28] sm:$0xf] }
  0x3e   : > { %3240 = vmatpush3.bf16.msra.mxu1 %v3423_v47  ;;  %3217 = vmatprep.subr.bf16.mxu0 %v3425_v57  ;;  %v832_v47 = vrot.slane %v782_v42, 5  ;;  %v1247_v34 = vrot.slane %v1245_v25, 5  ;;  %v1261_v39 = vrot.slane %v1259_v30, 5  ;;  %v3449_v42 = vld [vmem:[%s4095_s1 + $0x100] sm:$0xff]   ;;  %v2815_v15 = vld [vmem:[%s3573_s26 + $0x34] sm:$0x1] }
  0x3f   : > { %3241 = vmatprep.subr.bf16.mxu1 %v3426_v59  ;;  %v2817_v28 = vld [vmem:[%s3573_s26 + $0x3c] sm:$0x1] }
  0x40   : > { %v833_v53 = vsel %vm3659_vm5, %v2739_v46, %v832_v47  ;;  %v2851_v46 = vld [vmem:[%s3573_s26 + $0x14] sm:$0x1]  ;;  %v2864_v47 = vrot.slane %v2848_v35, 9 }
  0x41   : > { %3218 = vmatpush3.bf16.msra.mxu0 %v3425_v57  ;;  %v2759_v57 = vcombine.low %v829_v52, %v833_v53  ;;  %v1527_v52 = vrot.slane %v2851_v46, 5  ;;  %v2852_v53 = vld [vmem:[%s3573_s26 + $0x18] sm:$0xe]  ;;  %v3454_v35 = vld [vmem:[%s4095_s1 + $0x1f0] sm:$0xff]  }
  0x42   : > { %3242 = vmatpush3.bf16.msra.mxu1 %v3426_v59  ;;  %3219 = vmatprep.subr.bf16.mxu0 %v3427_v2  ;;  %v3441_v59 = vld [vmem:[%s4095_s1 + $0x120] sm:$0xff]  }
  0x43   : > { %3243 = vmatprep.subr.bf16.mxu1 %v3428_v8 }
  0x45   : > { %3220 = vmatpush3.bf16.msra.mxu0 %v3427_v2  ;;  %v2806_v2 = vld [vmem:[%s3573_s26 + $0x10] sm:$0xf] }
  0x46   : > { %3244 = vmatpush3.bf16.msra.mxu1 %v3428_v8  ;;  %3221 = vmatprep.subr.bf16.mxu0 %v3429_v16  ;;  %v1222_v8 = vshrl.u32 %v2806_v2, 16  ;;  %v1225_v9 = vshll.u32 %v2806_v2, 16 }
  0x47   : > { %3245 = vmatprep.subr.bf16.mxu1 %v3430_v22 }
  0x48   : > { %v1224_v17 = vrot.slane %v1222_v8, 4  ;;  %v1227_v18 = vrot.slane %v1225_v9, 5 }
  0x49   : > { %3222 = vmatpush3.bf16.msra.mxu0 %v3429_v16  ;;  %v1219_v16 = vrot.slane %v1217_v7, 5 }
  0x4a   : > { %3246 = vmatpush3.bf16.msra.mxu1 %v3430_v22  ;;  %3255 = vmatprep.subr.bf16.mxu0 %v3431_v23  ;;  %v1214_v22 = vor.u32 %v1213_v13, %v1210_v12  ;;  %v1228_v27 = vor.u32 %v1227_v18, %v1224_v17  ;;  %v2814_v12 = vld [vmem:[%s3573_s26 + $0x30] sm:$0xf]  ;;  %v1267_v17 = vshll.u32 %v2812_v10, 16 }
  0x4b   : > { %3279 = vmatprep.subr.bf16.mxu1 %v3434_v26 }
  0x4c   : > { %3224 = vmatmul.mubr.bf16.vlgmr.msra.gmra.mxu0 %v2757_v38  ;;  %v1215_v31 = vrot.slane %v1214_v22, 4  ;;  %v1229_v36 = vrot.slane %v1228_v27, 4  ;;  %v1255_v38 = vrot.slane %v1253_v29, 5  ;;  %v1281_v22 = vshll.u32 %v2814_v12, 16 }
  0x4d   : > { %3256 = vmatpush3.bf16.msra.mxu0 %v3431_v23  ;;  %3248 = vmatmul.mubr.bf16.vlgmr.msra.gmra.mxu1 %v3433_v33  ;;  %v1236_v23 = vshrl.u32 %v2808_v11, 16  ;;  %v1241_v33 = vrot.slane %v1239_v24, 5  ;;  %v2813_v11 = vld [vmem:[%s3573_s26 + $0x2c] sm:$0x1]  ;;  %v2816_v24 = vld [vmem:[%s3573_s26 + $0x38] sm:$0xf] }
  0x4e   : > { %3280 = vmatpush3.bf16.msra.mxu1 %v3434_v26  ;;  %3257 = vmatprep.subr.bf16.mxu0 %v3435_v48  ;;  %v3448_v26 = vld [vmem:[%s4095_s1 + $0x148] sm:$0xff]   ;;  %v1220_v43 = vsel %vm3598_vm2, %v1215_v31, %v1219_v16  ;;  %v1264_v16 = vshrl.u32 %v2812_v10, 16  ;;  %v1273_v18 = vshll.u32 %v2813_v11, 16  ;;  %v1292_v29 = vshrl.u32 %v2816_v24, 16  ;;  %v2863_v11 = vld [vmem:[%s3573_s26 + $0x44] sm:$0x1] }
  0x4f   : > { %3281 = vmatprep.subr.bf16.mxu1 %v3436_v49  ;;  %3227 = vmatprep.mubr.bf16.mxu0 %v2758_v50  ;;  %v1238_v32 = vrot.slane %v1236_v23, 4  ;;  %v1256_v50 = vor.u32 %v1255_v38, %v1252_v37  ;;  %v1287_v23 = vshll.u32 %v2815_v15, 16  ;;  %v1283_v31 = vrot.slane %v1281_v22, 5  ;;  %v2819_v37 = vld [vmem:[%s3573_s26 + $0x44] sm:$0x1]  ;;  %v3459_v22 = vld [vmem:[%s4095_s1 + $0x198] sm:$0xff]  }
  0x50   : > { %3251 = vmatprep.mubr.bf16.mxu1 %v3438_v51  ;;  %v2865_v51 = vrot.slane %v2850_v45, 9  ;;  %v1266_v25 = vrot.slane %v1264_v16, 4  ;;  %v1275_v27 = vrot.slane %v1273_v18, 5  ;;  %v1294_v38 = vrot.slane %v1292_v29, 4  ;;  %v3467_v29 = vld [vmem:[%s3573_s26 + $0x10] ss:$8 sps:$4 sm:$0xff]  }
  0x51   : > { %3258 = vmatpush3.bf16.msra.mxu0 %v3435_v48  ;;  %v1242_v44 = vor.u32 %v1241_v33, %v1238_v32  ;;  %v1523_v48 = vrot.slane %v2849_v41, 5  ;;  %v1257_v63 = vrot.slane %v1256_v50, 4  ;;  %v1289_v32 = vrot.slane %v1287_v23, 5  ;;  %v2818_v33 = vld [vmem:[%s3573_s26 + $0x40] sm:$0xf] }
  0x52   : > { %3282 = vmatpush3.bf16.msra.mxu1 %v3436_v49  ;;  %3259 = vmatprep.subr.bf16.mxu0 %v3437_v54  ;;  %v1234_v49 = vsel %vm3598_vm2, %v1229_v36, %v1233_v19  ;;  %v1528_v0 = vsel %vm3659_vm5, %v2865_v51, %v1527_v52  ;;  %v1306_v41 = vshrl.u32 %v2818_v33, 16  ;;  %v1315_v45 = vshll.u32 %v2819_v37, 16 }
  0x53   : > { %3283 = vmatprep.subr.bf16.mxu1 %v3440_v56  ;;  %v1262_v7 = vsel %vm3598_vm2, %v1257_v63, %v1261_v39  ;;  %v1301_v39 = vshll.u32 %v2817_v28, 16  ;;  %v1551_v18 = vrot.slane %v2863_v11, 5  ;;  %v3462_v28 = vld [vmem:[%s4095_s1 + $0x1d0] sm:$0xff]  }
  0x54   : > { %3228 = vmatmul.mubr.bf16.gmra.mxu0 %v2759_v57  ;;  %v1243_v57 = vrot.slane %v1242_v44, 4  ;;  %v1309_v44 = vshll.u32 %v2818_v33, 16  ;;  %v2937_v33 = vld [vmem:[%s3573_s26 + $0x14] sm:$0x1] }
  0x55   : > { %3260 = vmatpush3.bf16.msra.mxu0 %v3437_v54  ;;  %3252 = vmatmul.mubr.bf16.gmra.mxu1 %v3439_v58  ;;  %v2853_v54 = vld [vmem:[%s3573_s26 + $0x1c] sm:$0x1]  ;;  %v1524_v58 = vsel %vm3659_vm5, %v2864_v47, %v1523_v48  ;;  %v1303_v47 = vrot.slane %v1301_v39, 5  ;;  %v1308_v48 = vrot.slane %v1306_v41, 4  ;;  %v1936_v39 = vshll.u32 %v2937_v33, 16 }
  0x56   : > { %3284 = vmatpush3.bf16.msra.mxu1 %v3440_v56  ;;  %3261 = vmatprep.subr.bf16.mxu0 %v3441_v59  ;;  %v2836_v56 = vcombine.low %v1220_v43, %v1234_v49  ;;  %v1248_v3 = vsel %vm3598_vm2, %v1243_v57, %v1247_v34  ;;  %v2888_v5 = vcombine.low %v1524_v58, %v1528_v0  ;;  %v1295_v34 = vshll.u32 %v2816_v24, 16  ;;  %v3455_v49 = vld [vmem:[%s4095_s1 + $0x1a8] sm:$0xff]  }
  0x57   : > { %3285 = vmatprep.subr.bf16.mxu1 %v3442_v60  ;;  %v2837_v13 = vcombine.low %v1248_v3, %v1262_v7  ;;  %v1311_v52 = vrot.slane %v1309_v44, 5  ;;  %v2857_v58 = vld [vmem:[%s3573_s26 + $0x2c] sm:$0x1]  ;;  %v2862_v7 = vld [vmem:[%s3573_s26 + $0x40] sm:$0xe] }
  0x58   : > { %3271 = vmatprep.mubr.bf16.mxu0 %v2836_v56  ;;  %3295 = vmatprep.mubr.bf16.mxu1 %v2888_v5  ;;  %v1297_v43 = vrot.slane %v1295_v34, 5  ;;  %v3456_v56 = vld [vmem:[%s4095_s1 + $0x1e8] sm:$0xff]   ;;  %v2938_v34 = vld [vmem:[%s3573_s26 + $0x18] sm:$0xf] }
  0x59   : > { %3262 = vmatpush3.bf16.msra.mxu0 %v3441_v59  ;;  %v2854_v59 = vld [vmem:[%s3573_s26 + $0x20] sm:$0xe]  ;;  %v1312_v63 = vor.u32 %v1311_v52, %v1308_v48  ;;  %v1941_v41 = vshrl.u32 %v2938_v34, 16 }
  0x5a   : > { %3286 = vmatpush3.bf16.msra.mxu1 %v3442_v60  ;;  %3263 = vmatprep.subr.bf16.mxu0 %v3443_v61  ;;  %v2855_v60 = vld [vmem:[%s3573_s26 + $0x24] sm:$0x1]  ;;  %v2867_v2 = vrot.slane %v2854_v59, 9  ;;  %v1298_v51 = vor.u32 %v1297_v43, %v1294_v38  ;;  %v2858_v59 = vld [vmem:[%s3573_s26 + $0x30] sm:$0xe]  ;;  %v1944_v43 = vshll.u32 %v2938_v34, 16 }
  0x5b   : > { %3287 = vmatprep.subr.bf16.mxu1 %v3444_v62  ;;  %v2869_v5 = vrot.slane %v2858_v59, 9  ;;  %v1313_v10 = vrot.slane %v1312_v63, 4 }
  0x5c   : > { %v1946_v52 = vrot.slane %v1944_v43, 5 }
  0x5d   : > { %3264 = vmatpush3.bf16.msra.mxu0 %v3443_v61  ;;  %v2866_v61 = vrot.slane %v2852_v53, 9  ;;  %v1317_v53 = vrot.slane %v1315_v45, 5  ;;  %v2940_v45 = vld [vmem:[%s3573_s26 + $0x20] sm:$0xf] }
  0x5e   : > { %3288 = vmatpush3.bf16.msra.mxu1 %v3444_v62  ;;  %3265 = vmatprep.subr.bf16.mxu0 %v3445_v1  ;;  %v3450_v62 = vld [vmem:[%s4095_s1 + $0x140] sm:$0xff]  }
  0x5f   : > { %3289 = vmatprep.subr.bf16.mxu1 %v3446_v6 }
  0x61   : > { %3266 = vmatpush3.bf16.msra.mxu0 %v3445_v1  ;;  %v1531_v1 = vrot.slane %v2853_v54, 5  ;;  %v2856_v54 = vld [vmem:[%s3573_s26 + $0x28] sm:$0xe] }
  0x62   : > { %3290 = vmatpush3.bf16.msra.mxu1 %v3446_v6  ;;  %3267 = vmatprep.subr.bf16.mxu0 %v3447_v21  ;;  %v1535_v6 = vrot.slane %v2855_v60, 5  ;;  %v2859_v60 = vld [vmem:[%s3573_s26 + $0x34] sm:$0x1]  ;;  %v2868_v0 = vrot.slane %v2856_v54, 9  ;;  %v2943_v54 = vld [vmem:[%s3573_s26 + $0x2c] sm:$0x1] }
  0x63   : > { %3291 = vmatprep.subr.bf16.mxu1 %v3448_v26  ;;  %v1532_v8 = vsel %vm3659_vm5, %v2866_v61, %v1531_v1  ;;  %v2860_v1 = vld [vmem:[%s3573_s26 + $0x38] sm:$0xe] }
  0x64   : > { %v1536_v9 = vsel %vm3659_vm5, %v2867_v2, %v1535_v6  ;;  %v2861_v2 = vld [vmem:[%s3573_s26 + $0x3c] sm:$0x1]  ;;  %v1543_v6 = vrot.slane %v2859_v60, 5 }
  0x65   : > { %3268 = vmatpush3.bf16.msra.mxu0 %v3447_v21  ;;  %v2889_v19 = vcombine.low %v1532_v8, %v1536_v9  ;;  %v1278_v21 = vshrl.u32 %v2814_v12, 16  ;;  %v3457_v8 = vld [vmem:[%s4095_s1 + $0x1a0] sm:$0xff]   ;;  %v2870_v12 = vrot.slane %v2860_v1, 9  ;;  %v1978_v1 = vshll.u32 %v2943_v54, 16 }
  0x66   : > { %3292 = vmatpush3.bf16.msra.mxu1 %v3448_v26  ;;  %3269 = vmatprep.subr.bf16.mxu0 %v3449_v42  ;;  %v1269_v26 = vrot.slane %v1267_v17, 5  ;;  %v1544_v16 = vsel %vm3659_vm5, %v2869_v5, %v1543_v6  ;;  %v2871_v17 = vrot.slane %v2862_v7, 9 }
  0x67   : > { %3293 = vmatprep.subr.bf16.mxu1 %v3450_v62  ;;  %v1280_v30 = vrot.slane %v1278_v21, 4 }
  0x68   : > { %v1270_v36 = vor.u32 %v1269_v26, %v1266_v25  ;;  %v1552_v24 = vsel %vm3659_vm5, %v2871_v17, %v1551_v18  ;;  %v3460_v25 = vld [vmem:[%s4095_s1 + $0x1d8] sm:$0xff]   ;;  %v3470_v18 = vld [vmem:[%s4095_s1 + $0x230] sm:$0xff]  }
  0x69   : > { %3270 = vmatpush3.bf16.msra.mxu0 %v3449_v42  ;;  %v1284_v42 = vor.u32 %v1283_v31, %v1280_v30  ;;  %v3463_v30 = vld [vmem:[%s4095_s1 + $0x188] sm:$0xff]  }
  0x6a   : > { %3294 = vmatpush3.bf16.msra.mxu1 %v3450_v62  ;;  %3303 = vmatprep.subr.bf16.mxu0 %v3451_v4  ;;  %v1271_v46 = vrot.slane %v1270_v36, 4  ;;  %v1299_v62 = vrot.slane %v1298_v51, 4  ;;  %v3464_v31 = vld [vmem:[%s4095_s1 + $0x1c8] sm:$0xff]   ;;  %v2939_v36 = vld [vmem:[%s3573_s26 + $0x1c] sm:$0x1] }
  0x6b   : > { %3327 = vmatprep.subr.bf16.mxu1 %v3452_v14  ;;  %v1285_v50 = vrot.slane %v1284_v42, 4  ;;  %v3466_v42 = vld [vmem:[%s4095_s1 + $0x1c0] sm:$0xff]   ;;  %v1950_v44 = vshll.u32 %v2939_v36, 16  ;;  %v2942_v51 = vld [vmem:[%s3573_s26 + $0x28] sm:$0xf] }
  0x6c   : > { %3272 = vmatmul.mubr.bf16.vlgmr.msra.gmra.mxu0 %v2837_v13  ;;  %v1276_v57 = vsel %vm3598_vm2, %v1271_v46, %v1275_v27  ;;  %v1304_v9 = vsel %vm3598_vm2, %v1299_v62, %v1303_v47  ;;  %v1547_v13 = vrot.slane %v2861_v2, 5  ;;  %v3461_v27 = vld [vmem:[%s4095_s1 + $0x190] sm:$0xff]   ;;  %v2941_v46 = vld [vmem:[%s3573_s26 + $0x24] sm:$0x1]  ;;  %v1969_v60 = vshrl.u32 %v2942_v51, 16 }
  0x6d   : > { %3304 = vmatpush3.bf16.msra.mxu0 %v3451_v4  ;;  %3296 = vmatmul.mubr.bf16.vlgmr.msra.gmra.mxu1 %v2889_v19  ;;  %v1290_v61 = vsel %vm3598_vm2, %v1285_v50, %v1289_v32  ;;  %v1539_v4 = vrot.slane %v2857_v58, 5  ;;  %v1318_v19 = vsel %vm3598_vm2, %v1313_v10, %v1317_v53  ;;  %v2936_v32 = vld [vmem:[%s3573_s26 + $0x10] sm:$0xf]  ;;  %v1943_v50 = vrot.slane %v1941_v41, 4  ;;  %v3468_v2 = vld [vmem:[%s3573_s26 + $0x20] ss:$8 sps:$4 sm:$0xff]  }
  0x6e   : > { %3328 = vmatpush3.bf16.msra.mxu1 %v3452_v14  ;;  %3305 = vmatprep.subr.bf16.mxu0 %v3453_v20  ;;  %v2838_v3 = vcombine.low %v1276_v57, %v1290_v61  ;;  %v3458_v14 = vld [vmem:[%s4095_s1 + $0x1e0] sm:$0xff]   ;;  %v1548_v21 = vsel %vm3659_vm5, %v2870_v12, %v1547_v13  ;;  %v2839_v23 = vcombine.low %v1304_v9, %v1318_v19  ;;  %v1927_v37 = vshrl.u32 %v2936_v32, 16  ;;  %v3471_v13 = vld [vmem:[%s3573_s26 + $0x30] ss:$8 sps:$4 sm:$0xff]  }
  0x6f   : > { %3329 = vmatprep.subr.bf16.mxu1 %v3454_v35  ;;  %v1540_v15 = vsel %vm3659_vm5, %v2868_v0, %v1539_v4  ;;  %v2891_v26 = vcombine.low %v1548_v21, %v1552_v24  ;;  %v1930_v38 = vshll.u32 %v2936_v32, 16  ;;  %v1952_v53 = vrot.slane %v1950_v44, 5  ;;  %v2944_v19 = vld [vmem:[%s3573_s26 + $0x30] sm:$0xf]  ;;  %v3473_v32 = vld [vmem:[%s4095_s1 + $0x228] sm:$0xff]  }
  0x70   : > { %3275 = vmatprep.mubr.bf16.mxu0 %v2838_v3  ;;  %v1929_v47 = vrot.slane %v1927_v37, 4  ;;  %v1958_v57 = vshll.u32 %v2940_v45, 16  ;;  %v1964_v59 = vshll.u32 %v2941_v46, 16  ;;  %v1972_v61 = vshll.u32 %v2942_v51, 16  ;;  %v3469_v3 = vld [vmem:[%s4095_s1 + $0x238] sm:$0xff]  }
  0x71   : > { %3306 = vmatpush3.bf16.msra.mxu0 %v3453_v20  ;;  %v2890_v20 = vcombine.low %v1540_v15, %v1544_v16  ;;  %v1932_v48 = vrot.slane %v1930_v38, 5  ;;  %v1947_v62 = vor.u32 %v1946_v52, %v1943_v50  ;;  %v1971_v5 = vrot.slane %v1969_v60, 4  ;;  %v2949_v36 = vld [vmem:[%s3573_s26 + $0x44] sm:$0x1]  ;;  %v3472_v37 = vld [vmem:[%s3573_s26 + $0x40] ss:$8 sps:$4 sm:$0xff]  }
  0x72   : > { %3330 = vmatpush3.bf16.msra.mxu1 %v3454_v35  ;;  %3307 = vmatprep.subr.bf16.mxu0 %v3455_v49  ;;  %v3465_v35 = vld [vmem:[%s4095_s1 + $0x180] sm:$0xff]   ;;  %v1960_v0 = vrot.slane %v1958_v57, 5  ;;  %v1974_v6 = vrot.slane %v1972_v61, 5  ;;  %v1966_v9 = vrot.slane %v1964_v59, 5  ;;  %v1980_v10 = vrot.slane %v1978_v1, 5 }
  0x73   : > { %3331 = vmatprep.subr.bf16.mxu1 %v3456_v56  ;;  %3299 = vmatprep.mubr.bf16.mxu1 %v2890_v20  ;;  %v1933_v58 = vor.u32 %v1932_v48, %v1929_v47  ;;  %v1948_v7 = vrot.slane %v1947_v62, 4  ;;  %v2945_v20 = vld [vmem:[%s3573_s26 + $0x34] sm:$0x1]  ;;  %v1983_v24 = vshrl.u32 %v2944_v19, 16  ;;  %v2951_v46 = vld [vmem:[%s3573_s26 + $0x4c] sm:$0x1] }
  0x74   : > { %3276 = vmatmul.mubr.bf16.gmra.mxu0 %v2839_v23  ;;  %v1975_v12 = vor.u32 %v1974_v6, %v1971_v5  ;;  %v2947_v23 = vld [vmem:[%s3573_s26 + $0x3c] sm:$0x1]  ;;  %v2020_v48 = vshll.u32 %v2949_v36, 16  ;;  %v3474_v60 = vld [vmem:[%s4095_s1 + $0x220] sm:$0xff]  }
  0x75   : > { %3308 = vmatpush3.bf16.msra.mxu0 %v3455_v49  ;;  %3300 = vmatmul.mubr.bf16.gmra.mxu1 %v2891_v26  ;;  %v1938_v49 = vrot.slane %v1936_v39, 5  ;;  %v1934_v4 = vrot.slane %v1933_v58, 4  ;;  %v1985_v33 = vrot.slane %v1983_v24, 4  ;;  %v2984_v24 = vld [vmem:[%s3573_s26 + $0x20] sm:$0xe] }
  0x76   : > { %3332 = vmatpush3.bf16.msra.mxu1 %v3456_v56  ;;  %3309 = vmatprep.subr.bf16.mxu0 %v3457_v8  ;;  %v1955_v56 = vshrl.u32 %v2940_v45, 16  ;;  %v1976_v17 = vrot.slane %v1975_v12, 4  ;;  %v2980_v12 = vld [vmem:[%s3573_s26 + $0x10] sm:$0xe] }
  0x77   : > { %3333 = vmatprep.subr.bf16.mxu1 %v3458_v14  ;;  %3319 = vmatprep.mubr.bf16.mxu0 %v3467_v29  ;;  %v1939_v11 = vsel %vm3598_vm2, %v1934_v4, %v1938_v49 }
  0x78   : > { %v1957_v63 = vrot.slane %v1955_v56, 4  ;;  %v1981_v26 = vsel %vm3598_vm2, %v1976_v17, %v1980_v10  ;;  %v2034_v56 = vshll.u32 %v2951_v46, 16  ;;  %v2996_v17 = vrot.slane %v2980_v12, 9 }
  0x79   : > { %3310 = vmatpush3.bf16.msra.mxu0 %v3457_v8 }
  0x7a   : > { %3334 = vmatpush3.bf16.msra.mxu1 %v3458_v14  ;;  %3311 = vmatprep.subr.bf16.mxu0 %v3459_v22  ;;  %v1961_v8 = vor.u32 %v1960_v0, %v1957_v63  ;;  %v1953_v14 = vsel %vm3598_vm2, %v1948_v7, %v1952_v53  ;;  %v2022_v63 = vrot.slane %v2020_v48, 5  ;;  %v2473_v0 = vld [vmem:[%s4098_s4] sm:$0x3]  ;;  %v3475_v7 = vld [vmem:[%s4095_s1 + $0x218] sm:$0xff]  }
  0x7b   : > { %3335 = vmatprep.subr.bf16.mxu1 %v3460_v25  ;;  %v2968_v16 = vcombine.low %v1939_v11, %v1953_v14  ;;  %v2509_v4 = vsel %vm2507_vm6, %v2473_v0, 0 }
  0x7c   : > { %v1962_v15 = vrot.slane %v1961_v8, 4 }
  0x7d   : > { %3312 = vmatpush3.bf16.msra.mxu0 %v3459_v22  ;;  %v2946_v22 = vld [vmem:[%s3573_s26 + $0x38] sm:$0xf]  ;;  %3343 = vmatprep.mubr.bf16.mxu1 %v2968_v16  ;;  %v2983_v16 = vld [vmem:[%s3573_s26 + $0x1c] sm:$0x1] }
  0x7e   : > { %3336 = vmatpush3.bf16.msra.mxu1 %v3460_v25  ;;  %3313 = vmatprep.subr.bf16.mxu0 %v3461_v27  ;;  %v1967_v21 = vsel %vm3598_vm2, %v1962_v15, %v1966_v9  ;;  %v1986_v25 = vshll.u32 %v2944_v19, 16  ;;  %v2000_v29 = vshll.u32 %v2946_v22, 16  ;;  %v3479_v9 = vld [vmem:[%s3930_s17] sm:$0xff]   ;;  %v2982_v15 = vld [vmem:[%s3573_s26 + $0x18] sm:$0xe]  ;;  %v3476_v19 = vld [vmem:[%s4095_s1 + $0x210] sm:$0xff]  }
  0x7f   : > { %3337 = vmatprep.subr.bf16.mxu1 %v3462_v28  ;;  %v2997_v40 = vrot.slane %v2982_v15, 9 }
  0x80   : > { %v1988_v34 = vrot.slane %v1986_v25, 5  ;;  %v2002_v41 = vrot.slane %v2000_v29, 5  ;;  %v3480_v25 = vld [vmem:[%s3930_s17 + $0x8] sm:$0xff]  }
  0x81   : > { %3314 = vmatpush3.bf16.msra.mxu0 %v3461_v27  ;;  %v1992_v27 = vshll.u32 %v2945_v20, 16  ;;  %v2246_v20 = vrot.slane %v2983_v16, 5  ;;  %v2987_v29 = vld [vmem:[%s3573_s26 + $0x2c] sm:$0x1] }
  0x82   : > { %3338 = vmatpush3.bf16.msra.mxu1 %v3462_v28  ;;  %3315 = vmatprep.subr.bf16.mxu0 %v3463_v30  ;;  %v1997_v28 = vshrl.u32 %v2946_v22, 16  ;;  %v1989_v44 = vor.u32 %v1988_v34, %v1985_v33  ;;  %v3477_v22 = vld [vmem:[%s4095_s1 + $0x208] sm:$0xff]   ;;  %v2991_v33 = vld [vmem:[%s3573_s26 + $0x3c] sm:$0x1]  ;;  %v3481_v34 = vld [vmem:[%s3930_s17 + $0x10] sm:$0xff]  }
  0x83   : > { %3339 = vmatprep.subr.bf16.mxu1 %v3464_v31  ;;  %v1994_v38 = vrot.slane %v1992_v27, 5  ;;  %v2985_v27 = vld [vmem:[%s3573_s26 + $0x24] sm:$0x1] }
  0x84   : > { %v1999_v39 = vrot.slane %v1997_v28, 4  ;;  %v1990_v53 = vrot.slane %v1989_v44, 4  ;;  %v2986_v28 = vld [vmem:[%s3573_s26 + $0x28] sm:$0xe]  ;;  %v2250_v36 = vrot.slane %v2985_v27, 5  ;;  %v2262_v44 = vrot.slane %v2991_v33, 5 }
  0x85   : > { %3316 = vmatpush3.bf16.msra.mxu0 %v3463_v30  ;;  %v2948_v30 = vld [vmem:[%s3573_s26 + $0x40] sm:$0xf] }
  0x86   : > { %3340 = vmatpush3.bf16.msra.mxu1 %v3464_v31  ;;  %3317 = vmatprep.subr.bf16.mxu0 %v3465_v35  ;;  %v2969_v31 = vcombine.low %v1967_v21, %v1981_v26  ;;  %v2011_v43 = vshrl.u32 %v2948_v30, 16  ;;  %v2014_v47 = vshll.u32 %v2948_v30, 16  ;;  %v2003_v49 = vor.u32 %v2002_v41, %v1999_v39  ;;  %v2988_v30 = vld [vmem:[%s3573_s26 + $0x30] sm:$0xe]  ;;  %v3478_v39 = vld [vmem:[%s4095_s1 + $0x200] sm:$0xff]  }
  0x87   : > { %3341 = vmatprep.subr.bf16.mxu1 %v3466_v42  ;;  %v1995_v61 = vsel %vm3598_vm2, %v1990_v53, %v1994_v38  ;;  %v2254_v38 = vrot.slane %v2987_v29, 5  ;;  %v3000_v41 = vrot.slane %v2988_v30, 9  ;;  %v3482_v53 = vld [vmem:[%s3930_s17 + $0x18] sm:$0xff]  }
  0x88   : > { %v2013_v50 = vrot.slane %v2011_v43, 4  ;;  %v2016_v54 = vrot.slane %v2014_v47, 5  ;;  %v2004_v57 = vrot.slane %v2003_v49, 4  ;;  %v2992_v47 = vld [vmem:[%s3573_s26 + $0x40] sm:$0xe] }
  0x89   : > { %3318 = vmatpush3.bf16.msra.mxu0 %v3465_v35  ;;  %v2006_v35 = vshll.u32 %v2947_v23, 16  ;;  %v2247_v23 = vsel %vm3659_vm5, %v2997_v40, %v2246_v20 }
  0x8a   : > { %3342 = vmatpush3.bf16.msra.mxu1 %v3466_v42  ;;  %3351 = vmatprep.subr.bf16.mxu0 %v3469_v3  ;;  %v2950_v42 = vld [vmem:[%s3573_s26 + $0x48] sm:$0xf]  ;;  %v2017_v62 = vor.u32 %v2016_v54, %v2013_v50  ;;  %v2993_v50 = vld [vmem:[%s3573_s26 + $0x44] sm:$0x1] }
  0x8b   : > { %v2008_v45 = vrot.slane %v2006_v35, 5  ;;  %v2025_v51 = vshrl.u32 %v2950_v42, 16  ;;  %v2028_v52 = vshll.u32 %v2950_v42, 16  ;;  %3385 = vmatprep.subr.msk.bf16.mxu1 %vm2507_vm6, %v2473_v0  ;;  %v2998_v35 = vrot.slane %v2984_v24, 9 }
  0x8c   : > { %3320 = vmatmul.mubr.bf16.vlgmr.msra.gmra.mxu0 %v3468_v2  ;;  %v2018_v6 = vrot.slane %v2017_v62, 4 }
  0x8d   : > { %3352 = vmatpush3.bf16.msra.mxu0 %v3469_v3  ;;  %3323 = vmatprep.mubr.bf16.mxu0 %v3471_v13  ;;  %v2027_v58 = vrot.slane %v2025_v51, 4  ;;  %v2030_v59 = vrot.slane %v2028_v52, 5  ;;  %v2009_v1 = vsel %vm3598_vm2, %v2004_v57, %v2008_v45  ;;  %v2036_v3 = vrot.slane %v2034_v56, 5  ;;  %v2981_v13 = vld [vmem:[%s3573_s26 + $0x14] sm:$0x1] }
  0x8e   : > { %3353 = vmatprep.subr.bf16.mxu0 %v3470_v18  ;;  %3344 = vmatmul.mubr.bf16.vlgmr.msra.gmra.mxu1 %v2969_v31  ;;  %v2970_v5 = vcombine.low %v1995_v61, %v2009_v1  ;;  %v2023_v10 = vsel %vm3598_vm2, %v2018_v6, %v2022_v63  ;;  %v2989_v31 = vld [vmem:[%s3573_s26 + $0x34] sm:$0x1]  ;;  %v2251_v45 = vsel %vm3659_vm5, %v2998_v35, %v2250_v36  ;;  %v2994_v51 = vld [vmem:[%s3573_s26 + $0x48] sm:$0xe]  ;;  %v2995_v52 = vld [vmem:[%s3573_s26 + $0x4c] sm:$0x1] }
  0x8f   : > { %v2031_v2 = vor.u32 %v2030_v59, %v2027_v58  ;;  %3376 = vmatpush3.bf16.msra.mxu1 %v2509_v4  ;;  %v2258_v42 = vrot.slane %v2989_v31, 5  ;;  %v3002_v56 = vrot.slane %v2992_v47, 9  ;;  %v2266_v58 = vrot.slane %v2993_v50, 5 }
  0x90   : > { %3347 = vmatprep.mubr.bf16.mxu1 %v2970_v5  ;;  %v3003_v59 = vrot.slane %v2994_v51, 9 }
  0x91   : > { %3354 = vmatpush3.bf16.msra.mxu0 %v3470_v18  ;;  %v2032_v8 = vrot.slane %v2031_v2, 4  ;;  %v2242_v18 = vrot.slane %v2981_v13, 5  ;;  %v2259_v48 = vsel %vm3659_vm5, %v3000_v41, %v2258_v42  ;;  %v2267_v61 = vsel %vm3659_vm5, %v3002_v56, %v2266_v58 }
  0x92   : > { %3355 = vmatprep.subr.bf16.mxu0 %v3473_v32 }
  0x93   : > { %v2037_v11 = vsel %vm3598_vm2, %v2032_v8, %v2036_v3  ;;  %v2243_v21 = vsel %vm3659_vm5, %v2996_v17, %v2242_v18 }
  0x94   : > { %3324 = vmatmul.mubr.bf16.gmra.mxu0 %v3472_v37  ;;  %v2971_v14 = vcombine.low %v2023_v10, %v2037_v11  ;;  %v3020_v26 = vcombine.low %v2243_v21, %v2247_v23  ;;  %v2999_v37 = vrot.slane %v2986_v28, 9 }
  0x95   : > { %3356 = vmatpush3.bf16.msra.mxu0 %v3473_v32  ;;  %v2990_v32 = vld [vmem:[%s3573_s26 + $0x38] sm:$0xe] }
  0x96   : > { %3357 = vmatprep.subr.bf16.mxu0 %v3474_v60  ;;  %3348 = vmatmul.mubr.bf16.gmra.mxu1 %v2971_v14  ;;  %v3001_v43 = vrot.slane %v2990_v32, 9  ;;  %v2255_v46 = vsel %vm3659_vm5, %v2999_v37, %v2254_v38 }
  0x97   : > { %3377 = vmatprep.mubr.msk.bf16.mxu1 %vm2494_vm7, %v3479_v9  ;;  %3367 = vmatprep.mubr.bf16.mxu0 %v3020_v26  ;;  %v3021_v54 = vcombine.low %v2251_v45, %v2255_v46 }
  0x98   : > { %v2263_v49 = vsel %vm3659_vm5, %v3001_v43, %v2262_v44 }
  0x99   : > { %3358 = vmatpush3.bf16.msra.mxu0 %v3474_v60  ;;  %v3022_v57 = vcombine.low %v2259_v48, %v2263_v49  ;;  %v2270_v60 = vrot.slane %v2995_v52, 5 }
  0x9a   : > { %3359 = vmatprep.subr.bf16.mxu0 %v3475_v7 }
  0x9b   : > { %v2271_v62 = vsel %vm3659_vm5, %v3003_v59, %v2270_v60 }
  0x9c   : > { %v3023_v63 = vcombine.low %v2267_v61, %v2271_v62 }
  0x9d   : > { %3360 = vmatpush3.bf16.msra.mxu0 %v3475_v7 }
  0x9e   : > { %3361 = vmatprep.subr.bf16.mxu0 %v3476_v19  ;;  %3378 = vmatmul.mubr.msk.bf16.vlgmr.msra.gmra.mxu1 %vm2494_vm7, %v3480_v25 }
  0x9f   : > { %3381 = vmatprep.mubr.msk.bf16.mxu1 %vm2494_vm7, %v3481_v34 }
  0xa1   : > { %3362 = vmatpush3.bf16.msra.mxu0 %v3476_v19 }
  0xa2   : > { %3363 = vmatprep.subr.bf16.mxu0 %v3477_v22 }
  0xa5   : > { %3364 = vmatpush3.bf16.msra.mxu0 %v3477_v22 }
  0xa6   : > { %3365 = vmatprep.subr.bf16.mxu0 %v3478_v39  ;;  %3382 = vmatmul.mubr.msk.bf16.gmra.mxu1 %vm2494_vm7, %v3482_v53 }
  0xa9   : > { %3366 = vmatpush3.bf16.msra.mxu0 %v3478_v39 }
  0xac   : > { %3368 = vmatmul.mubr.bf16.vlgmr.msra.gmra.mxu0 %v3021_v54 }
  0xad   : > { %3371 = vmatprep.mubr.bf16.mxu0 %v3022_v57 }
  0xb4   : > { %3372 = vmatmul.mubr.bf16.gmra.mxu0 %v3023_v63 }
  0xec   : > { %v3177_v0 = vpop.f32.mrf.mxu0 }
  0xed   : > { %v3201_v1 = vpop.f32.mrf.mxu1 }
  0xee   : > { %v419_v2 = vpop.f32.mrf.mxu0  ;;  %v753_v54 = vadd.f32 %v3201_v1, %v3177_v0 }
  0xef   : > { %v720_v3 = vpop.f32.mrf.mxu1 }
  0xf0   : > { %v3178_v4 = vpop.f32.mrf.mxu0  ;;  %v751_v57 = vadd.f32 %v720_v3, %v419_v2 }
  0xf1   : > { %v3202_v5 = vpop.f32.mrf.mxu1 }
  0xf2   : > { %v422_v6 = vpop.f32.mrf.mxu0  ;;  %v754_v60 = vadd.f32 %v3202_v5, %v3178_v4 }
  0xf3   : > { %v723_v7 = vpop.f32.mrf.mxu1 }
  0xf4   : > { %v3992_v8 = vpop.f32.mrf.mxu0 }
  0xf5   : > { %v3994_v9 = vpop.f32.mrf.mxu1 }
  0xf6   : > { %v3996_v10 = vpop.f32.mrf.mxu0  ;;  %v757_v0 = vadd.f32 %v3994_v9, %v3992_v8 }
  0xf7   : > { %v736_v11 = vpop.f32.mrf.mxu1 }
  0xf8   : > { %v3998_v12 = vpop.f32.mrf.mxu0  ;;  %v755_v1 = vadd.f32 %v736_v11, %v3996_v10 }
  0xf9   : > { %v4000_v55 = vpop.f32.mrf.mxu1 }
  0xfa   : > { %v4002_v13 = vpop.f32.mrf.mxu0 }
  0xfb   : > { %v4004_v14 = vpop.f32.mrf.mxu1 }
 0x10c   : > { %v3225_v15 = vpop.f32.mrf.mxu0 }
 0x10d   : > { %v3249_v16 = vpop.f32.mrf.mxu1  ;;  %v990_v58 = vadd.f32 %v3225_v15, %v753_v54 }
 0x10e   : > { %v957_v17 = vpop.f32.mrf.mxu0 }
 0x10f   : > { %v1144_v18 = vpop.f32.mrf.mxu1  ;;  %v988_v61 = vadd.f32 %v957_v17, %v751_v57 }
 0x110   : > { %v3226_v19 = vpop.f32.mrf.mxu0 }
 0x111   : > { %v3250_v40 = vpop.f32.mrf.mxu1 }
 0x112   : > { %v960_v20 = vpop.f32.mrf.mxu0 }
 0x113   : > { %v1147_v21 = vpop.f32.mrf.mxu1 }
 0x114   : > { %v3229_v22 = vpop.f32.mrf.mxu0 }
 0x115   : > { %v4006_v23 = vpop.f32.mrf.mxu1 }
 0x116   : > { %v973_v24 = vpop.f32.mrf.mxu0 }
 0x117   : > { %v4008_v25 = vpop.f32.mrf.mxu1  ;;  %v992_v15 = vadd.f32 %v973_v24, %v755_v1 }
 0x118   : > { %v3230_v26 = vpop.f32.mrf.mxu0 }
 0x119   : > { %v4010_v27 = vpop.f32.mrf.mxu1 }
 0x11a   : > { %v4012_v28 = vpop.f32.mrf.mxu0 }
 0x11b   : > { %v4014_v29 = vpop.f32.mrf.mxu1 }
 0x11c   : > { %4105 = vst [vmem:[#allocation3_spill] sm:$0xff] %v4014_v29 }
 0x12c   : > { %v3273_v30 = vpop.f32.mrf.mxu0 }
 0x12d   : > { %v3297_v31 = vpop.f32.mrf.mxu1 }
 0x12e   : > { %v1442_v32 = vpop.f32.mrf.mxu0 }
 0x12f   : > { %v1676_v33 = vpop.f32.mrf.mxu1 }
 0x130   : > { %v3274_v34 = vpop.f32.mrf.mxu0 }
 0x131   : > { %v3298_v35 = vpop.f32.mrf.mxu1 }
 0x132   : > { %v1445_v36 = vpop.f32.mrf.mxu0 }
 0x133   : > { %v1679_v37 = vpop.f32.mrf.mxu1 }
 0x134   : > { %v3277_v38 = vpop.f32.mrf.mxu0 }
 0x135   : > { %v4016_v39 = vpop.f32.mrf.mxu1 }
 0x136   : > { %4106 = vst [vmem:[#allocation4_spill] sm:$0xff] %v4016_v39  ;;  %v1458_v41 = vpop.f32.mrf.mxu0 }
 0x137   : > { %v4018_v42 = vpop.f32.mrf.mxu1 }
 0x138   : > { %4107 = vst [vmem:[#allocation5_spill] sm:$0xff] %v4018_v42  ;;  %v3278_v43 = vpop.f32.mrf.mxu0 }
 0x139   : > { %v4020_v44 = vpop.f32.mrf.mxu1 }
 0x13a   : > { %4108 = vst [vmem:[#allocation6_spill] sm:$0xff] %v4020_v44  ;;  %v4022_v45 = vpop.f32.mrf.mxu0  ;;  %v1177_v44 = vadd.f32 %v3249_v16, %v990_v58 }
 0x13b   : > { %4109 = vst [vmem:[#allocation7_spill] sm:$0xff] %v4022_v45  ;;  %v4024_v46 = vpop.f32.mrf.mxu1  ;;  %v991_v45 = vadd.f32 %v3226_v19, %v754_v60  ;;  %v756_v19 = vadd.f32 %v4004_v14, %v4002_v13 }
 0x13c   : > { %4110 = vst [vmem:[#allocation8_spill] sm:$0xff] %v4024_v46  ;;  %v752_v46 = vadd.f32 %v723_v7, %v422_v6  ;;  %v1475_v29 = vadd.f32 %v3273_v30, %v1177_v44  ;;  %v758_v6 = vadd.f32 %v4000_v55, %v3998_v12  ;;  %v994_v7 = vadd.f32 %v3229_v22, %v757_v0 }
 0x13d   : > { %v1178_v3 = vadd.f32 %v3250_v40, %v991_v45  ;;  %v993_v12 = vadd.f32 %v4012_v28, %v756_v19 }
 0x13e   : > { %v989_v39 = vadd.f32 %v960_v20, %v752_v46  ;;  %v1709_v17 = vadd.f32 %v3297_v31, %v1475_v29  ;;  %v995_v20 = vadd.f32 %v3230_v26, %v758_v6  ;;  %v1181_v40 = vadd.f32 %v4006_v23, %v994_v7  ;;  %v4053_v23 = vld [vmem:[%s4096_s2] ss:$0 sm:$0xff] }
 0x140   : > { %v1176_v16 = vadd.f32 %v1147_v21, %v989_v39  ;;  %v1182_v21 = vadd.f32 %v4010_v27, %v995_v20  ;;  %v1479_v24 = vadd.f32 %v3277_v38, %v1181_v40 }
 0x141   : > { %v4118_v54 = vld [vmem:[#allocation6_spill] sm:$0xff] }
 0x142   : > { %v1474_v10 = vadd.f32 %v1445_v36, %v1176_v16  ;;  %v1480_v39 = vadd.f32 %v3278_v43, %v1182_v21 }
 0x143   : > { %v4120_v6 = vld [vmem:[#allocation8_spill] sm:$0xff] }
 0x144   : > { %v1708_v14 = vadd.f32 %v1679_v37, %v1474_v10  ;;  %v4116_v37 = vld [vmem:[#allocation7_spill] sm:$0xff]  ;;  %v1714_v57 = vadd.f32 %v4118_v54, %v1480_v39 }
 0x14c   : > { %v3321_v47 = vpop.f32.mrf.mxu0 }
 0x14d   : > { %v1896_v11 = vadd.f32 %v3321_v47, %v1709_v17 }
 0x14e   : > { %v3345_v48 = vpop.f32.mrf.mxu1  ;;  %v1863_v50 = vpop.f32.mrf.mxu0 }
 0x14f   : > { %v2194_v26 = vadd.f32 %v3345_v48, %v1896_v11 }
 0x150   : > { %v2161_v49 = vpop.f32.mrf.mxu1  ;;  %v3322_v52 = vpop.f32.mrf.mxu0 }
 0x152   : > { %v4026_v51 = vpop.f32.mrf.mxu1  ;;  %v1866_v56 = vpop.f32.mrf.mxu0 }
 0x153   : > { %4111 = vst [vmem:[#allocation9_spill] sm:$0xff] %v4026_v51  ;;  %v1175_v51 = vadd.f32 %v1144_v18, %v988_v61  ;;  %v1476_v18 = vadd.f32 %v3274_v34, %v1178_v3  ;;  %v1895_v28 = vadd.f32 %v1866_v56, %v1708_v14  ;;  %v3041_v56 = vld [vmem:[%s4099_s5] ss:$0 sm:$0xff] }
 0x154   : > { %v4028_v53 = vpop.f32.mrf.mxu1  ;;  %v3325_v63 = vpop.f32.mrf.mxu0 }
 0x155   : > { %4112 = vst [vmem:[#allocation10_spill] sm:$0xff] %v4028_v53  ;;  %v1473_v4 = vadd.f32 %v1442_v32, %v1175_v51  ;;  %v1179_v32 = vadd.f32 %v4008_v25, %v992_v15  ;;  %v1710_v55 = vadd.f32 %v3298_v35, %v1476_v18  ;;  %v4114_v35 = vld [vmem:[#allocation4_spill] sm:$0xff] }
 0x156   : > { %v4030_v59 = vpop.f32.mrf.mxu1  ;;  %v1879_v2 = vpop.f32.mrf.mxu0  ;;  %v1713_v38 = vadd.f32 %v4114_v35, %v1479_v24 }
 0x157   : > { %v1707_v9 = vadd.f32 %v1676_v33, %v1473_v4  ;;  %v1477_v29 = vadd.f32 %v1458_v41, %v1179_v32  ;;  %v1897_v34 = vadd.f32 %v3322_v52, %v1710_v55  ;;  %v4113_v33 = vld [vmem:[#allocation3_spill] sm:$0xff]  ;;  %v4115_v41 = vld [vmem:[#allocation5_spill] sm:$0xff] }
 0x158   : > { %v4032_v62 = vpop.f32.mrf.mxu1  ;;  %v3326_v30 = vpop.f32.mrf.mxu0  ;;  %v1180_v36 = vadd.f32 %v4113_v33, %v993_v12  ;;  %v1900_v58 = vadd.f32 %v3325_v63, %v1713_v38 }
 0x159   : > { %v1894_v22 = vadd.f32 %v1863_v50, %v1707_v9  ;;  %v1711_v45 = vadd.f32 %v4115_v41, %v1477_v29  ;;  %v1901_v15 = vadd.f32 %v3326_v30, %v1714_v57 }
 0x15a   : > { %v4034_v42 = vpop.f32.mrf.mxu1  ;;  %v1882_v31 = vpop.f32.mrf.mxu0  ;;  %v1478_v46 = vadd.f32 %v4116_v37, %v1180_v36  ;;  %v4117_v50 = vld [vmem:[#allocation9_spill] sm:$0xff]  ;;  %v2198_v20 = vadd.f32 %v4030_v59, %v1900_v58 }
 0x15b   : > { %v2192_v25 = vadd.f32 %v2161_v49, %v1894_v22  ;;  %v2195_v43 = vadd.f32 %v4117_v50, %v1897_v34  ;;  %v1898_v49 = vadd.f32 %v1879_v2, %v1711_v45  ;;  %v2199_v32 = vadd.f32 %v4034_v42, %v1901_v15 }
 0x15c   : > { %v4036_v53 = vpop.f32.mrf.mxu1  ;;  %v4119_v61 = vld [vmem:[#allocation10_spill] sm:$0xff]  ;;  %v1712_v7 = vadd.f32 %v4120_v6, %v1478_v46 }
 0x15d   : > { %v2193_v0 = vadd.f32 %v4119_v61, %v1895_v28  ;;  %v2196_v9 = vadd.f32 %v4032_v62, %v1898_v49 }
 0x15e   : > { %v3379_v5 = vpop.f32.mrf.mxu1  ;;  %v1899_v10 = vadd.f32 %v1882_v31, %v1712_v7 }
 0x160   : > { %v2545_v8 = vpop.f32.mrf.mxu1  ;;  %v2197_v29 = vadd.f32 %v4036_v53, %v1899_v10 }
 0x162   : > { %v3380_v13 = vpop.f32.mrf.mxu1 }
 0x164   : > { %v2548_v48 = vpop.f32.mrf.mxu1 }
 0x166   : > { %v3383_v17 = vpop.f32.mrf.mxu1 }
 0x168   : > { %v2561_v59 = vpop.f32.mrf.mxu1 }
 0x16a   : > { %v3384_v36 = vpop.f32.mrf.mxu1 }
 0x16c   : > { %v3369_v44 = vpop.f32.mrf.mxu0  ;;  %v2564_v37 = vpop.f32.mrf.mxu1 }
 0x16d   : > { %v2428_v27 = vadd.f32 %v3369_v44, %v2194_v26 }
 0x16e   : > { %v2395_v47 = vpop.f32.mrf.mxu0 }
 0x16f   : > { %v2459_v51 = vadd.f32 %v4053_v23, %v2428_v27  ;;  %v2426_v52 = vadd.f32 %v2395_v47, %v2192_v25 }
 0x170   : > { %v3370_v60 = vpop.f32.mrf.mxu0 }
 0x171   : > { %v2578_v1 = vadd.f32 %v3379_v5, %v2459_v51  ;;  %v2457_v3 = vadd.f32 %v4053_v23, %v2426_v52  ;;  %v2429_v4 = vadd.f32 %v3370_v60, %v2195_v43 }
 0x172   : > { %v2398_v16 = vpop.f32.mrf.mxu0 }
 0x173   : > { %v2593_v18 = vadd.f32 %v3041_v56, %v2578_v1  ;;  %v2576_v63 = vadd.f32 %v2545_v8, %v2457_v3  ;;  %v2460_v2 = vadd.f32 %v4053_v23, %v2429_v4  ;;  %v2427_v19 = vadd.f32 %v2398_v16, %v2193_v0 }
 0x174   : > { %v3373_v5 = vpop.f32.mrf.mxu0 }
 0x175   : > { %v2601_v30 = vmax.f32 %v2593_v18, 0.0  ;;  %v2591_v11 = vadd.f32 %v3041_v56, %v2576_v63  ;;  %v2579_v40 = vadd.f32 %v3380_v13, %v2460_v2  ;;  %v2458_v8 = vadd.f32 %v4053_v23, %v2427_v19 }
 0x176   : > { %v2432_v12 = vadd.f32 %v3373_v5, %v2198_v20  ;;  %v2411_v55 = vpop.f32.mrf.mxu0 }
 0x177   : > { %2609 = vst [vmem:[%s4074_s10 + $0x10] sm:$0xff] %v2601_v30  ;;  %v2599_v62 = vmax.f32 %v2591_v11, 0.0  ;;  %v2594_v22 = vadd.f32 %v3041_v56, %v2579_v40  ;;  %v2577_v21 = vadd.f32 %v2548_v48, %v2458_v8  ;;  %v2430_v24 = vadd.f32 %v2411_v55, %v2196_v9 }
 0x178   : > { %v2463_v31 = vadd.f32 %v4053_v23, %v2432_v12  ;;  %v3374_v14 = vpop.f32.mrf.mxu0 }
 0x179   : > { %2607 = vst [vmem:[%s4074_s10] sm:$0xff] %v2599_v62  ;;  %v2602_v13 = vmax.f32 %v2594_v22, 0.0  ;;  %v2592_v26 = vadd.f32 %v3041_v56, %v2577_v21  ;;  %v2461_v42 = vadd.f32 %v4053_v23, %v2430_v24  ;;  %v2433_v34 = vadd.f32 %v3374_v14, %v2199_v32 }
 0x17a   : > { %v2582_v33 = vadd.f32 %v3383_v17, %v2463_v31  ;;  %v2414_v39 = vpop.f32.mrf.mxu0 }
 0x17b   : > { %2610 = vst [vmem:[%s4074_s10 + $0x18] sm:$0xff] %v2602_v13  ;;  %v2600_v44 = vmax.f32 %v2592_v26, 0.0  ;;  %v2580_v25 = vadd.f32 %v2561_v59, %v2461_v42  ;;  %v2464_v53 = vadd.f32 %v4053_v23, %v2433_v34  ;;  %v2431_v28 = vadd.f32 %v2414_v39, %v2197_v29 }
 0x17c   : > { %v2597_v27 = vadd.f32 %v3041_v56, %v2582_v33 }
 0x17d   : > { %2608 = vst [vmem:[%s4074_s10 + $0x8] sm:$0xff] %v2600_v44  ;;  %v2595_v35 = vadd.f32 %v3041_v56, %v2580_v25  ;;  %v2583_v38 = vadd.f32 %v3384_v36, %v2464_v53  ;;  %v2462_v41 = vadd.f32 %v4053_v23, %v2431_v28 }
 0x17e   : > { %v2605_v45 = vmax.f32 %v2597_v27, 0.0 }
 0x17f   : > { %v2603_v46 = vmax.f32 %v2595_v35, 0.0  ;;  %v2598_v47 = vadd.f32 %v3041_v56, %v2583_v38  ;;  %v2581_v48 = vadd.f32 %v2564_v37, %v2462_v41 }
 0x180   : > { %2613 = vst [vmem:[%s4074_s10 + $0x30] sm:$0xff] %v2605_v45 }
 0x181   : > { %2611 = vst [vmem:[%s4074_s10 + $0x20] sm:$0xff] %v2603_v46  ;;  %v2606_v50 = vmax.f32 %v2598_v47, 0.0  ;;  %v2596_v43 = vadd.f32 %v3041_v56, %v2581_v48 }
 0x183   : > { %2614 = vst [vmem:[%s4074_s10 + $0x38] sm:$0xff] %v2606_v50  ;;  %v2604_v51 = vmax.f32 %v2596_v43, 0.0 }
 0x185   : > { %2612 = vst [vmem:[%s4074_s10 + $0x28] sm:$0xff] %v2604_v51 }
 0x186 PF: > { %s16_s21 = sadd.s32 1, %s3489_s21  }
 0x187   : > { %p13_p4 = scmp.ge.s32.totalorder %s16_s21, 4  }
 0x189   :  { %15 = sbr.rel (!%p13_p4) target bundleno = 1 (0x1), region = 87 }

</bundles_post_ra>
